<compile_context>
chip_gen: v7x
topology: tpu7x:2x2x1
jax: 0.10.0
libtpu: 0.0.40
codegen_flags: <defaults>
</compile_context>

<pallas_src>
import math

import jax
import jax.numpy as jnp
from jax import lax
from jax.experimental import pallas as pl
from jax.experimental.pallas import tpu as pltpu


def _round_up(x, m):
    return (x + m - 1) // m * m


# -----------------------------------------------------------------------------
# Pallas kernel: TT GRU-D timesteps per grid point.  grid = (batch_blocks, T//TT)
# -----------------------------------------------------------------------------
def grud_block_kernel(seq_ref,                       # (TT, tb, 4D) f32  [x|xl|m|d]
                      xmean_ref, gx_diag_ref, gx_b_ref,   # (1, D) f32 each
                      w_x3_ref,                      # (D, 3Hp)  bf16
                      w_md_ref,                      # (2D, 4Hp) bf16 [[w_m3,0],[0,gh_w]]
                      b3_ref,                        # (1, 3Hp)  f32
                      gh_b_ref,                      # (1, Hp)   f32
                      w_h_zr_ref,                    # (Hp, 2Hp) bf16
                      wh_h_ref,                      # (Hp, Hp)  bf16
                      hid_ref,                       # (TT, tb, Hp) bf16 out
                      h_scr):                        # (tb, Hp)  f32 VMEM carry
    Hp = h_scr.shape[1]
    D = gx_diag_ref.shape[1]
    TT = seq_ref.shape[0]

    # Reset the hidden-state carry at the first time block of every batch block.
    @pl.when(pl.program_id(1) == 0)
    def _():
        h_scr[...] = jnp.zeros_like(h_scr)

    xmean = xmean_ref[...]
    gx_diag = gx_diag_ref[...]
    gx_b = gx_b_ref[...]
    gh_b = gh_b_ref[...]
    b3 = b3_ref[...]

    def step(tt, h):
        s = seq_ref[tt]                      # (tb, 4D) f32, one load per step
        x = s[:, :D]
        x_last = s[:, D:2 * D]
        mask = s[:, 2 * D:3 * D]
        delta = s[:, 3 * D:]
        md = s[:, 2 * D:]                    # contiguous [mask | delta] (tb, 2D)

        # gamma_x: FilterLinear with identity filter == diagonal linear.
        delta_x = jnp.exp(-jnp.maximum(delta * gx_diag + gx_b, 0.0))
        one_minus_mask = 1.0 - mask
        x_imp = mask * x + one_minus_mask * (delta_x * x_last
                                             + (1.0 - delta_x) * xmean)

        # Fused [mask|delta] matmul: cols [:3Hp] = mask@w_m3, cols [3Hp:] = delta@gh_w.
        md_out = jnp.dot(md.astype(jnp.bfloat16), w_md_ref[...],
                         preferred_element_type=jnp.float32)        # (tb, 4Hp)
        gates_m = md_out[:, :3 * Hp]
        delta_h = jnp.exp(-jnp.maximum(md_out[:, 3 * Hp:] + gh_b, 0.0))

        h = delta_h * h

        # Fused gate matmuls.  Column layout of the 3Hp / 2Hp results: [z | r | h~].
        gates_x = (jnp.dot(x_imp.astype(jnp.bfloat16), w_x3_ref[...],
                           preferred_element_type=jnp.float32)
                   + gates_m + b3)                                   # (tb, 3Hp)
        gates_h = jnp.dot(h.astype(jnp.bfloat16), w_h_zr_ref[...],
                          preferred_element_type=jnp.float32)        # (tb, 2Hp)

        zr = jax.nn.sigmoid(gates_x[:, :2 * Hp] + gates_h)           # one EUP pass
        z = zr[:, :Hp]
        r = zr[:, Hp:]
        h_tilde = jnp.tanh(gates_x[:, 2 * Hp:]
                           + jnp.dot((r * h).astype(jnp.bfloat16), wh_h_ref[...],
                                     preferred_element_type=jnp.float32))
        h_new = h + z * (h_tilde - h)

        hid_ref[tt] = h_new.astype(hid_ref.dtype)
        return h_new

    h_final = lax.fori_loop(0, TT, step, h_scr[...], unroll=(TT <= 16))
    h_scr[...] = h_final


# -----------------------------------------------------------------------------
# Wrapper
# -----------------------------------------------------------------------------
def grud_forward_pallas(X, X_last_obsv, Mask, Delta, packed, hidden_size,
                        *, batch_block=None, time_block=None):
    """X, X_last_obsv, Mask, Delta: (B, T, D) float32.  Returns (fc_out, hidden_seq)."""
    B, T, D = X.shape
    H = hidden_size
    Hp = packed["wh_h"].shape[1]

    # Batch blocking: on v7x pass batch_block = round_to_8(B // 2) to use both TCs.
    tb = B if batch_block is None else batch_block
    assert B % tb == 0, "batch_block must divide the batch size"
    if tb != B:
        assert tb % 8 == 0, "batch_block must be a multiple of 8 (sublane tile)"

    # Time blocking: TT recurrent steps per grid point.
    if time_block is None:
        TT = T
        if T > 32:
            for cand in (32, 16, 8, 4, 2, 1):
                if T % cand == 0:
                    TT = cand
                    break
    else:
        TT = time_block
    assert T % TT == 0, "time_block must divide the sequence length"

    # One time-major (T, B, 4D) stream: [x | x_last | mask | delta].
    seq = jnp.concatenate([X, X_last_obsv, Mask, Delta], axis=-1)    # (B, T, 4D)
    seq = jnp.transpose(seq, (1, 0, 2)).astype(jnp.float32)          # (T, B, 4D)

    weights = (packed["xmean"], packed["gx_diag"], packed["gx_b"],
               packed["w_x3"], packed["w_md"], packed["b3"], packed["gh_b"],
               packed["w_h_zr"], packed["wh_h"])

    seq_spec = pl.BlockSpec((TT, tb, 4 * D), lambda b, t: (t, b, 0))

    def const_spec(a):
        nd = a.ndim
        return pl.BlockSpec(a.shape, lambda b, t, _n=nd: (0,) * _n)

    in_specs = [seq_spec] + [const_spec(w) for w in weights]
    out_spec = pl.BlockSpec((TT, tb, Hp), lambda b, t: (t, b, 0))

    w_bytes = sum(int(w.size) * int(w.dtype.itemsize) for w in weights)
    cost = pl.CostEstimate(
        flops=2 * T * B * (D * 3 * Hp + 2 * D * 4 * Hp + Hp * 2 * Hp + Hp * Hp),
        transcendentals=T * B * (D + 4 * Hp),
        bytes_accessed=T * B * 4 * D * 4 + T * B * Hp * 2 + w_bytes,
    )

    hid_tm = pl.pallas_call(
        grud_block_kernel,
        out_shape=jax.ShapeDtypeStruct((T, B, Hp), jnp.bfloat16),
        grid_spec=pltpu.PrefetchScalarGridSpec(
            num_scalar_prefetch=0,
            grid=(B // tb, T // TT),
            in_specs=in_specs,
            out_specs=out_spec,
            scratch_shapes=[pltpu.VMEM((tb, Hp), jnp.float32)],
        ),
        compiler_params=pltpu.CompilerParams(
            # time axis MUST stay innermost + "arbitrary" (sequential recurrence).
            dimension_semantics=("parallel", "arbitrary"),
            # Safe on all generations (v7x has 64 MiB physical VMEM); raise on
            # v5e/v6e together with larger tb/TT when shapes are big.
            vmem_limit_bytes=48 * 1024 * 1024,
        ),
        cost_estimate=cost,
    )(seq, *weights)

    # fc head on the time-major Hp-padded slab (padded rows of wfc are zero, so exact).
    fc_out = jnp.einsum("tbh,hc->btc", hid_tm.astype(jnp.float32), packed["wfc"]) \
        + packed["bfc"]                                              # (B, T, 2)
    hidden_seq = jnp.transpose(hid_tm[:, :, :H], (1, 0, 2)).astype(jnp.float32)
    # torch: self.fc(torch.squeeze(outputs, 0)) — squeeze only bites when B == 1.
    if B == 1:
        fc_out = fc_out[0]
    return fc_out, hidden_seq


# -----------------------------------------------------------------------------
# Parameter init (mirrors nn.Linear / FilterLinear reset_parameters) + packing
# -----------------------------------------------------------------------------
def init_params(key, D, H, x_mean):
    def linear(k, in_f, out_f):
        stdv = 1.0 / math.sqrt(in_f)
        kw, kb = jax.random.split(k)
        w = jax.random.uniform(kw, (out_f, in_f), jnp.float32, -stdv, stdv)
        b = jax.random.uniform(kb, (out_f,), jnp.float32, -stdv, stdv)
        return w, b

    k = jax.random.split(key, 6)
    wz, bz = linear(k[0], D + H + D, H)
    wr, br = linear(k[1], D + H + D, H)
    wh, bh = linear(k[2], D + H + D, H)
    wgx, bgx = linear(k[3], D, D)       # FilterLinear(D, D) with identity filter
    wgh, bgh = linear(k[4], D, H)
    wfc, bfc = linear(k[5], H, 2)

    def split_t(w):  # (H, D+H+D) -> (D,H), (H,H), (D,H) pre-transposed blocks
        return w[:, :D].T, w[:, D:D + H].T, w[:, D + H:].T

    wz_x, wz_h, wz_m = split_t(wz)
    wr_x, wr_h, wr_m = split_t(wr)
    wh_x, wh_h, wh_m = split_t(wh)

    return dict(
        xmean=x_mean.reshape(1, D).astype(jnp.float32),
        gx_diag=jnp.diag(wgx).reshape(1, D), gx_b=bgx.reshape(1, D),
        gh_w=wgh.T, gh_b=bgh.reshape(1, H),
        wz_x=wz_x, wz_h=wz_h, wz_m=wz_m, bz=bz.reshape(1, H),
        wr_x=wr_x, wr_h=wr_h, wr_m=wr_m, br=br.reshape(1, H),
        wh_x=wh_x, wh_h=wh_h, wh_m=wh_m, bh=bh.reshape(1, H),
        wfc=wfc.T, bfc=bfc.reshape(1, 2),
    )


def pack_params(p, lane=128, mm_dtype=jnp.bfloat16):
    """Pad hidden to a lane multiple, fuse gate weights, cast MXU operands to bf16.

    Zero padding keeps the padded hidden columns exactly 0 through the
    recurrence, so slicing the output back to H (and the padded fc) is exact.
    """
    H = p["bz"].shape[1]
    D = p["gx_diag"].shape[1]
    Hp = _round_up(H, lane)

    def pad_c(w):   # pad last (output) dim H -> Hp
        return jnp.pad(w, ((0, 0), (0, Hp - w.shape[1])))

    def pad_rc(w):  # pad an (H, H) matrix to (Hp, Hp)
        return jnp.pad(w, ((0, Hp - w.shape[0]), (0, Hp - w.shape[1])))

    w_x3 = jnp.concatenate([pad_c(p["wz_x"]), pad_c(p["wr_x"]), pad_c(p["wh_x"])], axis=1)
    w_m3 = jnp.concatenate([pad_c(p["wz_m"]), pad_c(p["wr_m"]), pad_c(p["wh_m"])], axis=1)
    gh_w = pad_c(p["gh_w"])                                           # (D, Hp)
    # Block-diagonal fused [mask|delta] weight: (2D, 4Hp) = [[w_m3, 0], [0, gh_w]]
    w_md = jnp.concatenate(
        [jnp.concatenate([w_m3, jnp.zeros((D, Hp), jnp.float32)], axis=1),
         jnp.concatenate([jnp.zeros((D, 3 * Hp), jnp.float32), gh_w], axis=1)],
        axis=0)

    b3 = jnp.concatenate([pad_c(p["bz"]), pad_c(p["br"]), pad_c(p["bh"])], axis=1)
    w_h_zr = jnp.concatenate([pad_rc(p["wz_h"]), pad_rc(p["wr_h"])], axis=1)
    wfc_p = jnp.pad(p["wfc"], ((0, Hp - H), (0, 0)))                  # (Hp, 2)

    return dict(
        xmean=p["xmean"], gx_diag=p["gx_diag"], gx_b=p["gx_b"],
        w_x3=w_x3.astype(mm_dtype),
        w_md=w_md.astype(mm_dtype),
        b3=b3, gh_b=pad_c(p["gh_b"]),
        w_h_zr=w_h_zr.astype(mm_dtype),
        wh_h=pad_rc(p["wh_h"]).astype(mm_dtype),
        wfc=wfc_p, bfc=p["bfc"],
    )


# -----------------------------------------------------------------------------
# Pure-JAX f32 reference (mirrors GRUD.forward / GRUD.step exactly)
# -----------------------------------------------------------------------------
def grud_forward_ref(X, XL, M, DL, p):
    B, T, D = X.shape
    H = p["bz"].shape[1]
    h = jnp.zeros((B, H), jnp.float32)
    outs = []
    for t in range(T):
        x, xl, m, d = X[:, t], XL[:, t], M[:, t], DL[:, t]
        delta_x = jnp.exp(-jnp.maximum(0.0, d * p["gx_diag"] + p["gx_b"]))
        delta_h = jnp.exp(-jnp.maximum(0.0, d @ p["gh_w"] + p["gh_b"]))
        x_imp = m * x + (1 - m) * (delta_x * xl + (1 - delta_x) * p["xmean"])
        h = delta_h * h
        z = jax.nn.sigmoid(x_imp @ p["wz_x"] + h @ p["wz_h"] + m @ p["wz_m"] + p["bz"])
        r = jax.nn.sigmoid(x_imp @ p["wr_x"] + h @ p["wr_h"] + m @ p["wr_m"] + p["br"])
        h_tilde = jnp.tanh(x_imp @ p["wh_x"] + (r * h) @ p["wh_h"] + m @ p["wh_m"] + p["bh"])
        h = (1 - z) * h + z * h_tilde
        outs.append(h)
    outputs = jnp.stack(outs, axis=1)               # (B, T, H)
    fc = outputs @ p["wfc"] + p["bfc"]              # (B, T, 2)
    if B == 1:
        fc = fc[0]
    return fc, outputs


if __name__ == "__main__":
    B, T, D, H = 2, 8, 16, 32   # batch, seq, input_size, hidden_size

    key = jax.random.PRNGKey(0)
    k_x, k_m, k_d, k_mean, k_param = jax.random.split(key, 5)

    X = jax.random.normal(k_x, (B, T, D), jnp.float32)
    Mask = (jax.random.uniform(k_m, (B, T, D)) > 0.3).astype(jnp.float32)
    Delta = jax.random.uniform(k_d, (B, T, D), jnp.float32, 0.0, 3.0)
    X_last_obsv = X * Mask          # simple stand-in for forward-filled values
    X_mean = jax.random.normal(k_mean, (D,), jnp.float32) * 0.1

    params = init_params(k_param, D, H, X_mean)
    packed = pack_params(params)

    fc_out, hidden_seq = grud_forward_pallas(X, X_last_obsv, Mask, Delta, packed, H)
    jax.block_until_ready(fc_out)
    jax.block_until_ready(hidden_seq)

    fc_ref, hid_ref = grud_forward_ref(X, X_last_obsv, Mask, Delta, params)
    assert fc_out.shape == (B, T, 2) and hidden_seq.shape == (B, T, H)
    # bf16 MXU operands + bf16 hidden writeback (f32 recurrence/accumulation)
    # => slightly looser tolerance than pure f32.
    assert jnp.allclose(hidden_seq, hid_ref, atol=2e-2, rtol=2e-2)
    assert jnp.allclose(fc_out, fc_ref, atol=2e-2, rtol=2e-2)

    print("KERNEL_OK")
</pallas_src>

<mosaic_0001>
module attributes {stable_mosaic.version = 11 : i64} {
  func.func @grud_block_kernel(%arg0: i32, %arg1: i32, %arg2: memref<8x2x64xf32, #tpu.memory_space<vmem>>, %arg3: memref<1x16xf32, #tpu.memory_space<vmem>>, %arg4: memref<1x16xf32, #tpu.memory_space<vmem>>, %arg5: memref<1x16xf32, #tpu.memory_space<vmem>>, %arg6: memref<16x384xbf16, #tpu.memory_space<vmem>>, %arg7: memref<32x512xbf16, #tpu.memory_space<vmem>>, %arg8: memref<1x384xf32, #tpu.memory_space<vmem>>, %arg9: memref<1x128xf32, #tpu.memory_space<vmem>>, %arg10: memref<128x256xbf16, #tpu.memory_space<vmem>>, %arg11: memref<128x128xbf16, #tpu.memory_space<vmem>>, %arg12: memref<8x2x128xbf16, #tpu.memory_space<vmem>>, %arg13: memref<2x128xf32, #tpu.memory_space<vmem>>) attributes {dimension_semantics = [#tpu.dimension_semantics<parallel>, #tpu.dimension_semantics<arbitrary>], iteration_bounds = array<i64: 1, 1>, scalar_prefetch = 0 : i64, scratch_operands = 1 : i64, tpu.core_type = #tpu.core_type<tc>, window_params = [{transform_indices = @transform_0, window_bounds = array<i64: 8, 2, 64>}, {pipeline_mode = #tpu.pipeline_mode<synchronous>, transform_indices = @transform_1, window_bounds = array<i64: 1, 16>}, {pipeline_mode = #tpu.pipeline_mode<synchronous>, transform_indices = @transform_2, window_bounds = array<i64: 1, 16>}, {pipeline_mode = #tpu.pipeline_mode<synchronous>, transform_indices = @transform_3, window_bounds = array<i64: 1, 16>}, {pipeline_mode = #tpu.pipeline_mode<synchronous>, transform_indices = @transform_4, window_bounds = array<i64: 16, 384>}, {pipeline_mode = #tpu.pipeline_mode<synchronous>, transform_indices = @transform_5, window_bounds = array<i64: 32, 512>}, {pipeline_mode = #tpu.pipeline_mode<synchronous>, transform_indices = @transform_6, window_bounds = array<i64: 1, 384>}, {pipeline_mode = #tpu.pipeline_mode<synchronous>, transform_indices = @transform_7, window_bounds = array<i64: 1, 128>}, {pipeline_mode = #tpu.pipeline_mode<synchronous>, transform_indices = @transform_8, window_bounds = array<i64: 128, 256>}, {pipeline_mode = #tpu.pipeline_mode<synchronous>, transform_indices = @transform_9, window_bounds = array<i64: 128, 128>}, {transform_indices = @transform_10, window_bounds = array<i64: 8, 2, 128>}]} {
    %c0_i32 = arith.constant 0 : i32
    %0 = arith.cmpi eq, %arg1, %c0_i32 : i32
    %1 = arith.extui %0 : i1 to i32
    %c0_i32_0 = arith.constant 0 : i32
    %2 = arith.cmpi ne, %1, %c0_i32_0 : i32
    scf.if %2 {
      %cst_198 = arith.constant 0.000000e+00 : f32
      %602 = vector.broadcast %cst_198 : f32 to vector<2x128xf32>
      %c0_199 = arith.constant 0 : index
      %c0_200 = arith.constant 0 : index
      %603 = vector.load %arg13[%c0_199, %c0_200] : memref<2x128xf32, #tpu.memory_space<vmem>>, vector<2x128xf32>
      tpu.vector_store %arg13[%c0_199, %c0_200], %602 {strides = array<i32>} : memref<2x128xf32, #tpu.memory_space<vmem>>, vector<2x128xf32>,
    } else {
    }
    %c0 = arith.constant 0 : index
    %c0_1 = arith.constant 0 : index
    %3 = vector.load %arg3[%c0, %c0_1] : memref<1x16xf32, #tpu.memory_space<vmem>>, vector<1x16xf32>
    %c0_2 = arith.constant 0 : index
    %c0_3 = arith.constant 0 : index
    %4 = vector.load %arg4[%c0_2, %c0_3] : memref<1x16xf32, #tpu.memory_space<vmem>>, vector<1x16xf32>
    %c0_4 = arith.constant 0 : index
    %c0_5 = arith.constant 0 : index
    %5 = vector.load %arg5[%c0_4, %c0_5] : memref<1x16xf32, #tpu.memory_space<vmem>>, vector<1x16xf32>
    %c0_6 = arith.constant 0 : index
    %c0_7 = arith.constant 0 : index
    %6 = vector.load %arg9[%c0_6, %c0_7] : memref<1x128xf32, #tpu.memory_space<vmem>>, vector<1x128xf32>
    %c0_8 = arith.constant 0 : index
    %c0_9 = arith.constant 0 : index
    %7 = vector.load %arg8[%c0_8, %c0_9] : memref<1x384xf32, #tpu.memory_space<vmem>>, vector<1x384xf32>
    %c0_10 = arith.constant 0 : index
    %c0_11 = arith.constant 0 : index
    %8 = vector.load %arg13[%c0_10, %c0_11] : memref<2x128xf32, #tpu.memory_space<vmem>>, vector<2x128xf32>
    %c0_i32_12 = arith.constant 0 : i32
    %9 = arith.index_cast %c0_i32_12 : i32 to index
    %c0_13 = arith.constant 0 : index
    %c0_14 = arith.constant 0 : index
    %10 = vector.load %arg2[%9, %c0_13, %c0_14] : memref<8x2x64xf32, #tpu.memory_space<vmem>>, vector<1x2x64xf32>
    %11 = vector.shape_cast %10 : vector<1x2x64xf32> to vector<2x64xf32>
    %12 = vector.extract_strided_slice %11 {offsets = [0, 0], sizes = [2, 16], strides = [1, 1]} : vector<2x64xf32> to vector<2x16xf32>
    %13 = vector.extract_strided_slice %11 {offsets = [0, 16], sizes = [2, 16], strides = [1, 1]} : vector<2x64xf32> to vector<2x16xf32>
    %14 = vector.extract_strided_slice %11 {offsets = [0, 32], sizes = [2, 16], strides = [1, 1]} : vector<2x64xf32> to vector<2x16xf32>
    %15 = vector.extract_strided_slice %11 {offsets = [0, 48], sizes = [2, 16], strides = [1, 1]} : vector<2x64xf32> to vector<2x16xf32>
    %16 = vector.extract_strided_slice %11 {offsets = [0, 32], sizes = [2, 32], strides = [1, 1]} : vector<2x64xf32> to vector<2x32xf32>
    %17 = vector.broadcast %4 : vector<1x16xf32> to vector<2x16xf32>
    %18 = arith.mulf %15, %17 : vector<2x16xf32>
    %19 = vector.broadcast %5 : vector<1x16xf32> to vector<2x16xf32>
    %20 = arith.addf %18, %19 : vector<2x16xf32>
    %cst = arith.constant 0.000000e+00 : f32
    %21 = vector.broadcast %cst : f32 to vector<2x16xf32>
    %22 = arith.maximumf %20, %21 : vector<2x16xf32>
    %cst_15 = arith.constant 0.000000e+00 : f32
    %23 = vector.broadcast %cst_15 : f32 to vector<2x16xf32>
    %24 = arith.subf %23, %22 : vector<2x16xf32>
    %25 = math.exp %24 : vector<2x16xf32>
    %cst_16 = arith.constant 1.000000e+00 : f32
    %26 = vector.broadcast %cst_16 : f32 to vector<2x16xf32>
    %27 = arith.subf %26, %14 : vector<2x16xf32>
    %28 = arith.mulf %14, %12 : vector<2x16xf32>
    %29 = arith.mulf %25, %13 : vector<2x16xf32>
    %cst_17 = arith.constant 1.000000e+00 : f32
    %30 = vector.broadcast %cst_17 : f32 to vector<2x16xf32>
    %31 = arith.subf %30, %25 : vector<2x16xf32>
    %32 = vector.broadcast %3 : vector<1x16xf32> to vector<2x16xf32>
    %33 = arith.mulf %31, %32 : vector<2x16xf32>
    %34 = arith.addf %29, %33 : vector<2x16xf32>
    %35 = arith.mulf %27, %34 : vector<2x16xf32>
    %36 = arith.addf %28, %35 : vector<2x16xf32>
    %37 = arith.truncf %16 : vector<2x32xf32> to vector<2x32xbf16>
    %c0_18 = arith.constant 0 : index
    %c0_19 = arith.constant 0 : index
    %38 = vector.load %arg7[%c0_18, %c0_19] : memref<32x512xbf16, #tpu.memory_space<vmem>>, vector<32x512xbf16>
    %cst_20 = arith.constant dense<0.000000e+00> : vector<2x512xf32>
    %39 = tpu.matmul %37, %38, %cst_20 {dimension_numbers = #tpu.dot_dimension_numbers<[1], [0], [0], [1], [0, 0, 1, 1], [], []>} : vector<2x32xbf16>, vector<32x512xbf16>, vector<2x512xf32> -> vector<2x512xf32>
    %40 = vector.extract_strided_slice %39 {offsets = [0, 0], sizes = [2, 384], strides = [1, 1]} : vector<2x512xf32> to vector<2x384xf32>
    %41 = vector.extract_strided_slice %39 {offsets = [0, 384], sizes = [2, 128], strides = [1, 1]} : vector<2x512xf32> to vector<2x128xf32>
    %42 = vector.broadcast %6 : vector<1x128xf32> to vector<2x128xf32>
    %43 = arith.addf %41, %42 : vector<2x128xf32>
    %cst_21 = arith.constant 0.000000e+00 : f32
    %44 = vector.broadcast %cst_21 : f32 to vector<2x128xf32>
    %45 = arith.maximumf %43, %44 : vector<2x128xf32>
    %cst_22 = arith.constant 0.000000e+00 : f32
    %46 = vector.broadcast %cst_22 : f32 to vector<2x128xf32>
    %47 = arith.subf %46, %45 : vector<2x128xf32>
    %48 = math.exp %47 : vector<2x128xf32>
    %49 = arith.mulf %48, %8 : vector<2x128xf32>
    %50 = arith.truncf %36 : vector<2x16xf32> to vector<2x16xbf16>
    %c0_23 = arith.constant 0 : index
    %c0_24 = arith.constant 0 : index
    %51 = vector.load %arg6[%c0_23, %c0_24] : memref<16x384xbf16, #tpu.memory_space<vmem>>, vector<16x384xbf16>
    %cst_25 = arith.constant dense<0.000000e+00> : vector<2x384xf32>
    %52 = tpu.matmul %50, %51, %cst_25 {dimension_numbers = #tpu.dot_dimension_numbers<[1], [0], [0], [1], [0, 0, 1, 1], [], []>} : vector<2x16xbf16>, vector<16x384xbf16>, vector<2x384xf32> -> vector<2x384xf32>
    %53 = arith.addf %52, %40 : vector<2x384xf32>
    %54 = vector.broadcast %7 : vector<1x384xf32> to vector<2x384xf32>
    %55 = arith.addf %53, %54 : vector<2x384xf32>
    %56 = arith.truncf %49 : vector<2x128xf32> to vector<2x128xbf16>
    %c0_26 = arith.constant 0 : index
    %c0_27 = arith.constant 0 : index
    %57 = vector.load %arg10[%c0_26, %c0_27] : memref<128x256xbf16, #tpu.memory_space<vmem>>, vector<128x256xbf16>
    %cst_28 = arith.constant dense<0.000000e+00> : vector<2x256xf32>
    %58 = tpu.matmul %56, %57, %cst_28 {dimension_numbers = #tpu.dot_dimension_numbers<[1], [0], [0], [1], [0, 0, 1, 1], [], []>} : vector<2x128xbf16>, vector<128x256xbf16>, vector<2x256xf32> -> vector<2x256xf32>
    %59 = vector.extract_strided_slice %55 {offsets = [0, 0], sizes = [2, 256], strides = [1, 1]} : vector<2x384xf32> to vector<2x256xf32>
    %60 = arith.addf %59, %58 : vector<2x256xf32>
    %61 = arith.negf %60 : vector<2x256xf32>
    %62 = math.exp %61 : vector<2x256xf32>
    %cst_29 = arith.constant 1.000000e+00 : f32
    %63 = vector.broadcast %cst_29 : f32 to vector<2x256xf32>
    %64 = arith.addf %63, %62 : vector<2x256xf32>
    %65 = arith.divf %63, %64 : vector<2x256xf32>
    %66 = vector.extract_strided_slice %65 {offsets = [0, 0], sizes = [2, 128], strides = [1, 1]} : vector<2x256xf32> to vector<2x128xf32>
    %67 = vector.extract_strided_slice %65 {offsets = [0, 128], sizes = [2, 128], strides = [1, 1]} : vector<2x256xf32> to vector<2x128xf32>
    %68 = vector.extract_strided_slice %55 {offsets = [0, 256], sizes = [2, 128], strides = [1, 1]} : vector<2x384xf32> to vector<2x128xf32>
    %69 = arith.mulf %67, %49 : vector<2x128xf32>
    %70 = arith.truncf %69 : vector<2x128xf32> to vector<2x128xbf16>
    %c0_30 = arith.constant 0 : index
    %c0_31 = arith.constant 0 : index
    %71 = vector.load %arg11[%c0_30, %c0_31] : memref<128x128xbf16, #tpu.memory_space<vmem>>, vector<128x128xbf16>
    %cst_32 = arith.constant dense<0.000000e+00> : vector<2x128xf32>
    %72 = tpu.matmul %70, %71, %cst_32 {dimension_numbers = #tpu.dot_dimension_numbers<[1], [0], [0], [1], [0, 0, 1, 1], [], []>} : vector<2x128xbf16>, vector<128x128xbf16>, vector<2x128xf32> -> vector<2x128xf32>
    %73 = arith.addf %68, %72 : vector<2x128xf32>
    %74 = math.tanh %73 : vector<2x128xf32>
    %75 = arith.subf %74, %49 : vector<2x128xf32>
    %76 = arith.mulf %66, %75 : vector<2x128xf32>
    %77 = arith.addf %49, %76 : vector<2x128xf32>
    %78 = arith.truncf %77 : vector<2x128xf32> to vector<2x128xbf16>
    %79 = arith.index_cast %c0_i32_12 : i32 to index
    %c0_33 = arith.constant 0 : index
    %c0_34 = arith.constant 0 : index
    %80 = vector.load %arg12[%79, %c0_33, %c0_34] : memref<8x2x128xbf16, #tpu.memory_space<vmem>>, vector<1x2x128xbf16>
    %81 = vector.shape_cast %80 : vector<1x2x128xbf16> to vector<2x128xbf16>
    %82 = vector.shape_cast %78 : vector<2x128xbf16> to vector<1x2x128xbf16>
    tpu.vector_store %arg12[%79, %c0_33, %c0_34], %82 {strides = array<i32>} : memref<8x2x128xbf16, #tpu.memory_space<vmem>>, vector<1x2x128xbf16>,
    %c1_i32 = arith.constant 1 : i32
    %83 = arith.index_cast %c1_i32 : i32 to index
    %c0_35 = arith.constant 0 : index
    %c0_36 = arith.constant 0 : index
    %84 = vector.load %arg2[%83, %c0_35, %c0_36] : memref<8x2x64xf32, #tpu.memory_space<vmem>>, vector<1x2x64xf32>
    %85 = vector.shape_cast %84 : vector<1x2x64xf32> to vector<2x64xf32>
    %86 = vector.extract_strided_slice %85 {offsets = [0, 0], sizes = [2, 16], strides = [1, 1]} : vector<2x64xf32> to vector<2x16xf32>
    %87 = vector.extract_strided_slice %85 {offsets = [0, 16], sizes = [2, 16], strides = [1, 1]} : vector<2x64xf32> to vector<2x16xf32>
    %88 = vector.extract_strided_slice %85 {offsets = [0, 32], sizes = [2, 16], strides = [1, 1]} : vector<2x64xf32> to vector<2x16xf32>
    %89 = vector.extract_strided_slice %85 {offsets = [0, 48], sizes = [2, 16], strides = [1, 1]} : vector<2x64xf32> to vector<2x16xf32>
    %90 = vector.extract_strided_slice %85 {offsets = [0, 32], sizes = [2, 32], strides = [1, 1]} : vector<2x64xf32> to vector<2x32xf32>
    %91 = vector.broadcast %4 : vector<1x16xf32> to vector<2x16xf32>
    %92 = arith.mulf %89, %91 : vector<2x16xf32>
    %93 = vector.broadcast %5 : vector<1x16xf32> to vector<2x16xf32>
    %94 = arith.addf %92, %93 : vector<2x16xf32>
    %cst_37 = arith.constant 0.000000e+00 : f32
    %95 = vector.broadcast %cst_37 : f32 to vector<2x16xf32>
    %96 = arith.maximumf %94, %95 : vector<2x16xf32>
    %cst_38 = arith.constant 0.000000e+00 : f32
    %97 = vector.broadcast %cst_38 : f32 to vector<2x16xf32>
    %98 = arith.subf %97, %96 : vector<2x16xf32>
    %99 = math.exp %98 : vector<2x16xf32>
    %cst_39 = arith.constant 1.000000e+00 : f32
    %100 = vector.broadcast %cst_39 : f32 to vector<2x16xf32>
    %101 = arith.subf %100, %88 : vector<2x16xf32>
    %102 = arith.mulf %88, %86 : vector<2x16xf32>
    %103 = arith.mulf %99, %87 : vector<2x16xf32>
    %cst_40 = arith.constant 1.000000e+00 : f32
    %104 = vector.broadcast %cst_40 : f32 to vector<2x16xf32>
    %105 = arith.subf %104, %99 : vector<2x16xf32>
    %106 = vector.broadcast %3 : vector<1x16xf32> to vector<2x16xf32>
    %107 = arith.mulf %105, %106 : vector<2x16xf32>
    %108 = arith.addf %103, %107 : vector<2x16xf32>
    %109 = arith.mulf %101, %108 : vector<2x16xf32>
    %110 = arith.addf %102, %109 : vector<2x16xf32>
    %111 = arith.truncf %90 : vector<2x32xf32> to vector<2x32xbf16>
    %c0_41 = arith.constant 0 : index
    %c0_42 = arith.constant 0 : index
    %112 = vector.load %arg7[%c0_41, %c0_42] : memref<32x512xbf16, #tpu.memory_space<vmem>>, vector<32x512xbf16>
    %cst_43 = arith.constant dense<0.000000e+00> : vector<2x512xf32>
    %113 = tpu.matmul %111, %112, %cst_43 {dimension_numbers = #tpu.dot_dimension_numbers<[1], [0], [0], [1], [0, 0, 1, 1], [], []>} : vector<2x32xbf16>, vector<32x512xbf16>, vector<2x512xf32> -> vector<2x512xf32>
    %114 = vector.extract_strided_slice %113 {offsets = [0, 0], sizes = [2, 384], strides = [1, 1]} : vector<2x512xf32> to vector<2x384xf32>
    %115 = vector.extract_strided_slice %113 {offsets = [0, 384], sizes = [2, 128], strides = [1, 1]} : vector<2x512xf32> to vector<2x128xf32>
    %116 = vector.broadcast %6 : vector<1x128xf32> to vector<2x128xf32>
    %117 = arith.addf %115, %116 : vector<2x128xf32>
    %cst_44 = arith.constant 0.000000e+00 : f32
    %118 = vector.broadcast %cst_44 : f32 to vector<2x128xf32>
    %119 = arith.maximumf %117, %118 : vector<2x128xf32>
    %cst_45 = arith.constant 0.000000e+00 : f32
    %120 = vector.broadcast %cst_45 : f32 to vector<2x128xf32>
    %121 = arith.subf %120, %119 : vector<2x128xf32>
    %122 = math.exp %121 : vector<2x128xf32>
    %123 = arith.mulf %122, %77 : vector<2x128xf32>
    %124 = arith.truncf %110 : vector<2x16xf32> to vector<2x16xbf16>
    %c0_46 = arith.constant 0 : index
    %c0_47 = arith.constant 0 : index
    %125 = vector.load %arg6[%c0_46, %c0_47] : memref<16x384xbf16, #tpu.memory_space<vmem>>, vector<16x384xbf16>
    %cst_48 = arith.constant dense<0.000000e+00> : vector<2x384xf32>
    %126 = tpu.matmul %124, %125, %cst_48 {dimension_numbers = #tpu.dot_dimension_numbers<[1], [0], [0], [1], [0, 0, 1, 1], [], []>} : vector<2x16xbf16>, vector<16x384xbf16>, vector<2x384xf32> -> vector<2x384xf32>
    %127 = arith.addf %126, %114 : vector<2x384xf32>
    %128 = vector.broadcast %7 : vector<1x384xf32> to vector<2x384xf32>
    %129 = arith.addf %127, %128 : vector<2x384xf32>
    %130 = arith.truncf %123 : vector<2x128xf32> to vector<2x128xbf16>
    %c0_49 = arith.constant 0 : index
    %c0_50 = arith.constant 0 : index
    %131 = vector.load %arg10[%c0_49, %c0_50] : memref<128x256xbf16, #tpu.memory_space<vmem>>, vector<128x256xbf16>
    %cst_51 = arith.constant dense<0.000000e+00> : vector<2x256xf32>
    %132 = tpu.matmul %130, %131, %cst_51 {dimension_numbers = #tpu.dot_dimension_numbers<[1], [0], [0], [1], [0, 0, 1, 1], [], []>} : vector<2x128xbf16>, vector<128x256xbf16>, vector<2x256xf32> -> vector<2x256xf32>
    %133 = vector.extract_strided_slice %129 {offsets = [0, 0], sizes = [2, 256], strides = [1, 1]} : vector<2x384xf32> to vector<2x256xf32>
    %134 = arith.addf %133, %132 : vector<2x256xf32>
    %135 = arith.negf %134 : vector<2x256xf32>
    %136 = math.exp %135 : vector<2x256xf32>
    %cst_52 = arith.constant 1.000000e+00 : f32
    %137 = vector.broadcast %cst_52 : f32 to vector<2x256xf32>
    %138 = arith.addf %137, %136 : vector<2x256xf32>
    %139 = arith.divf %137, %138 : vector<2x256xf32>
    %140 = vector.extract_strided_slice %139 {offsets = [0, 0], sizes = [2, 128], strides = [1, 1]} : vector<2x256xf32> to vector<2x128xf32>
    %141 = vector.extract_strided_slice %139 {offsets = [0, 128], sizes = [2, 128], strides = [1, 1]} : vector<2x256xf32> to vector<2x128xf32>
    %142 = vector.extract_strided_slice %129 {offsets = [0, 256], sizes = [2, 128], strides = [1, 1]} : vector<2x384xf32> to vector<2x128xf32>
    %143 = arith.mulf %141, %123 : vector<2x128xf32>
    %144 = arith.truncf %143 : vector<2x128xf32> to vector<2x128xbf16>
    %c0_53 = arith.constant 0 : index
    %c0_54 = arith.constant 0 : index
    %145 = vector.load %arg11[%c0_53, %c0_54] : memref<128x128xbf16, #tpu.memory_space<vmem>>, vector<128x128xbf16>
    %cst_55 = arith.constant dense<0.000000e+00> : vector<2x128xf32>
    %146 = tpu.matmul %144, %145, %cst_55 {dimension_numbers = #tpu.dot_dimension_numbers<[1], [0], [0], [1], [0, 0, 1, 1], [], []>} : vector<2x128xbf16>, vector<128x128xbf16>, vector<2x128xf32> -> vector<2x128xf32>
    %147 = arith.addf %142, %146 : vector<2x128xf32>
    %148 = math.tanh %147 : vector<2x128xf32>
    %149 = arith.subf %148, %123 : vector<2x128xf32>
    %150 = arith.mulf %140, %149 : vector<2x128xf32>
    %151 = arith.addf %123, %150 : vector<2x128xf32>
    %152 = arith.truncf %151 : vector<2x128xf32> to vector<2x128xbf16>
    %153 = arith.index_cast %c1_i32 : i32 to index
    %c0_56 = arith.constant 0 : index
    %c0_57 = arith.constant 0 : index
    %154 = vector.load %arg12[%153, %c0_56, %c0_57] : memref<8x2x128xbf16, #tpu.memory_space<vmem>>, vector<1x2x128xbf16>
    %155 = vector.shape_cast %154 : vector<1x2x128xbf16> to vector<2x128xbf16>
    %156 = vector.shape_cast %152 : vector<2x128xbf16> to vector<1x2x128xbf16>
    tpu.vector_store %arg12[%153, %c0_56, %c0_57], %156 {strides = array<i32>} : memref<8x2x128xbf16, #tpu.memory_space<vmem>>, vector<1x2x128xbf16>,
    %c2_i32 = arith.constant 2 : i32
    %157 = arith.index_cast %c2_i32 : i32 to index
    %c0_58 = arith.constant 0 : index
    %c0_59 = arith.constant 0 : index
    %158 = vector.load %arg2[%157, %c0_58, %c0_59] : memref<8x2x64xf32, #tpu.memory_space<vmem>>, vector<1x2x64xf32>
    %159 = vector.shape_cast %158 : vector<1x2x64xf32> to vector<2x64xf32>
    %160 = vector.extract_strided_slice %159 {offsets = [0, 0], sizes = [2, 16], strides = [1, 1]} : vector<2x64xf32> to vector<2x16xf32>
    %161 = vector.extract_strided_slice %159 {offsets = [0, 16], sizes = [2, 16], strides = [1, 1]} : vector<2x64xf32> to vector<2x16xf32>
    %162 = vector.extract_strided_slice %159 {offsets = [0, 32], sizes = [2, 16], strides = [1, 1]} : vector<2x64xf32> to vector<2x16xf32>
    %163 = vector.extract_strided_slice %159 {offsets = [0, 48], sizes = [2, 16], strides = [1, 1]} : vector<2x64xf32> to vector<2x16xf32>
    %164 = vector.extract_strided_slice %159 {offsets = [0, 32], sizes = [2, 32], strides = [1, 1]} : vector<2x64xf32> to vector<2x32xf32>
    %165 = vector.broadcast %4 : vector<1x16xf32> to vector<2x16xf32>
    %166 = arith.mulf %163, %165 : vector<2x16xf32>
    %167 = vector.broadcast %5 : vector<1x16xf32> to vector<2x16xf32>
    %168 = arith.addf %166, %167 : vector<2x16xf32>
    %cst_60 = arith.constant 0.000000e+00 : f32
    %169 = vector.broadcast %cst_60 : f32 to vector<2x16xf32>
    %170 = arith.maximumf %168, %169 : vector<2x16xf32>
    %cst_61 = arith.constant 0.000000e+00 : f32
    %171 = vector.broadcast %cst_61 : f32 to vector<2x16xf32>
    %172 = arith.subf %171, %170 : vector<2x16xf32>
    %173 = math.exp %172 : vector<2x16xf32>
    %cst_62 = arith.constant 1.000000e+00 : f32
    %174 = vector.broadcast %cst_62 : f32 to vector<2x16xf32>
    %175 = arith.subf %174, %162 : vector<2x16xf32>
    %176 = arith.mulf %162, %160 : vector<2x16xf32>
    %177 = arith.mulf %173, %161 : vector<2x16xf32>
    %cst_63 = arith.constant 1.000000e+00 : f32
    %178 = vector.broadcast %cst_63 : f32 to vector<2x16xf32>
    %179 = arith.subf %178, %173 : vector<2x16xf32>
    %180 = vector.broadcast %3 : vector<1x16xf32> to vector<2x16xf32>
    %181 = arith.mulf %179, %180 : vector<2x16xf32>
    %182 = arith.addf %177, %181 : vector<2x16xf32>
    %183 = arith.mulf %175, %182 : vector<2x16xf32>
    %184 = arith.addf %176, %183 : vector<2x16xf32>
    %185 = arith.truncf %164 : vector<2x32xf32> to vector<2x32xbf16>
    %c0_64 = arith.constant 0 : index
    %c0_65 = arith.constant 0 : index
    %186 = vector.load %arg7[%c0_64, %c0_65] : memref<32x512xbf16, #tpu.memory_space<vmem>>, vector<32x512xbf16>
    %cst_66 = arith.constant dense<0.000000e+00> : vector<2x512xf32>
    %187 = tpu.matmul %185, %186, %cst_66 {dimension_numbers = #tpu.dot_dimension_numbers<[1], [0], [0], [1], [0, 0, 1, 1], [], []>} : vector<2x32xbf16>, vector<32x512xbf16>, vector<2x512xf32> -> vector<2x512xf32>
    %188 = vector.extract_strided_slice %187 {offsets = [0, 0], sizes = [2, 384], strides = [1, 1]} : vector<2x512xf32> to vector<2x384xf32>
    %189 = vector.extract_strided_slice %187 {offsets = [0, 384], sizes = [2, 128], strides = [1, 1]} : vector<2x512xf32> to vector<2x128xf32>
    %190 = vector.broadcast %6 : vector<1x128xf32> to vector<2x128xf32>
    %191 = arith.addf %189, %190 : vector<2x128xf32>
    %cst_67 = arith.constant 0.000000e+00 : f32
    %192 = vector.broadcast %cst_67 : f32 to vector<2x128xf32>
    %193 = arith.maximumf %191, %192 : vector<2x128xf32>
    %cst_68 = arith.constant 0.000000e+00 : f32
    %194 = vector.broadcast %cst_68 : f32 to vector<2x128xf32>
    %195 = arith.subf %194, %193 : vector<2x128xf32>
    %196 = math.exp %195 : vector<2x128xf32>
    %197 = arith.mulf %196, %151 : vector<2x128xf32>
    %198 = arith.truncf %184 : vector<2x16xf32> to vector<2x16xbf16>
    %c0_69 = arith.constant 0 : index
    %c0_70 = arith.constant 0 : index
    %199 = vector.load %arg6[%c0_69, %c0_70] : memref<16x384xbf16, #tpu.memory_space<vmem>>, vector<16x384xbf16>
    %cst_71 = arith.constant dense<0.000000e+00> : vector<2x384xf32>
    %200 = tpu.matmul %198, %199, %cst_71 {dimension_numbers = #tpu.dot_dimension_numbers<[1], [0], [0], [1], [0, 0, 1, 1], [], []>} : vector<2x16xbf16>, vector<16x384xbf16>, vector<2x384xf32> -> vector<2x384xf32>
    %201 = arith.addf %200, %188 : vector<2x384xf32>
    %202 = vector.broadcast %7 : vector<1x384xf32> to vector<2x384xf32>
    %203 = arith.addf %201, %202 : vector<2x384xf32>
    %204 = arith.truncf %197 : vector<2x128xf32> to vector<2x128xbf16>
    %c0_72 = arith.constant 0 : index
    %c0_73 = arith.constant 0 : index
    %205 = vector.load %arg10[%c0_72, %c0_73] : memref<128x256xbf16, #tpu.memory_space<vmem>>, vector<128x256xbf16>
    %cst_74 = arith.constant dense<0.000000e+00> : vector<2x256xf32>
    %206 = tpu.matmul %204, %205, %cst_74 {dimension_numbers = #tpu.dot_dimension_numbers<[1], [0], [0], [1], [0, 0, 1, 1], [], []>} : vector<2x128xbf16>, vector<128x256xbf16>, vector<2x256xf32> -> vector<2x256xf32>
    %207 = vector.extract_strided_slice %203 {offsets = [0, 0], sizes = [2, 256], strides = [1, 1]} : vector<2x384xf32> to vector<2x256xf32>
    %208 = arith.addf %207, %206 : vector<2x256xf32>
    %209 = arith.negf %208 : vector<2x256xf32>
    %210 = math.exp %209 : vector<2x256xf32>
    %cst_75 = arith.constant 1.000000e+00 : f32
    %211 = vector.broadcast %cst_75 : f32 to vector<2x256xf32>
    %212 = arith.addf %211, %210 : vector<2x256xf32>
    %213 = arith.divf %211, %212 : vector<2x256xf32>
    %214 = vector.extract_strided_slice %213 {offsets = [0, 0], sizes = [2, 128], strides = [1, 1]} : vector<2x256xf32> to vector<2x128xf32>
    %215 = vector.extract_strided_slice %213 {offsets = [0, 128], sizes = [2, 128], strides = [1, 1]} : vector<2x256xf32> to vector<2x128xf32>
    %216 = vector.extract_strided_slice %203 {offsets = [0, 256], sizes = [2, 128], strides = [1, 1]} : vector<2x384xf32> to vector<2x128xf32>
    %217 = arith.mulf %215, %197 : vector<2x128xf32>
    %218 = arith.truncf %217 : vector<2x128xf32> to vector<2x128xbf16>
    %c0_76 = arith.constant 0 : index
    %c0_77 = arith.constant 0 : index
    %219 = vector.load %arg11[%c0_76, %c0_77] : memref<128x128xbf16, #tpu.memory_space<vmem>>, vector<128x128xbf16>
    %cst_78 = arith.constant dense<0.000000e+00> : vector<2x128xf32>
    %220 = tpu.matmul %218, %219, %cst_78 {dimension_numbers = #tpu.dot_dimension_numbers<[1], [0], [0], [1], [0, 0, 1, 1], [], []>} : vector<2x128xbf16>, vector<128x128xbf16>, vector<2x128xf32> -> vector<2x128xf32>
    %221 = arith.addf %216, %220 : vector<2x128xf32>
    %222 = math.tanh %221 : vector<2x128xf32>
    %223 = arith.subf %222, %197 : vector<2x128xf32>
    %224 = arith.mulf %214, %223 : vector<2x128xf32>
    %225 = arith.addf %197, %224 : vector<2x128xf32>
    %226 = arith.truncf %225 : vector<2x128xf32> to vector<2x128xbf16>
    %227 = arith.index_cast %c2_i32 : i32 to index
    %c0_79 = arith.constant 0 : index
    %c0_80 = arith.constant 0 : index
    %228 = vector.load %arg12[%227, %c0_79, %c0_80] : memref<8x2x128xbf16, #tpu.memory_space<vmem>>, vector<1x2x128xbf16>
    %229 = vector.shape_cast %228 : vector<1x2x128xbf16> to vector<2x128xbf16>
    %230 = vector.shape_cast %226 : vector<2x128xbf16> to vector<1x2x128xbf16>
    tpu.vector_store %arg12[%227, %c0_79, %c0_80], %230 {strides = array<i32>} : memref<8x2x128xbf16, #tpu.memory_space<vmem>>, vector<1x2x128xbf16>,
    %c3_i32 = arith.constant 3 : i32
    %231 = arith.index_cast %c3_i32 : i32 to index
    %c0_81 = arith.constant 0 : index
    %c0_82 = arith.constant 0 : index
    %232 = vector.load %arg2[%231, %c0_81, %c0_82] : memref<8x2x64xf32, #tpu.memory_space<vmem>>, vector<1x2x64xf32>
    %233 = vector.shape_cast %232 : vector<1x2x64xf32> to vector<2x64xf32>
    %234 = vector.extract_strided_slice %233 {offsets = [0, 0], sizes = [2, 16], strides = [1, 1]} : vector<2x64xf32> to vector<2x16xf32>
    %235 = vector.extract_strided_slice %233 {offsets = [0, 16], sizes = [2, 16], strides = [1, 1]} : vector<2x64xf32> to vector<2x16xf32>
    %236 = vector.extract_strided_slice %233 {offsets = [0, 32], sizes = [2, 16], strides = [1, 1]} : vector<2x64xf32> to vector<2x16xf32>
    %237 = vector.extract_strided_slice %233 {offsets = [0, 48], sizes = [2, 16], strides = [1, 1]} : vector<2x64xf32> to vector<2x16xf32>
    %238 = vector.extract_strided_slice %233 {offsets = [0, 32], sizes = [2, 32], strides = [1, 1]} : vector<2x64xf32> to vector<2x32xf32>
    %239 = vector.broadcast %4 : vector<1x16xf32> to vector<2x16xf32>
    %240 = arith.mulf %237, %239 : vector<2x16xf32>
    %241 = vector.broadcast %5 : vector<1x16xf32> to vector<2x16xf32>
    %242 = arith.addf %240, %241 : vector<2x16xf32>
    %cst_83 = arith.constant 0.000000e+00 : f32
    %243 = vector.broadcast %cst_83 : f32 to vector<2x16xf32>
    %244 = arith.maximumf %242, %243 : vector<2x16xf32>
    %cst_84 = arith.constant 0.000000e+00 : f32
    %245 = vector.broadcast %cst_84 : f32 to vector<2x16xf32>
    %246 = arith.subf %245, %244 : vector<2x16xf32>
    %247 = math.exp %246 : vector<2x16xf32>
    %cst_85 = arith.constant 1.000000e+00 : f32
    %248 = vector.broadcast %cst_85 : f32 to vector<2x16xf32>
    %249 = arith.subf %248, %236 : vector<2x16xf32>
    %250 = arith.mulf %236, %234 : vector<2x16xf32>
    %251 = arith.mulf %247, %235 : vector<2x16xf32>
    %cst_86 = arith.constant 1.000000e+00 : f32
    %252 = vector.broadcast %cst_86 : f32 to vector<2x16xf32>
    %253 = arith.subf %252, %247 : vector<2x16xf32>
    %254 = vector.broadcast %3 : vector<1x16xf32> to vector<2x16xf32>
    %255 = arith.mulf %253, %254 : vector<2x16xf32>
    %256 = arith.addf %251, %255 : vector<2x16xf32>
    %257 = arith.mulf %249, %256 : vector<2x16xf32>
    %258 = arith.addf %250, %257 : vector<2x16xf32>
    %259 = arith.truncf %238 : vector<2x32xf32> to vector<2x32xbf16>
    %c0_87 = arith.constant 0 : index
    %c0_88 = arith.constant 0 : index
    %260 = vector.load %arg7[%c0_87, %c0_88] : memref<32x512xbf16, #tpu.memory_space<vmem>>, vector<32x512xbf16>
    %cst_89 = arith.constant dense<0.000000e+00> : vector<2x512xf32>
    %261 = tpu.matmul %259, %260, %cst_89 {dimension_numbers = #tpu.dot_dimension_numbers<[1], [0], [0], [1], [0, 0, 1, 1], [], []>} : vector<2x32xbf16>, vector<32x512xbf16>, vector<2x512xf32> -> vector<2x512xf32>
    %262 = vector.extract_strided_slice %261 {offsets = [0, 0], sizes = [2, 384], strides = [1, 1]} : vector<2x512xf32> to vector<2x384xf32>
    %263 = vector.extract_strided_slice %261 {offsets = [0, 384], sizes = [2, 128], strides = [1, 1]} : vector<2x512xf32> to vector<2x128xf32>
    %264 = vector.broadcast %6 : vector<1x128xf32> to vector<2x128xf32>
    %265 = arith.addf %263, %264 : vector<2x128xf32>
    %cst_90 = arith.constant 0.000000e+00 : f32
    %266 = vector.broadcast %cst_90 : f32 to vector<2x128xf32>
    %267 = arith.maximumf %265, %266 : vector<2x128xf32>
    %cst_91 = arith.constant 0.000000e+00 : f32
    %268 = vector.broadcast %cst_91 : f32 to vector<2x128xf32>
    %269 = arith.subf %268, %267 : vector<2x128xf32>
    %270 = math.exp %269 : vector<2x128xf32>
    %271 = arith.mulf %270, %225 : vector<2x128xf32>
    %272 = arith.truncf %258 : vector<2x16xf32> to vector<2x16xbf16>
    %c0_92 = arith.constant 0 : index
    %c0_93 = arith.constant 0 : index
    %273 = vector.load %arg6[%c0_92, %c0_93] : memref<16x384xbf16, #tpu.memory_space<vmem>>, vector<16x384xbf16>
    %cst_94 = arith.constant dense<0.000000e+00> : vector<2x384xf32>
    %274 = tpu.matmul %272, %273, %cst_94 {dimension_numbers = #tpu.dot_dimension_numbers<[1], [0], [0], [1], [0, 0, 1, 1], [], []>} : vector<2x16xbf16>, vector<16x384xbf16>, vector<2x384xf32> -> vector<2x384xf32>
    %275 = arith.addf %274, %262 : vector<2x384xf32>
    %276 = vector.broadcast %7 : vector<1x384xf32> to vector<2x384xf32>
    %277 = arith.addf %275, %276 : vector<2x384xf32>
    %278 = arith.truncf %271 : vector<2x128xf32> to vector<2x128xbf16>
    %c0_95 = arith.constant 0 : index
    %c0_96 = arith.constant 0 : index
    %279 = vector.load %arg10[%c0_95, %c0_96] : memref<128x256xbf16, #tpu.memory_space<vmem>>, vector<128x256xbf16>
    %cst_97 = arith.constant dense<0.000000e+00> : vector<2x256xf32>
    %280 = tpu.matmul %278, %279, %cst_97 {dimension_numbers = #tpu.dot_dimension_numbers<[1], [0], [0], [1], [0, 0, 1, 1], [], []>} : vector<2x128xbf16>, vector<128x256xbf16>, vector<2x256xf32> -> vector<2x256xf32>
    %281 = vector.extract_strided_slice %277 {offsets = [0, 0], sizes = [2, 256], strides = [1, 1]} : vector<2x384xf32> to vector<2x256xf32>
    %282 = arith.addf %281, %280 : vector<2x256xf32>
    %283 = arith.negf %282 : vector<2x256xf32>
    %284 = math.exp %283 : vector<2x256xf32>
    %cst_98 = arith.constant 1.000000e+00 : f32
    %285 = vector.broadcast %cst_98 : f32 to vector<2x256xf32>
    %286 = arith.addf %285, %284 : vector<2x256xf32>
    %287 = arith.divf %285, %286 : vector<2x256xf32>
    %288 = vector.extract_strided_slice %287 {offsets = [0, 0], sizes = [2, 128], strides = [1, 1]} : vector<2x256xf32> to vector<2x128xf32>
    %289 = vector.extract_strided_slice %287 {offsets = [0, 128], sizes = [2, 128], strides = [1, 1]} : vector<2x256xf32> to vector<2x128xf32>
    %290 = vector.extract_strided_slice %277 {offsets = [0, 256], sizes = [2, 128], strides = [1, 1]} : vector<2x384xf32> to vector<2x128xf32>
    %291 = arith.mulf %289, %271 : vector<2x128xf32>
    %292 = arith.truncf %291 : vector<2x128xf32> to vector<2x128xbf16>
    %c0_99 = arith.constant 0 : index
    %c0_100 = arith.constant 0 : index
    %293 = vector.load %arg11[%c0_99, %c0_100] : memref<128x128xbf16, #tpu.memory_space<vmem>>, vector<128x128xbf16>
    %cst_101 = arith.constant dense<0.000000e+00> : vector<2x128xf32>
    %294 = tpu.matmul %292, %293, %cst_101 {dimension_numbers = #tpu.dot_dimension_numbers<[1], [0], [0], [1], [0, 0, 1, 1], [], []>} : vector<2x128xbf16>, vector<128x128xbf16>, vector<2x128xf32> -> vector<2x128xf32>
    %295 = arith.addf %290, %294 : vector<2x128xf32>
    %296 = math.tanh %295 : vector<2x128xf32>
    %297 = arith.subf %296, %271 : vector<2x128xf32>
    %298 = arith.mulf %288, %297 : vector<2x128xf32>
    %299 = arith.addf %271, %298 : vector<2x128xf32>
    %300 = arith.truncf %299 : vector<2x128xf32> to vector<2x128xbf16>
    %301 = arith.index_cast %c3_i32 : i32 to index
    %c0_102 = arith.constant 0 : index
    %c0_103 = arith.constant 0 : index
    %302 = vector.load %arg12[%301, %c0_102, %c0_103] : memref<8x2x128xbf16, #tpu.memory_space<vmem>>, vector<1x2x128xbf16>
    %303 = vector.shape_cast %302 : vector<1x2x128xbf16> to vector<2x128xbf16>
    %304 = vector.shape_cast %300 : vector<2x128xbf16> to vector<1x2x128xbf16>
    tpu.vector_store %arg12[%301, %c0_102, %c0_103], %304 {strides = array<i32>} : memref<8x2x128xbf16, #tpu.memory_space<vmem>>, vector<1x2x128xbf16>,
    %c4_i32 = arith.constant 4 : i32
    %305 = arith.index_cast %c4_i32 : i32 to index
    %c0_104 = arith.constant 0 : index
    %c0_105 = arith.constant 0 : index
    %306 = vector.load %arg2[%305, %c0_104, %c0_105] : memref<8x2x64xf32, #tpu.memory_space<vmem>>, vector<1x2x64xf32>
    %307 = vector.shape_cast %306 : vector<1x2x64xf32> to vector<2x64xf32>
    %308 = vector.extract_strided_slice %307 {offsets = [0, 0], sizes = [2, 16], strides = [1, 1]} : vector<2x64xf32> to vector<2x16xf32>
    %309 = vector.extract_strided_slice %307 {offsets = [0, 16], sizes = [2, 16], strides = [1, 1]} : vector<2x64xf32> to vector<2x16xf32>
    %310 = vector.extract_strided_slice %307 {offsets = [0, 32], sizes = [2, 16], strides = [1, 1]} : vector<2x64xf32> to vector<2x16xf32>
    %311 = vector.extract_strided_slice %307 {offsets = [0, 48], sizes = [2, 16], strides = [1, 1]} : vector<2x64xf32> to vector<2x16xf32>
    %312 = vector.extract_strided_slice %307 {offsets = [0, 32], sizes = [2, 32], strides = [1, 1]} : vector<2x64xf32> to vector<2x32xf32>
    %313 = vector.broadcast %4 : vector<1x16xf32> to vector<2x16xf32>
    %314 = arith.mulf %311, %313 : vector<2x16xf32>
    %315 = vector.broadcast %5 : vector<1x16xf32> to vector<2x16xf32>
    %316 = arith.addf %314, %315 : vector<2x16xf32>
    %cst_106 = arith.constant 0.000000e+00 : f32
    %317 = vector.broadcast %cst_106 : f32 to vector<2x16xf32>
    %318 = arith.maximumf %316, %317 : vector<2x16xf32>
    %cst_107 = arith.constant 0.000000e+00 : f32
    %319 = vector.broadcast %cst_107 : f32 to vector<2x16xf32>
    %320 = arith.subf %319, %318 : vector<2x16xf32>
    %321 = math.exp %320 : vector<2x16xf32>
    %cst_108 = arith.constant 1.000000e+00 : f32
    %322 = vector.broadcast %cst_108 : f32 to vector<2x16xf32>
    %323 = arith.subf %322, %310 : vector<2x16xf32>
    %324 = arith.mulf %310, %308 : vector<2x16xf32>
    %325 = arith.mulf %321, %309 : vector<2x16xf32>
    %cst_109 = arith.constant 1.000000e+00 : f32
    %326 = vector.broadcast %cst_109 : f32 to vector<2x16xf32>
    %327 = arith.subf %326, %321 : vector<2x16xf32>
    %328 = vector.broadcast %3 : vector<1x16xf32> to vector<2x16xf32>
    %329 = arith.mulf %327, %328 : vector<2x16xf32>
    %330 = arith.addf %325, %329 : vector<2x16xf32>
    %331 = arith.mulf %323, %330 : vector<2x16xf32>
    %332 = arith.addf %324, %331 : vector<2x16xf32>
    %333 = arith.truncf %312 : vector<2x32xf32> to vector<2x32xbf16>
    %c0_110 = arith.constant 0 : index
    %c0_111 = arith.constant 0 : index
    %334 = vector.load %arg7[%c0_110, %c0_111] : memref<32x512xbf16, #tpu.memory_space<vmem>>, vector<32x512xbf16>
    %cst_112 = arith.constant dense<0.000000e+00> : vector<2x512xf32>
    %335 = tpu.matmul %333, %334, %cst_112 {dimension_numbers = #tpu.dot_dimension_numbers<[1], [0], [0], [1], [0, 0, 1, 1], [], []>} : vector<2x32xbf16>, vector<32x512xbf16>, vector<2x512xf32> -> vector<2x512xf32>
    %336 = vector.extract_strided_slice %335 {offsets = [0, 0], sizes = [2, 384], strides = [1, 1]} : vector<2x512xf32> to vector<2x384xf32>
    %337 = vector.extract_strided_slice %335 {offsets = [0, 384], sizes = [2, 128], strides = [1, 1]} : vector<2x512xf32> to vector<2x128xf32>
    %338 = vector.broadcast %6 : vector<1x128xf32> to vector<2x128xf32>
    %339 = arith.addf %337, %338 : vector<2x128xf32>
    %cst_113 = arith.constant 0.000000e+00 : f32
    %340 = vector.broadcast %cst_113 : f32 to vector<2x128xf32>
    %341 = arith.maximumf %339, %340 : vector<2x128xf32>
    %cst_114 = arith.constant 0.000000e+00 : f32
    %342 = vector.broadcast %cst_114 : f32 to vector<2x128xf32>
    %343 = arith.subf %342, %341 : vector<2x128xf32>
    %344 = math.exp %343 : vector<2x128xf32>
    %345 = arith.mulf %344, %299 : vector<2x128xf32>
    %346 = arith.truncf %332 : vector<2x16xf32> to vector<2x16xbf16>
    %c0_115 = arith.constant 0 : index
    %c0_116 = arith.constant 0 : index
    %347 = vector.load %arg6[%c0_115, %c0_116] : memref<16x384xbf16, #tpu.memory_space<vmem>>, vector<16x384xbf16>
    %cst_117 = arith.constant dense<0.000000e+00> : vector<2x384xf32>
    %348 = tpu.matmul %346, %347, %cst_117 {dimension_numbers = #tpu.dot_dimension_numbers<[1], [0], [0], [1], [0, 0, 1, 1], [], []>} : vector<2x16xbf16>, vector<16x384xbf16>, vector<2x384xf32> -> vector<2x384xf32>
    %349 = arith.addf %348, %336 : vector<2x384xf32>
    %350 = vector.broadcast %7 : vector<1x384xf32> to vector<2x384xf32>
    %351 = arith.addf %349, %350 : vector<2x384xf32>
    %352 = arith.truncf %345 : vector<2x128xf32> to vector<2x128xbf16>
    %c0_118 = arith.constant 0 : index
    %c0_119 = arith.constant 0 : index
    %353 = vector.load %arg10[%c0_118, %c0_119] : memref<128x256xbf16, #tpu.memory_space<vmem>>, vector<128x256xbf16>
    %cst_120 = arith.constant dense<0.000000e+00> : vector<2x256xf32>
    %354 = tpu.matmul %352, %353, %cst_120 {dimension_numbers = #tpu.dot_dimension_numbers<[1], [0], [0], [1], [0, 0, 1, 1], [], []>} : vector<2x128xbf16>, vector<128x256xbf16>, vector<2x256xf32> -> vector<2x256xf32>
    %355 = vector.extract_strided_slice %351 {offsets = [0, 0], sizes = [2, 256], strides = [1, 1]} : vector<2x384xf32> to vector<2x256xf32>
    %356 = arith.addf %355, %354 : vector<2x256xf32>
    %357 = arith.negf %356 : vector<2x256xf32>
    %358 = math.exp %357 : vector<2x256xf32>
    %cst_121 = arith.constant 1.000000e+00 : f32
    %359 = vector.broadcast %cst_121 : f32 to vector<2x256xf32>
    %360 = arith.addf %359, %358 : vector<2x256xf32>
    %361 = arith.divf %359, %360 : vector<2x256xf32>
    %362 = vector.extract_strided_slice %361 {offsets = [0, 0], sizes = [2, 128], strides = [1, 1]} : vector<2x256xf32> to vector<2x128xf32>
    %363 = vector.extract_strided_slice %361 {offsets = [0, 128], sizes = [2, 128], strides = [1, 1]} : vector<2x256xf32> to vector<2x128xf32>
    %364 = vector.extract_strided_slice %351 {offsets = [0, 256], sizes = [2, 128], strides = [1, 1]} : vector<2x384xf32> to vector<2x128xf32>
    %365 = arith.mulf %363, %345 : vector<2x128xf32>
    %366 = arith.truncf %365 : vector<2x128xf32> to vector<2x128xbf16>
    %c0_122 = arith.constant 0 : index
    %c0_123 = arith.constant 0 : index
    %367 = vector.load %arg11[%c0_122, %c0_123] : memref<128x128xbf16, #tpu.memory_space<vmem>>, vector<128x128xbf16>
    %cst_124 = arith.constant dense<0.000000e+00> : vector<2x128xf32>
    %368 = tpu.matmul %366, %367, %cst_124 {dimension_numbers = #tpu.dot_dimension_numbers<[1], [0], [0], [1], [0, 0, 1, 1], [], []>} : vector<2x128xbf16>, vector<128x128xbf16>, vector<2x128xf32> -> vector<2x128xf32>
    %369 = arith.addf %364, %368 : vector<2x128xf32>
    %370 = math.tanh %369 : vector<2x128xf32>
    %371 = arith.subf %370, %345 : vector<2x128xf32>
    %372 = arith.mulf %362, %371 : vector<2x128xf32>
    %373 = arith.addf %345, %372 : vector<2x128xf32>
    %374 = arith.truncf %373 : vector<2x128xf32> to vector<2x128xbf16>
    %375 = arith.index_cast %c4_i32 : i32 to index
    %c0_125 = arith.constant 0 : index
    %c0_126 = arith.constant 0 : index
    %376 = vector.load %arg12[%375, %c0_125, %c0_126] : memref<8x2x128xbf16, #tpu.memory_space<vmem>>, vector<1x2x128xbf16>
    %377 = vector.shape_cast %376 : vector<1x2x128xbf16> to vector<2x128xbf16>
    %378 = vector.shape_cast %374 : vector<2x128xbf16> to vector<1x2x128xbf16>
    tpu.vector_store %arg12[%375, %c0_125, %c0_126], %378 {strides = array<i32>} : memref<8x2x128xbf16, #tpu.memory_space<vmem>>, vector<1x2x128xbf16>,
    %c5_i32 = arith.constant 5 : i32
    %379 = arith.index_cast %c5_i32 : i32 to index
    %c0_127 = arith.constant 0 : index
    %c0_128 = arith.constant 0 : index
    %380 = vector.load %arg2[%379, %c0_127, %c0_128] : memref<8x2x64xf32, #tpu.memory_space<vmem>>, vector<1x2x64xf32>
    %381 = vector.shape_cast %380 : vector<1x2x64xf32> to vector<2x64xf32>
    %382 = vector.extract_strided_slice %381 {offsets = [0, 0], sizes = [2, 16], strides = [1, 1]} : vector<2x64xf32> to vector<2x16xf32>
    %383 = vector.extract_strided_slice %381 {offsets = [0, 16], sizes = [2, 16], strides = [1, 1]} : vector<2x64xf32> to vector<2x16xf32>
    %384 = vector.extract_strided_slice %381 {offsets = [0, 32], sizes = [2, 16], strides = [1, 1]} : vector<2x64xf32> to vector<2x16xf32>
    %385 = vector.extract_strided_slice %381 {offsets = [0, 48], sizes = [2, 16], strides = [1, 1]} : vector<2x64xf32> to vector<2x16xf32>
    %386 = vector.extract_strided_slice %381 {offsets = [0, 32], sizes = [2, 32], strides = [1, 1]} : vector<2x64xf32> to vector<2x32xf32>
    %387 = vector.broadcast %4 : vector<1x16xf32> to vector<2x16xf32>
    %388 = arith.mulf %385, %387 : vector<2x16xf32>
    %389 = vector.broadcast %5 : vector<1x16xf32> to vector<2x16xf32>
    %390 = arith.addf %388, %389 : vector<2x16xf32>
    %cst_129 = arith.constant 0.000000e+00 : f32
    %391 = vector.broadcast %cst_129 : f32 to vector<2x16xf32>
    %392 = arith.maximumf %390, %391 : vector<2x16xf32>
    %cst_130 = arith.constant 0.000000e+00 : f32
    %393 = vector.broadcast %cst_130 : f32 to vector<2x16xf32>
    %394 = arith.subf %393, %392 : vector<2x16xf32>
    %395 = math.exp %394 : vector<2x16xf32>
    %cst_131 = arith.constant 1.000000e+00 : f32
    %396 = vector.broadcast %cst_131 : f32 to vector<2x16xf32>
    %397 = arith.subf %396, %384 : vector<2x16xf32>
    %398 = arith.mulf %384, %382 : vector<2x16xf32>
    %399 = arith.mulf %395, %383 : vector<2x16xf32>
    %cst_132 = arith.constant 1.000000e+00 : f32
    %400 = vector.broadcast %cst_132 : f32 to vector<2x16xf32>
    %401 = arith.subf %400, %395 : vector<2x16xf32>
    %402 = vector.broadcast %3 : vector<1x16xf32> to vector<2x16xf32>
    %403 = arith.mulf %401, %402 : vector<2x16xf32>
    %404 = arith.addf %399, %403 : vector<2x16xf32>
    %405 = arith.mulf %397, %404 : vector<2x16xf32>
    %406 = arith.addf %398, %405 : vector<2x16xf32>
    %407 = arith.truncf %386 : vector<2x32xf32> to vector<2x32xbf16>
    %c0_133 = arith.constant 0 : index
    %c0_134 = arith.constant 0 : index
    %408 = vector.load %arg7[%c0_133, %c0_134] : memref<32x512xbf16, #tpu.memory_space<vmem>>, vector<32x512xbf16>
    %cst_135 = arith.constant dense<0.000000e+00> : vector<2x512xf32>
    %409 = tpu.matmul %407, %408, %cst_135 {dimension_numbers = #tpu.dot_dimension_numbers<[1], [0], [0], [1], [0, 0, 1, 1], [], []>} : vector<2x32xbf16>, vector<32x512xbf16>, vector<2x512xf32> -> vector<2x512xf32>
    %410 = vector.extract_strided_slice %409 {offsets = [0, 0], sizes = [2, 384], strides = [1, 1]} : vector<2x512xf32> to vector<2x384xf32>
    %411 = vector.extract_strided_slice %409 {offsets = [0, 384], sizes = [2, 128], strides = [1, 1]} : vector<2x512xf32> to vector<2x128xf32>
    %412 = vector.broadcast %6 : vector<1x128xf32> to vector<2x128xf32>
    %413 = arith.addf %411, %412 : vector<2x128xf32>
    %cst_136 = arith.constant 0.000000e+00 : f32
    %414 = vector.broadcast %cst_136 : f32 to vector<2x128xf32>
    %415 = arith.maximumf %413, %414 : vector<2x128xf32>
    %cst_137 = arith.constant 0.000000e+00 : f32
    %416 = vector.broadcast %cst_137 : f32 to vector<2x128xf32>
    %417 = arith.subf %416, %415 : vector<2x128xf32>
    %418 = math.exp %417 : vector<2x128xf32>
    %419 = arith.mulf %418, %373 : vector<2x128xf32>
    %420 = arith.truncf %406 : vector<2x16xf32> to vector<2x16xbf16>
    %c0_138 = arith.constant 0 : index
    %c0_139 = arith.constant 0 : index
    %421 = vector.load %arg6[%c0_138, %c0_139] : memref<16x384xbf16, #tpu.memory_space<vmem>>, vector<16x384xbf16>
    %cst_140 = arith.constant dense<0.000000e+00> : vector<2x384xf32>
    %422 = tpu.matmul %420, %421, %cst_140 {dimension_numbers = #tpu.dot_dimension_numbers<[1], [0], [0], [1], [0, 0, 1, 1], [], []>} : vector<2x16xbf16>, vector<16x384xbf16>, vector<2x384xf32> -> vector<2x384xf32>
    %423 = arith.addf %422, %410 : vector<2x384xf32>
    %424 = vector.broadcast %7 : vector<1x384xf32> to vector<2x384xf32>
    %425 = arith.addf %423, %424 : vector<2x384xf32>
    %426 = arith.truncf %419 : vector<2x128xf32> to vector<2x128xbf16>
    %c0_141 = arith.constant 0 : index
    %c0_142 = arith.constant 0 : index
    %427 = vector.load %arg10[%c0_141, %c0_142] : memref<128x256xbf16, #tpu.memory_space<vmem>>, vector<128x256xbf16>
    %cst_143 = arith.constant dense<0.000000e+00> : vector<2x256xf32>
    %428 = tpu.matmul %426, %427, %cst_143 {dimension_numbers = #tpu.dot_dimension_numbers<[1], [0], [0], [1], [0, 0, 1, 1], [], []>} : vector<2x128xbf16>, vector<128x256xbf16>, vector<2x256xf32> -> vector<2x256xf32>
    %429 = vector.extract_strided_slice %425 {offsets = [0, 0], sizes = [2, 256], strides = [1, 1]} : vector<2x384xf32> to vector<2x256xf32>
    %430 = arith.addf %429, %428 : vector<2x256xf32>
    %431 = arith.negf %430 : vector<2x256xf32>
    %432 = math.exp %431 : vector<2x256xf32>
    %cst_144 = arith.constant 1.000000e+00 : f32
    %433 = vector.broadcast %cst_144 : f32 to vector<2x256xf32>
    %434 = arith.addf %433, %432 : vector<2x256xf32>
    %435 = arith.divf %433, %434 : vector<2x256xf32>
    %436 = vector.extract_strided_slice %435 {offsets = [0, 0], sizes = [2, 128], strides = [1, 1]} : vector<2x256xf32> to vector<2x128xf32>
    %437 = vector.extract_strided_slice %435 {offsets = [0, 128], sizes = [2, 128], strides = [1, 1]} : vector<2x256xf32> to vector<2x128xf32>
    %438 = vector.extract_strided_slice %425 {offsets = [0, 256], sizes = [2, 128], strides = [1, 1]} : vector<2x384xf32> to vector<2x128xf32>
    %439 = arith.mulf %437, %419 : vector<2x128xf32>
    %440 = arith.truncf %439 : vector<2x128xf32> to vector<2x128xbf16>
    %c0_145 = arith.constant 0 : index
    %c0_146 = arith.constant 0 : index
    %441 = vector.load %arg11[%c0_145, %c0_146] : memref<128x128xbf16, #tpu.memory_space<vmem>>, vector<128x128xbf16>
    %cst_147 = arith.constant dense<0.000000e+00> : vector<2x128xf32>
    %442 = tpu.matmul %440, %441, %cst_147 {dimension_numbers = #tpu.dot_dimension_numbers<[1], [0], [0], [1], [0, 0, 1, 1], [], []>} : vector<2x128xbf16>, vector<128x128xbf16>, vector<2x128xf32> -> vector<2x128xf32>
    %443 = arith.addf %438, %442 : vector<2x128xf32>
    %444 = math.tanh %443 : vector<2x128xf32>
    %445 = arith.subf %444, %419 : vector<2x128xf32>
    %446 = arith.mulf %436, %445 : vector<2x128xf32>
    %447 = arith.addf %419, %446 : vector<2x128xf32>
    %448 = arith.truncf %447 : vector<2x128xf32> to vector<2x128xbf16>
    %449 = arith.index_cast %c5_i32 : i32 to index
    %c0_148 = arith.constant 0 : index
    %c0_149 = arith.constant 0 : index
    %450 = vector.load %arg12[%449, %c0_148, %c0_149] : memref<8x2x128xbf16, #tpu.memory_space<vmem>>, vector<1x2x128xbf16>
    %451 = vector.shape_cast %450 : vector<1x2x128xbf16> to vector<2x128xbf16>
    %452 = vector.shape_cast %448 : vector<2x128xbf16> to vector<1x2x128xbf16>
    tpu.vector_store %arg12[%449, %c0_148, %c0_149], %452 {strides = array<i32>} : memref<8x2x128xbf16, #tpu.memory_space<vmem>>, vector<1x2x128xbf16>,
    %c6_i32 = arith.constant 6 : i32
    %453 = arith.index_cast %c6_i32 : i32 to index
    %c0_150 = arith.constant 0 : index
    %c0_151 = arith.constant 0 : index
    %454 = vector.load %arg2[%453, %c0_150, %c0_151] : memref<8x2x64xf32, #tpu.memory_space<vmem>>, vector<1x2x64xf32>
    %455 = vector.shape_cast %454 : vector<1x2x64xf32> to vector<2x64xf32>
    %456 = vector.extract_strided_slice %455 {offsets = [0, 0], sizes = [2, 16], strides = [1, 1]} : vector<2x64xf32> to vector<2x16xf32>
    %457 = vector.extract_strided_slice %455 {offsets = [0, 16], sizes = [2, 16], strides = [1, 1]} : vector<2x64xf32> to vector<2x16xf32>
    %458 = vector.extract_strided_slice %455 {offsets = [0, 32], sizes = [2, 16], strides = [1, 1]} : vector<2x64xf32> to vector<2x16xf32>
    %459 = vector.extract_strided_slice %455 {offsets = [0, 48], sizes = [2, 16], strides = [1, 1]} : vector<2x64xf32> to vector<2x16xf32>
    %460 = vector.extract_strided_slice %455 {offsets = [0, 32], sizes = [2, 32], strides = [1, 1]} : vector<2x64xf32> to vector<2x32xf32>
    %461 = vector.broadcast %4 : vector<1x16xf32> to vector<2x16xf32>
    %462 = arith.mulf %459, %461 : vector<2x16xf32>
    %463 = vector.broadcast %5 : vector<1x16xf32> to vector<2x16xf32>
    %464 = arith.addf %462, %463 : vector<2x16xf32>
    %cst_152 = arith.constant 0.000000e+00 : f32
    %465 = vector.broadcast %cst_152 : f32 to vector<2x16xf32>
    %466 = arith.maximumf %464, %465 : vector<2x16xf32>
    %cst_153 = arith.constant 0.000000e+00 : f32
    %467 = vector.broadcast %cst_153 : f32 to vector<2x16xf32>
    %468 = arith.subf %467, %466 : vector<2x16xf32>
    %469 = math.exp %468 : vector<2x16xf32>
    %cst_154 = arith.constant 1.000000e+00 : f32
    %470 = vector.broadcast %cst_154 : f32 to vector<2x16xf32>
    %471 = arith.subf %470, %458 : vector<2x16xf32>
    %472 = arith.mulf %458, %456 : vector<2x16xf32>
    %473 = arith.mulf %469, %457 : vector<2x16xf32>
    %cst_155 = arith.constant 1.000000e+00 : f32
    %474 = vector.broadcast %cst_155 : f32 to vector<2x16xf32>
    %475 = arith.subf %474, %469 : vector<2x16xf32>
    %476 = vector.broadcast %3 : vector<1x16xf32> to vector<2x16xf32>
    %477 = arith.mulf %475, %476 : vector<2x16xf32>
    %478 = arith.addf %473, %477 : vector<2x16xf32>
    %479 = arith.mulf %471, %478 : vector<2x16xf32>
    %480 = arith.addf %472, %479 : vector<2x16xf32>
    %481 = arith.truncf %460 : vector<2x32xf32> to vector<2x32xbf16>
    %c0_156 = arith.constant 0 : index
    %c0_157 = arith.constant 0 : index
    %482 = vector.load %arg7[%c0_156, %c0_157] : memref<32x512xbf16, #tpu.memory_space<vmem>>, vector<32x512xbf16>
    %cst_158 = arith.constant dense<0.000000e+00> : vector<2x512xf32>
    %483 = tpu.matmul %481, %482, %cst_158 {dimension_numbers = #tpu.dot_dimension_numbers<[1], [0], [0], [1], [0, 0, 1, 1], [], []>} : vector<2x32xbf16>, vector<32x512xbf16>, vector<2x512xf32> -> vector<2x512xf32>
    %484 = vector.extract_strided_slice %483 {offsets = [0, 0], sizes = [2, 384], strides = [1, 1]} : vector<2x512xf32> to vector<2x384xf32>
    %485 = vector.extract_strided_slice %483 {offsets = [0, 384], sizes = [2, 128], strides = [1, 1]} : vector<2x512xf32> to vector<2x128xf32>
    %486 = vector.broadcast %6 : vector<1x128xf32> to vector<2x128xf32>
    %487 = arith.addf %485, %486 : vector<2x128xf32>
    %cst_159 = arith.constant 0.000000e+00 : f32
    %488 = vector.broadcast %cst_159 : f32 to vector<2x128xf32>
    %489 = arith.maximumf %487, %488 : vector<2x128xf32>
    %cst_160 = arith.constant 0.000000e+00 : f32
    %490 = vector.broadcast %cst_160 : f32 to vector<2x128xf32>
    %491 = arith.subf %490, %489 : vector<2x128xf32>
    %492 = math.exp %491 : vector<2x128xf32>
    %493 = arith.mulf %492, %447 : vector<2x128xf32>
    %494 = arith.truncf %480 : vector<2x16xf32> to vector<2x16xbf16>
    %c0_161 = arith.constant 0 : index
    %c0_162 = arith.constant 0 : index
    %495 = vector.load %arg6[%c0_161, %c0_162] : memref<16x384xbf16, #tpu.memory_space<vmem>>, vector<16x384xbf16>
    %cst_163 = arith.constant dense<0.000000e+00> : vector<2x384xf32>
    %496 = tpu.matmul %494, %495, %cst_163 {dimension_numbers = #tpu.dot_dimension_numbers<[1], [0], [0], [1], [0, 0, 1, 1], [], []>} : vector<2x16xbf16>, vector<16x384xbf16>, vector<2x384xf32> -> vector<2x384xf32>
    %497 = arith.addf %496, %484 : vector<2x384xf32>
    %498 = vector.broadcast %7 : vector<1x384xf32> to vector<2x384xf32>
    %499 = arith.addf %497, %498 : vector<2x384xf32>
    %500 = arith.truncf %493 : vector<2x128xf32> to vector<2x128xbf16>
    %c0_164 = arith.constant 0 : index
    %c0_165 = arith.constant 0 : index
    %501 = vector.load %arg10[%c0_164, %c0_165] : memref<128x256xbf16, #tpu.memory_space<vmem>>, vector<128x256xbf16>
    %cst_166 = arith.constant dense<0.000000e+00> : vector<2x256xf32>
    %502 = tpu.matmul %500, %501, %cst_166 {dimension_numbers = #tpu.dot_dimension_numbers<[1], [0], [0], [1], [0, 0, 1, 1], [], []>} : vector<2x128xbf16>, vector<128x256xbf16>, vector<2x256xf32> -> vector<2x256xf32>
    %503 = vector.extract_strided_slice %499 {offsets = [0, 0], sizes = [2, 256], strides = [1, 1]} : vector<2x384xf32> to vector<2x256xf32>
    %504 = arith.addf %503, %502 : vector<2x256xf32>
    %505 = arith.negf %504 : vector<2x256xf32>
    %506 = math.exp %505 : vector<2x256xf32>
    %cst_167 = arith.constant 1.000000e+00 : f32
    %507 = vector.broadcast %cst_167 : f32 to vector<2x256xf32>
    %508 = arith.addf %507, %506 : vector<2x256xf32>
    %509 = arith.divf %507, %508 : vector<2x256xf32>
    %510 = vector.extract_strided_slice %509 {offsets = [0, 0], sizes = [2, 128], strides = [1, 1]} : vector<2x256xf32> to vector<2x128xf32>
    %511 = vector.extract_strided_slice %509 {offsets = [0, 128], sizes = [2, 128], strides = [1, 1]} : vector<2x256xf32> to vector<2x128xf32>
    %512 = vector.extract_strided_slice %499 {offsets = [0, 256], sizes = [2, 128], strides = [1, 1]} : vector<2x384xf32> to vector<2x128xf32>
    %513 = arith.mulf %511, %493 : vector<2x128xf32>
    %514 = arith.truncf %513 : vector<2x128xf32> to vector<2x128xbf16>
    %c0_168 = arith.constant 0 : index
    %c0_169 = arith.constant 0 : index
    %515 = vector.load %arg11[%c0_168, %c0_169] : memref<128x128xbf16, #tpu.memory_space<vmem>>, vector<128x128xbf16>
    %cst_170 = arith.constant dense<0.000000e+00> : vector<2x128xf32>
    %516 = tpu.matmul %514, %515, %cst_170 {dimension_numbers = #tpu.dot_dimension_numbers<[1], [0], [0], [1], [0, 0, 1, 1], [], []>} : vector<2x128xbf16>, vector<128x128xbf16>, vector<2x128xf32> -> vector<2x128xf32>
    %517 = arith.addf %512, %516 : vector<2x128xf32>
    %518 = math.tanh %517 : vector<2x128xf32>
    %519 = arith.subf %518, %493 : vector<2x128xf32>
    %520 = arith.mulf %510, %519 : vector<2x128xf32>
    %521 = arith.addf %493, %520 : vector<2x128xf32>
    %522 = arith.truncf %521 : vector<2x128xf32> to vector<2x128xbf16>
    %523 = arith.index_cast %c6_i32 : i32 to index
    %c0_171 = arith.constant 0 : index
    %c0_172 = arith.constant 0 : index
    %524 = vector.load %arg12[%523, %c0_171, %c0_172] : memref<8x2x128xbf16, #tpu.memory_space<vmem>>, vector<1x2x128xbf16>
    %525 = vector.shape_cast %524 : vector<1x2x128xbf16> to vector<2x128xbf16>
    %526 = vector.shape_cast %522 : vector<2x128xbf16> to vector<1x2x128xbf16>
    tpu.vector_store %arg12[%523, %c0_171, %c0_172], %526 {strides = array<i32>} : memref<8x2x128xbf16, #tpu.memory_space<vmem>>, vector<1x2x128xbf16>,
    %c7_i32 = arith.constant 7 : i32
    %527 = arith.index_cast %c7_i32 : i32 to index
    %c0_173 = arith.constant 0 : index
    %c0_174 = arith.constant 0 : index
    %528 = vector.load %arg2[%527, %c0_173, %c0_174] : memref<8x2x64xf32, #tpu.memory_space<vmem>>, vector<1x2x64xf32>
    %529 = vector.shape_cast %528 : vector<1x2x64xf32> to vector<2x64xf32>
    %530 = vector.extract_strided_slice %529 {offsets = [0, 0], sizes = [2, 16], strides = [1, 1]} : vector<2x64xf32> to vector<2x16xf32>
    %531 = vector.extract_strided_slice %529 {offsets = [0, 16], sizes = [2, 16], strides = [1, 1]} : vector<2x64xf32> to vector<2x16xf32>
    %532 = vector.extract_strided_slice %529 {offsets = [0, 32], sizes = [2, 16], strides = [1, 1]} : vector<2x64xf32> to vector<2x16xf32>
    %533 = vector.extract_strided_slice %529 {offsets = [0, 48], sizes = [2, 16], strides = [1, 1]} : vector<2x64xf32> to vector<2x16xf32>
    %534 = vector.extract_strided_slice %529 {offsets = [0, 32], sizes = [2, 32], strides = [1, 1]} : vector<2x64xf32> to vector<2x32xf32>
    %535 = vector.broadcast %4 : vector<1x16xf32> to vector<2x16xf32>
    %536 = arith.mulf %533, %535 : vector<2x16xf32>
    %537 = vector.broadcast %5 : vector<1x16xf32> to vector<2x16xf32>
    %538 = arith.addf %536, %537 : vector<2x16xf32>
    %cst_175 = arith.constant 0.000000e+00 : f32
    %539 = vector.broadcast %cst_175 : f32 to vector<2x16xf32>
    %540 = arith.maximumf %538, %539 : vector<2x16xf32>
    %cst_176 = arith.constant 0.000000e+00 : f32
    %541 = vector.broadcast %cst_176 : f32 to vector<2x16xf32>
    %542 = arith.subf %541, %540 : vector<2x16xf32>
    %543 = math.exp %542 : vector<2x16xf32>
    %cst_177 = arith.constant 1.000000e+00 : f32
    %544 = vector.broadcast %cst_177 : f32 to vector<2x16xf32>
    %545 = arith.subf %544, %532 : vector<2x16xf32>
    %546 = arith.mulf %532, %530 : vector<2x16xf32>
    %547 = arith.mulf %543, %531 : vector<2x16xf32>
    %cst_178 = arith.constant 1.000000e+00 : f32
    %548 = vector.broadcast %cst_178 : f32 to vector<2x16xf32>
    %549 = arith.subf %548, %543 : vector<2x16xf32>
    %550 = vector.broadcast %3 : vector<1x16xf32> to vector<2x16xf32>
    %551 = arith.mulf %549, %550 : vector<2x16xf32>
    %552 = arith.addf %547, %551 : vector<2x16xf32>
    %553 = arith.mulf %545, %552 : vector<2x16xf32>
    %554 = arith.addf %546, %553 : vector<2x16xf32>
    %555 = arith.truncf %534 : vector<2x32xf32> to vector<2x32xbf16>
    %c0_179 = arith.constant 0 : index
    %c0_180 = arith.constant 0 : index
    %556 = vector.load %arg7[%c0_179, %c0_180] : memref<32x512xbf16, #tpu.memory_space<vmem>>, vector<32x512xbf16>
    %cst_181 = arith.constant dense<0.000000e+00> : vector<2x512xf32>
    %557 = tpu.matmul %555, %556, %cst_181 {dimension_numbers = #tpu.dot_dimension_numbers<[1], [0], [0], [1], [0, 0, 1, 1], [], []>} : vector<2x32xbf16>, vector<32x512xbf16>, vector<2x512xf32> -> vector<2x512xf32>
    %558 = vector.extract_strided_slice %557 {offsets = [0, 0], sizes = [2, 384], strides = [1, 1]} : vector<2x512xf32> to vector<2x384xf32>
    %559 = vector.extract_strided_slice %557 {offsets = [0, 384], sizes = [2, 128], strides = [1, 1]} : vector<2x512xf32> to vector<2x128xf32>
    %560 = vector.broadcast %6 : vector<1x128xf32> to vector<2x128xf32>
    %561 = arith.addf %559, %560 : vector<2x128xf32>
    %cst_182 = arith.constant 0.000000e+00 : f32
    %562 = vector.broadcast %cst_182 : f32 to vector<2x128xf32>
    %563 = arith.maximumf %561, %562 : vector<2x128xf32>
    %cst_183 = arith.constant 0.000000e+00 : f32
    %564 = vector.broadcast %cst_183 : f32 to vector<2x128xf32>
    %565 = arith.subf %564, %563 : vector<2x128xf32>
    %566 = math.exp %565 : vector<2x128xf32>
    %567 = arith.mulf %566, %521 : vector<2x128xf32>
    %568 = arith.truncf %554 : vector<2x16xf32> to vector<2x16xbf16>
    %c0_184 = arith.constant 0 : index
    %c0_185 = arith.constant 0 : index
    %569 = vector.load %arg6[%c0_184, %c0_185] : memref<16x384xbf16, #tpu.memory_space<vmem>>, vector<16x384xbf16>
    %cst_186 = arith.constant dense<0.000000e+00> : vector<2x384xf32>
    %570 = tpu.matmul %568, %569, %cst_186 {dimension_numbers = #tpu.dot_dimension_numbers<[1], [0], [0], [1], [0, 0, 1, 1], [], []>} : vector<2x16xbf16>, vector<16x384xbf16>, vector<2x384xf32> -> vector<2x384xf32>
    %571 = arith.addf %570, %558 : vector<2x384xf32>
    %572 = vector.broadcast %7 : vector<1x384xf32> to vector<2x384xf32>
    %573 = arith.addf %571, %572 : vector<2x384xf32>
    %574 = arith.truncf %567 : vector<2x128xf32> to vector<2x128xbf16>
    %c0_187 = arith.constant 0 : index
    %c0_188 = arith.constant 0 : index
    %575 = vector.load %arg10[%c0_187, %c0_188] : memref<128x256xbf16, #tpu.memory_space<vmem>>, vector<128x256xbf16>
    %cst_189 = arith.constant dense<0.000000e+00> : vector<2x256xf32>
    %576 = tpu.matmul %574, %575, %cst_189 {dimension_numbers = #tpu.dot_dimension_numbers<[1], [0], [0], [1], [0, 0, 1, 1], [], []>} : vector<2x128xbf16>, vector<128x256xbf16>, vector<2x256xf32> -> vector<2x256xf32>
    %577 = vector.extract_strided_slice %573 {offsets = [0, 0], sizes = [2, 256], strides = [1, 1]} : vector<2x384xf32> to vector<2x256xf32>
    %578 = arith.addf %577, %576 : vector<2x256xf32>
    %579 = arith.negf %578 : vector<2x256xf32>
    %580 = math.exp %579 : vector<2x256xf32>
    %cst_190 = arith.constant 1.000000e+00 : f32
    %581 = vector.broadcast %cst_190 : f32 to vector<2x256xf32>
    %582 = arith.addf %581, %580 : vector<2x256xf32>
    %583 = arith.divf %581, %582 : vector<2x256xf32>
    %584 = vector.extract_strided_slice %583 {offsets = [0, 0], sizes = [2, 128], strides = [1, 1]} : vector<2x256xf32> to vector<2x128xf32>
    %585 = vector.extract_strided_slice %583 {offsets = [0, 128], sizes = [2, 128], strides = [1, 1]} : vector<2x256xf32> to vector<2x128xf32>
    %586 = vector.extract_strided_slice %573 {offsets = [0, 256], sizes = [2, 128], strides = [1, 1]} : vector<2x384xf32> to vector<2x128xf32>
    %587 = arith.mulf %585, %567 : vector<2x128xf32>
    %588 = arith.truncf %587 : vector<2x128xf32> to vector<2x128xbf16>
    %c0_191 = arith.constant 0 : index
    %c0_192 = arith.constant 0 : index
    %589 = vector.load %arg11[%c0_191, %c0_192] : memref<128x128xbf16, #tpu.memory_space<vmem>>, vector<128x128xbf16>
    %cst_193 = arith.constant dense<0.000000e+00> : vector<2x128xf32>
    %590 = tpu.matmul %588, %589, %cst_193 {dimension_numbers = #tpu.dot_dimension_numbers<[1], [0], [0], [1], [0, 0, 1, 1], [], []>} : vector<2x128xbf16>, vector<128x128xbf16>, vector<2x128xf32> -> vector<2x128xf32>
    %591 = arith.addf %586, %590 : vector<2x128xf32>
    %592 = math.tanh %591 : vector<2x128xf32>
    %593 = arith.subf %592, %567 : vector<2x128xf32>
    %594 = arith.mulf %584, %593 : vector<2x128xf32>
    %595 = arith.addf %567, %594 : vector<2x128xf32>
    %596 = arith.truncf %595 : vector<2x128xf32> to vector<2x128xbf16>
    %597 = arith.index_cast %c7_i32 : i32 to index
    %c0_194 = arith.constant 0 : index
    %c0_195 = arith.constant 0 : index
    %598 = vector.load %arg12[%597, %c0_194, %c0_195] : memref<8x2x128xbf16, #tpu.memory_space<vmem>>, vector<1x2x128xbf16>
    %599 = vector.shape_cast %598 : vector<1x2x128xbf16> to vector<2x128xbf16>
    %600 = vector.shape_cast %596 : vector<2x128xbf16> to vector<1x2x128xbf16>
    tpu.vector_store %arg12[%597, %c0_194, %c0_195], %600 {strides = array<i32>} : memref<8x2x128xbf16, #tpu.memory_space<vmem>>, vector<1x2x128xbf16>,
    %c8_i32 = arith.constant 8 : i32
    %c0_196 = arith.constant 0 : index
    %c0_197 = arith.constant 0 : index
    %601 = vector.load %arg13[%c0_196, %c0_197] : memref<2x128xf32, #tpu.memory_space<vmem>>, vector<2x128xf32>
    tpu.vector_store %arg13[%c0_196, %c0_197], %595 {strides = array<i32>} : memref<2x128xf32, #tpu.memory_space<vmem>>, vector<2x128xf32>,
    return
  }
  func.func @transform_0(%arg0: i32, %arg1: i32) -> (i32, i32, i32) {
    %c0_i32 = arith.constant 0 : i32
    %c0_i32_0 = arith.constant 0 : i32
    return %arg1, %arg0, %c0_i32 : i32, i32, i32
  }
  func.func @transform_1(%arg0: i32, %arg1: i32) -> (i32, i32) {
    %c0_i32 = arith.constant 0 : i32
    %c0_i32_0 = arith.constant 0 : i32
    %c0_i32_1 = arith.constant 0 : i32
    return %c0_i32, %c0_i32_0 : i32, i32
  }
  func.func @transform_2(%arg0: i32, %arg1: i32) -> (i32, i32) {
    %c0_i32 = arith.constant 0 : i32
    %c0_i32_0 = arith.constant 0 : i32
    %c0_i32_1 = arith.constant 0 : i32
    return %c0_i32, %c0_i32_0 : i32, i32
  }
  func.func @transform_3(%arg0: i32, %arg1: i32) -> (i32, i32) {
    %c0_i32 = arith.constant 0 : i32
    %c0_i32_0 = arith.constant 0 : i32
    %c0_i32_1 = arith.constant 0 : i32
    return %c0_i32, %c0_i32_0 : i32, i32
  }
  func.func @transform_4(%arg0: i32, %arg1: i32) -> (i32, i32) {
    %c0_i32 = arith.constant 0 : i32
    %c0_i32_0 = arith.constant 0 : i32
    %c0_i32_1 = arith.constant 0 : i32
    return %c0_i32, %c0_i32_0 : i32, i32
  }
  func.func @transform_5(%arg0: i32, %arg1: i32) -> (i32, i32) {
    %c0_i32 = arith.constant 0 : i32
    %c0_i32_0 = arith.constant 0 : i32
    %c0_i32_1 = arith.constant 0 : i32
    return %c0_i32, %c0_i32_0 : i32, i32
  }
  func.func @transform_6(%arg0: i32, %arg1: i32) -> (i32, i32) {
    %c0_i32 = arith.constant 0 : i32
    %c0_i32_0 = arith.constant 0 : i32
    %c0_i32_1 = arith.constant 0 : i32
    return %c0_i32, %c0_i32_0 : i32, i32
  }
  func.func @transform_7(%arg0: i32, %arg1: i32) -> (i32, i32) {
    %c0_i32 = arith.constant 0 : i32
    %c0_i32_0 = arith.constant 0 : i32
    %c0_i32_1 = arith.constant 0 : i32
    return %c0_i32, %c0_i32_0 : i32, i32
  }
  func.func @transform_8(%arg0: i32, %arg1: i32) -> (i32, i32) {
    %c0_i32 = arith.constant 0 : i32
    %c0_i32_0 = arith.constant 0 : i32
    %c0_i32_1 = arith.constant 0 : i32
    return %c0_i32, %c0_i32_0 : i32, i32
  }
  func.func @transform_9(%arg0: i32, %arg1: i32) -> (i32, i32) {
    %c0_i32 = arith.constant 0 : i32
    %c0_i32_0 = arith.constant 0 : i32
    %c0_i32_1 = arith.constant 0 : i32
    return %c0_i32, %c0_i32_0 : i32, i32
  }
  func.func @transform_10(%arg0: i32, %arg1: i32) -> (i32, i32, i32) {
    %c0_i32 = arith.constant 0 : i32
    %c0_i32_0 = arith.constant 0 : i32
    return %arg1, %arg0, %c0_i32 : i32, i32, i32
  }
}

</mosaic_0001>

<bundles_post_ra>
// kernel: tpu_custom_call.1
= control target key start
LH: loop header
LB: loop body
LE: loop exit
PB: predicated region body
PF: predicated region fallthrough
CT: control target
= control target key end

     0   :  { %15 = vsyncpa [#allocation4], 0  ;;  %s6717_s0 = inlined_call_operand.hbm [shape: f32[8,2,64], index: 0, kind: input, shape index: {}]   ;;  %s6718_s1 = inlined_call_operand.vmem [shape: f32[1,16], index: 1, kind: input, shape index: {}]   ;;  %s6719_s2 = inlined_call_operand.vmem [shape: f32[1,16], index: 2, kind: input, shape index: {}]   ;;  %s6720_s3 = inlined_call_operand.vmem [shape: f32[1,16], index: 3, kind: input, shape index: {}]   ;;  %s6721_s4 = inlined_call_operand.hbm [shape: bf16[16,384], index: 4, kind: input, shape index: {}]   ;;  %s6722_s5 = inlined_call_operand.hbm [shape: bf16[32,512], index: 5, kind: input, shape index: {}]   ;;  %s6723_s6 = inlined_call_operand.vmem [shape: f32[1,384], index: 6, kind: input, shape index: {}]   ;;  %s6724_s7 = inlined_call_operand.vmem [shape: f32[1,128], index: 7, kind: input, shape index: {}]   ;;  %s6725_s8 = inlined_call_operand.hbm [shape: bf16[128,256], index: 8, kind: input, shape index: {}]   ;;  %s6726_s9 = inlined_call_operand.hbm [shape: bf16[128,128], index: 9, kind: input, shape index: {}]   ;;  %s6727_s10 = inlined_call_operand.hbm [shape: bf16[8,2,128], index: 10, kind: output, shape index: {}]  }
   0x1   :  { %16 = vsyncpa [#allocation7], 0 }
   0x2   :  { %17 = vsyncpa [#allocation10], 0 }
   0x3   :  { %18 = vsyncpa [#allocation5], 0  ;;  %s5716_s13 = smov [#allocation6]   ;;  %s5576_s17 = scalar_lea.hbm %s6721_s4, 384 }
   0x4   :  { %s42_s14 = sshll.u32 %s5716_s13, 4  ;;  %p5577_p0 = scmp.ne.s32.totalorder %s6721_s4, %s5576_s17  ;;  %s43_s14 = int_to_ptr.vmem [resolvable:$true] %s42_s14 }
   0x5   :  { %p5580_p1 = scmp.lt.u32.totalorder %s5576_s17, %s6721_s4 }
   0x7   :  { %p5582_p2 = pnand %p5580_p1, %p5577_p0 }
   0x9   :  { %5585 = shalt.err (!%p5582_p2)
}
   0xa   :  { %s5586_s22 = scalar_lea.vmem %s43_s14, 384  ;;  %p5591_p4 = scmp.lt.s32.totalorder %s43_s14, %s43_s14 }
   0xb   :  { %p5587_p3 = scmp.ne.s32.totalorder %s43_s14, %s5586_s22  ;;  %p5592_p5 = scmp.lt.s32.totalorder %s5586_s22, %s5586_s22 }
   0xd   :  { %p5593_p6 = por %p5592_p5, %p5591_p4 }
   0xf   :  { %p5594_p7 = pnand %p5593_p6, %p5587_p3 }
  0x11   :  { %5597 = shalt.err (!%p5594_p7)
}
  0x12   :  { %s5717_s23 = smov 192   ;;  %s5718_s24 = smov 12  }
  0x13   :  { %48 = dma.hbm_to_vmem [thread:$0]  %s6721_s4, 384, %s43_s14, [#allocation7], %s5717_s23, %s5717_s23, %s5718_s24  }
  0x14   :  { %s5719_s27 = smov [#allocation9]   ;;  %s5598_s11 = scalar_lea.hbm %s6725_s8, 2048 }
  0x15   :  { %s70_s28 = sshll.u32 %s5719_s27, 4  ;;  %p5599_p8 = scmp.ne.s32.totalorder %s6725_s8, %s5598_s11  ;;  %s71_s28 = int_to_ptr.vmem [resolvable:$true] %s70_s28 }
  0x16   :  { %p5602_p9 = scmp.lt.u32.totalorder %s5598_s11, %s6725_s8 }
  0x18   :  { %p5604_p10 = pnand %p5602_p9, %p5599_p8 }
  0x1a   :  { %5607 = shalt.err (!%p5604_p10)
}
  0x1b   :  { %s5608_s17 = scalar_lea.vmem %s71_s28, 2048  ;;  %p5613_p12 = scmp.lt.s32.totalorder %s71_s28, %s71_s28 }
  0x1c   :  { %p5609_p11 = scmp.ne.s32.totalorder %s71_s28, %s5608_s17  ;;  %p5614_p13 = scmp.lt.s32.totalorder %s5608_s17, %s5608_s17 }
  0x1e   :  { %p5615_p0 = por %p5614_p13, %p5613_p12 }
  0x20   :  { %p5616_p1 = pnand %p5615_p0, %p5609_p11 }
  0x22   :  { %5619 = shalt.err (!%p5616_p1)
}
  0x23   :  { %s5720_s4 = smov 128   ;;  %s5721_s14 = smov 8  }
  0x24   :  { %76 = dma.hbm_to_vmem [thread:$0]  %s6725_s8, 2048, %s71_s28, [#allocation10], %s5720_s4, %s5720_s4, %s5721_s14  }
  0x25   :  { %s5722_s20 = smov [#allocation3]   ;;  %s5620_s24 = scalar_lea.hbm %s6717_s0, 256 }
  0x26   :  { %s24_s21 = sshll.u32 %s5722_s20, 4  ;;  %p5621_p2 = scmp.ne.s32.totalorder %s6717_s0, %s5620_s24  ;;  %s25_s21 = int_to_ptr.vmem [resolvable:$true] %s24_s21 }
  0x27   :  { %p5624_p3 = scmp.lt.u32.totalorder %s5620_s24, %s6717_s0 }
  0x29   :  { %p5626_p4 = pnand %p5624_p3, %p5621_p2 }
  0x2b   :  { %5629 = shalt.err (!%p5626_p4)
}
  0x2c   :  { %s5630_s30 = scalar_lea.vmem %s25_s21, 256  ;;  %p5635_p6 = scmp.lt.s32.totalorder %s25_s21, %s25_s21 }
  0x2d   :  { %p5631_p5 = scmp.ne.s32.totalorder %s25_s21, %s5630_s30  ;;  %p5636_p7 = scmp.lt.s32.totalorder %s5630_s30, %s5630_s30 }
  0x2f   :  { %p5637_p8 = por %p5636_p7, %p5635_p6 }
  0x31   :  { %p5638_p9 = pnand %p5637_p8, %p5631_p5 }
  0x33   :  { %5641 = shalt.err (!%p5638_p9)
}
  0x34   :  { %s5723_s8 = smov 32   ;;  %s5724_s28 = smov 2  }
  0x35   :  { %30 = dma.hbm_to_vmem [thread:$0]  %s6717_s0, 256, %s25_s21, [#allocation4], %s5723_s8, %s5723_s8, %s5724_s28  }
  0x36   :  { %s5725_s13 = smov [#allocation8]   ;;  %s5642_s4 = scalar_lea.hbm %s6722_s5, 1024 }
  0x37   :  { %s54_s15 = sshll.u32 %s5725_s13, 4  ;;  %p5643_p10 = scmp.ne.s32.totalorder %s6722_s5, %s5642_s4  ;;  %s55_s15 = int_to_ptr.vmem [resolvable:$true] %s54_s15 }
  0x38   :  { %p5646_p11 = scmp.lt.u32.totalorder %s5642_s4, %s6722_s5 }
  0x3a   :  { %p5648_p12 = pnand %p5646_p11, %p5643_p10 }
  0x3c   :  { %5651 = shalt.err (!%p5648_p12)
}
  0x3d   :  { %s5652_s22 = scalar_lea.vmem %s55_s15, 1024  ;;  %p5657_p0 = scmp.lt.s32.totalorder %s55_s15, %s55_s15 }
  0x3e   :  { %p5653_p13 = scmp.ne.s32.totalorder %s55_s15, %s5652_s22  ;;  %p5658_p1 = scmp.lt.s32.totalorder %s5652_s22, %s5652_s22 }
  0x40   :  { %p5659_p2 = por %p5658_p1, %p5657_p0 }
  0x42   :  { %p5660_p3 = pnand %p5659_p2, %p5653_p13 }
  0x44   :  { %5663 = shalt.err (!%p5660_p3)
}
  0x45   :  { %s5726_s0 = smov 256   ;;  %s5727_s21 = smov 16  }
  0x46   :  { %60 = dma.hbm_to_vmem [thread:$0]  %s6722_s5, 1024, %s55_s15, [#allocation7], %s5726_s0, %s5726_s0, %s5727_s21  }
  0x47   :  { %s5728_s25 = smov [#allocation11]   ;;  %s5664_s30 = scalar_lea.hbm %s6726_s9, 1024 }
  0x48   :  { %s82_s26 = sshll.u32 %s5728_s25, 4  ;;  %p5665_p4 = scmp.ne.s32.totalorder %s6726_s9, %s5664_s30  ;;  %s83_s26 = int_to_ptr.vmem [resolvable:$true] %s82_s26 }
  0x49   :  { %p5668_p5 = scmp.lt.u32.totalorder %s5664_s30, %s6726_s9 }
  0x4b   :  { %p5670_p6 = pnand %p5668_p5, %p5665_p4 }
  0x4d   :  { %5673 = shalt.err (!%p5670_p6)
}
  0x4e   :  { %s5674_s16 = scalar_lea.vmem %s83_s26, 1024  ;;  %p5679_p8 = scmp.lt.s32.totalorder %s83_s26, %s83_s26 }
  0x4f   :  { %p5675_p7 = scmp.ne.s32.totalorder %s83_s26, %s5674_s16  ;;  %p5680_p9 = scmp.lt.s32.totalorder %s5674_s16, %s5674_s16 }
  0x51   :  { %p5681_p10 = por %p5680_p9, %p5679_p8 }
  0x53   :  { %p5682_p11 = pnand %p5681_p10, %p5675_p7 }
  0x55   :  { %5685 = shalt.err (!%p5682_p11)
}
  0x56   :  { %s5729_s5 = smov 64   ;;  %s5730_s15 = smov 4  }
  0x57   :  { %88 = dma.hbm_to_vmem [thread:$0]  %s6726_s9, 1024, %s83_s26, [#allocation10], %s5729_s5, %s5729_s5, %s5730_s15  }
  0x58   :  { %5708 = dma.done.wait [#allocation4], 256  }
  0x59   :  { %5709 = vsyncadd [#allocation4], 4294967040 }
  0x5a   :  { %5710 = dma.done.wait [#allocation7], 1408  }
  0x5b   :  { %5711 = vsyncadd [#allocation7], 4294965888 }
  0x5c   :  { %5712 = dma.done.wait [#allocation10], 3072  }
  0x5d   :  { %5713 = vsyncadd [#allocation10], 4294964224  ;;  %v5731_v0 = vmov 0   ;;  %v5859_v1 = vld [vmem:[#allocation3] sm:$0x3]  ;;  %s5732_s9 = smov 48  }
  0x5e   :  { %251 = vmatprep.mubr.bf16.mxu0 %v5731_v0  ;;  %292 = vmatprep.mubr.bf16.mxu1 %v5731_v0  ;;  %v4535_v2 = vld [vmem:[%s6720_s3] ss:$0 sm:$0xff]  ;;  %v163_v3 = vpack.c.bf16 %v5859_v1, %v5859_v1  ;;  %s5733_s22 = smov 96   ;;  %v5872_v6 = vld [vmem:[#allocation8 + $0xc] ss:$16 sps:$4 sm:$0xff]   ;;  %vm215_vm0 = vcmask 261120  }
  0x5f   :  { %131 = vrot.lane.b32.xlu1 %v4535_v2, %s5732_s9  ;;  %v4534_v4 = vld [vmem:[%s6719_s2] ss:$0 sm:$0xff]  ;;  %v5874_v7 = vld [vmem:[#allocation8] ss:$16 sps:$4 sm:$0xff]   ;;  %v5876_v8 = vld [vmem:[#allocation8 + $0x8] ss:$16 sps:$4 sm:$0xff]   ;;  %260 = vmatprep.subr.bf16.mxu1 %v5872_v6 }
  0x60   :  { %v5869_v5 = vld [vmem:[#allocation8 + $0x4] ss:$16 sps:$4 sm:$0xff]   ;;  %173 = vrot.lane.b32.xlu0 %v163_v3, %s5733_s22  ;;  %v5884_v10 = vld [vmem:[#allocation8 + $0x2c] ss:$16 sps:$4 sm:$0xff]   ;;  %261 = vmatpush1.bf16.msra.mxu1 %v5876_v8  ;;  %v5891_v12 = vld [vmem:[#allocation8 + $0x20] ss:$16 sps:$4 sm:$0xff]  }
  0x61   :  { %219 = vmatprep.subr.bf16.mxu0 %v5869_v5  ;;  %v5879_v9 = vld [vmem:[#allocation8 + $0x24] ss:$16 sps:$4 sm:$0xff]   ;;  %v5893_v13 = vld [vmem:[#allocation8 + $0x28] ss:$16 sps:$4 sm:$0xff]   ;;  %262 = vmatprep.subr.bf16.mxu1 %v5884_v10  ;;  %v5904_v16 = vld [vmem:[#allocation3 + $0x4] sm:$0x3] }
  0x62   :  { %v4536_v11 = vld [vmem:[%s6718_s1] ss:$0 sm:$0xff]  ;;  %220 = vmatpush1.bf16.msra.mxu0 %v5874_v7  ;;  %v5901_v15 = vld [vmem:[#allocation3 + $0x2] sm:$0x3]  ;;  %v5906_v17 = vld [vmem:[#allocation3 + $0x6] sm:$0x3] }
  0x63   :  { %141 = vrot.lane.b32.xlu1 %v5859_v1, %s5723_s8  ;;  %221 = vmatprep.subr.bf16.mxu0 %v5879_v9  ;;  %v5908_v18 = vld [vmem:[#allocation3 + $0x8] sm:$0x3]  ;;  %v5910_v19 = vld [vmem:[#allocation3 + $0xa] sm:$0x3]  ;;  %v5912_v20 = vld [vmem:[#allocation3 + $0xc] sm:$0x3]  ;;  %v730_v56 = vpack.c.bf16 %v5901_v15, %v5901_v15 }
  0x64   :  { %122 = vrot.lane.b32.xlu0 %v4534_v4, %s5732_s9  ;;  %263 = vmatpush1.bf16.msra.mxu1 %v5893_v13  ;;  %v3971_v21 = vld [vmem:[#allocation3 + $0xe] sm:$0x3]  ;;  %s5734_s1 = smov 112   ;;  %v5735_v50 = vmov 0.0   ;;  %v5939_v51 = vld [vmem:[#allocation6] ss:$12 sps:$4 sm:$0xff]  }
  0x65   :  { %109 = vst [vmem:[#allocation2] sm:$0x3] %v5735_v50  ;;  %4954 = vmatprep.subr.bf16.mxu1 %v5735_v50  ;;  %v5941_v52 = vld [vmem:[#allocation6 + $0x4] ss:$12 sps:$4 sm:$0xff]   ;;  %v5280_v53 = vld [vmem:[#allocation6 + $0x8] ss:$12 sps:$4 sm:$0xff]  }
  0x66   :  { %222 = vmatpush1.bf16.msra.mxu0 %v5891_v12  ;;  %v5943_v54 = vld [vmem:[#allocation9 + $0x4] ss:$8 sps:$4 sm:$0xff]   ;;  %vm5736_vm1 = vmmov 0   ;;  %v139_v55 = vsub.f32 1.0, %v5859_v1  ;;  %vm337_vm2 = vcmask 130048  }
  0x67   :  { %341 = vmatprep.subr.bf16.mxu0 %v5941_v52 }
  0x68   :  { %152 = vrot.lane.b32.xlu0 %v4536_v11, %s5732_s9 }
  0xd1   :  { %v132_v23 = vpop.permute.xlu1 %131 }
  0xd2   :  { %v174_v14 = vpop.permute.xlu0 %173 }
  0xd3   :  { %4545 = vmatmul.mubr.msk.bf16.vlgmr.msra.gmra.mrb[0].mxu0 %vm215_vm0, %v174_v14  ;;  %4546 = vmatmul.mubr.msk.bf16.vlgmr.msra.gmra.mrb[0].mxu1 %vm215_vm0, %v174_v14 }
  0xd4   :  { %373 = vmatprep.mubr.bf16.mxu0 %v5731_v0  ;;  %4955 = vmatpush3.bf16.msra.mxu1 %v5280_v53  ;;  %v6006_v53 = vld [vmem:[#allocation9 + $0x64] ss:$8 sps:$4 sm:$0xff]  }
  0xd5   :  { %v142_v44 = vpop.permute.xlu1 %141  ;;  %342 = vmatpush1.bf16.msra.mxu0 %v5939_v51  ;;  %4956 = vmatprep.mubr.msk.bf16.mxu1 %vm5736_vm1, %v5735_v50 }
  0xd6   :  { %v123_v22 = vpop.permute.xlu0 %122  ;;  %538 = vmatprep.subr.bf16.mxu0 %v5943_v54  ;;  %4960 = vmatprep.subr.bf16.mxu1 %v5735_v50  ;;  %v144_v58 = vmul.f32 %v142_v44, %v5859_v1 }
  0xd7   :  { %v125_v24 = vmul.f32 %v123_v22, %v5859_v1  ;;  %v708_v25 = vmul.f32 %v5901_v15, %v123_v22  ;;  %v1252_v26 = vmul.f32 %v5904_v16, %v123_v22  ;;  %v1796_v27 = vmul.f32 %v5906_v17, %v123_v22  ;;  %v5964_v1 = vld [vmem:[%s6724_s7] ss:$0 sm:$0xff] }
  0xd8   :  { %v2340_v28 = vmul.f32 %v5908_v18, %v123_v22  ;;  %v2884_v29 = vmul.f32 %v5910_v19, %v123_v22  ;;  %v3428_v30 = vmul.f32 %v5912_v20, %v123_v22  ;;  %v3972_v31 = vmul.f32 %v3971_v21, %v123_v22 }
  0xd9   :  { %v134_v32 = vadd.f32 %v132_v23, %v125_v24  ;;  %v709_v33 = vadd.f32 %v708_v25, %v132_v23  ;;  %v5921_v34 = vadd.f32 %v1252_v26, %v132_v23  ;;  %v5923_v35 = vadd.f32 %v1796_v27, %v132_v23  ;;  %v5969_v24 = vld [vmem:[#allocation9 + $0x14] ss:$8 sps:$4 sm:$0xff]  }
  0xda   :  { %v5925_v36 = vadd.f32 %v2340_v28, %v132_v23  ;;  %v5927_v37 = vadd.f32 %v2884_v29, %v132_v23  ;;  %v5929_v38 = vadd.f32 %v3428_v30, %v132_v23  ;;  %v5931_v39 = vadd.f32 %v3972_v31, %v132_v23  ;;  %v5933_v45 = vpop.permute.xlu0 %152  ;;  %v5967_v23 = vld [vmem:[#allocation9] ss:$8 sps:$4 sm:$0xff]   ;;  %v5974_v28 = vld [vmem:[#allocation9 + $0x10] ss:$8 sps:$4 sm:$0xff]   ;;  %v5978_v29 = vld [vmem:[#allocation9 + $0x24] ss:$8 sps:$4 sm:$0xff]  }
  0xdb   :  { %v135_v40 = vmax.f32 %v134_v32, 0.0  ;;  %v710_v4 = vmax.f32 %v709_v33, 0.0 }
  0xdd   :  { %v136_v41 = vsub.f32 0.0, %v135_v40  ;;  %v711_v11 = vsub.f32 0.0, %v710_v4  ;;  %v5984_v40 = vld [vmem:[#allocation9 + $0x20] ss:$8 sps:$4 sm:$0xff]  }
  0xdf   :  { %v137_v42 = vmul.f32 1.442695, %v136_v41  ;;  %v712_v14 = vmul.f32 1.442695, %v711_v11 }
  0xe1   :  { %5454 = vpow2.f32 %v137_v42  ;;  %v5987_v42 = vld [vmem:[#allocation9 + $0x34] ss:$8 sps:$4 sm:$0xff]  }
  0xe2   :  { %5456 = vpow2.f32 %v712_v14  ;;  %v5305_v14 = vld [vmem:[#allocation11] sm:$0xff]  }
  0xeb   :  { %v5455_v43 = vpop.eup %5454 }
  0xec   :  { %v146_v46 = vsub.f32 1.0, %v5455_v43  ;;  %v145_v47 = vmul.f32 %v5455_v43, %v142_v44  ;;  %v5457_v21 = vpop.eup %5456  ;;  %v5991_v44 = vld [vmem:[#allocation9 + $0x30] ss:$8 sps:$4 sm:$0xff]  }
  0xed   :  { %v721_v26 = vsub.f32 1.0, %v5457_v21 }
  0xee   :  { %v155_v48 = vmul.f32 %v5933_v45, %v146_v46  ;;  %v5994_v46 = vld [vmem:[#allocation9 + $0x44] ss:$8 sps:$4 sm:$0xff]  }
  0xef   :  { %v722_v32 = vmul.f32 %v721_v26, %v5933_v45  ;;  %v5306_v26 = vld [vmem:[#allocation11 + $0x8] sm:$0xff]  }
  0xf0   :  { %v156_v49 = vadd.f32 %v155_v48, %v145_v47  ;;  %v5997_v47 = vld [vmem:[#allocation9 + $0x40] ss:$8 sps:$4 sm:$0xff]   ;;  %v6000_v48 = vld [vmem:[#allocation9 + $0x54] ss:$8 sps:$4 sm:$0xff]  }
  0xf2   :  { %158 = vrot.lane.b32.xlu1 %v156_v49, %s5734_s1  ;;  %v6003_v49 = vld [vmem:[#allocation9 + $0x50] ss:$8 sps:$4 sm:$0xff]  }
  0xf6   :  { %740 = vrot.lane.b32.xlu1 %v730_v56, %s5733_s22  ;;  %v6012_v56 = vld [vmem:[#allocation9 + $0x74] ss:$8 sps:$4 sm:$0xff]  }
 0x164   :  { %v159_v57 = vpop.permute.xlu1 %158 }
 0x165   :  { %v161_v59 = vmul.f32 %v159_v57, %v139_v55  ;;  %v6009_v55 = vld [vmem:[#allocation9 + $0x60] ss:$8 sps:$4 sm:$0xff]  }
 0x167   :  { %v162_v60 = vadd.f32 %v161_v59, %v144_v58  ;;  %v115_v58 = vld [vmem:[#allocation2] sm:$0x3]  ;;  %v6015_v59 = vld [vmem:[#allocation9 + $0x70] ss:$8 sps:$4 sm:$0xff]  }
 0x169   :  { %v313_v61 = vpack.c.bf16 %v162_v60, %v162_v60 }
 0x16b   :  { %319 = vrot.lane.b32.xlu0 %v313_v61, %s5733_s22 }
 0x16f   :  { %716 = vrot.lane.b32.xlu0 %v5901_v15, %s5723_s8 }
 0x1a6   :  { %v5959_v62 = vpop.f32.mrb[0].mxu1 }
 0x1a7   :  { %v296_v63 = vpop.f32.mrb[1].mxu1 }
 0x1a8   :  { %v298_v2 = vpop.f32.mrb[2].mxu1  ;;  %v307_v22 = vadd.f32 %v5964_v1, %v296_v63  ;;  %v6029_v63 = vpop.permute.xlu1 %740 }
 0x1a9   :  { %v299_v3 = vpop.f32.mrb[3].mxu1 }
 0x1aa   :  { %v308_v27 = vmax.f32 %v307_v22, 0.0  ;;  %v1274_v22 = vpack.c.bf16 %v5904_v16, %v5904_v16 }
 0x1ac   :  { %v309_v33 = vsub.f32 0.0, %v308_v27 }
 0x1ae   :  { %v310_v43 = vmul.f32 1.442695, %v309_v33  ;;  %v5307_v33 = vld [vmem:[#allocation11 + $0x10] sm:$0xff]  }
 0x1b0   :  { %5458 = vpow2.f32 %v310_v43  ;;  %v5308_v43 = vld [vmem:[#allocation11 + $0x18] sm:$0xff]  }
 0x1ba   :  { %v5459_v57 = vpop.eup %5458 }
 0x1bb   :  { %v6017_v60 = vmul.f32 %v5459_v57, %v115_v58  ;;  %v5311_v57 = vld [vmem:[#allocation11 + $0x30] sm:$0xff]   ;;  %v5312_v58 = vld [vmem:[#allocation11 + $0x38] sm:$0xff]  }
 0x1bd   :  { %v441_v61 = vpack.c.bf16 %v6017_v60, %v6017_v60 }
 0x1dd   :  { %v320_v25 = vpop.permute.xlu0 %319 }
 0x1de   :  { %4551 = vmatmul.mubr.msk.bf16.vlgmr.msra.gmra.mrb[0].mxu0 %vm337_vm2, %v320_v25  ;;  %4957 = vmatmul.mubr.msk.bf16.vlgmr.msra.gmra.mrb[4].mxu1 %vm337_vm2, %v320_v25 }
 0x1df   :  { %539 = vmatpush1.bf16.msra.mxu0 %v5967_v23  ;;  %570 = vmatprep.mubr.bf16.mxu0 %v5731_v0 }
 0x1e0   :  { %540 = vmatprep.subr.bf16.mxu0 %v5969_v24  ;;  %4976 = vmatprep.mubr.msk.bf16.mxu1 %vm5736_vm1, %v5735_v50 }
 0x1e1   :  { %v717_v30 = vpop.permute.xlu0 %716  ;;  %4961 = vmatpush3.bf16.msra.mxu1 %v5305_v14 }
 0x1e2   :  { %v720_v31 = vmul.f32 %v5457_v21, %v717_v30  ;;  %v714_v21 = vsub.f32 1.0, %v5901_v15  ;;  %4962 = vmatprep.subr.bf16.mxu1 %v5735_v50  ;;  %v719_v25 = vmul.f32 %v717_v30, %v5901_v15  ;;  %v5309_v15 = vld [vmem:[#allocation11 + $0x20] sm:$0xff]   ;;  %v5310_v30 = vld [vmem:[#allocation11 + $0x28] sm:$0xff]  }
 0x1e3   :  { %541 = vmatpush1.bf16.msra.mxu0 %v5974_v28 }
 0x1e4   :  { %v723_v41 = vadd.f32 %v722_v32, %v720_v31  ;;  %542 = vmatprep.subr.bf16.mxu0 %v5978_v29 }
 0x1e5   :  { %4963 = vmatpush3.bf16.msra.mxu1 %v5306_v26 }
 0x1e6   :  { %725 = vrot.lane.b32.xlu1 %v723_v41, %s5734_s1  ;;  %4964 = vmatprep.subr.bf16.mxu1 %v5735_v50 }
 0x1e7   :  { %543 = vmatpush1.bf16.msra.mxu0 %v5984_v40 }
 0x1e8   :  { %544 = vmatprep.subr.bf16.mxu0 %v5987_v42 }
 0x1e9   :  { %4965 = vmatpush3.bf16.msra.mxu1 %v5307_v33 }
 0x1ea   :  { %1284 = vrot.lane.b32.xlu1 %v1274_v22, %s5733_s22  ;;  %4966 = vmatprep.subr.bf16.mxu1 %v5735_v50 }
 0x1eb   :  { %545 = vmatpush1.bf16.msra.mxu0 %v5991_v44 }
 0x1ec   :  { %546 = vmatprep.subr.bf16.mxu0 %v5994_v46 }
 0x1ed   :  { %4967 = vmatpush3.bf16.msra.mxu1 %v5308_v43 }
 0x1ee   :  { %4968 = vmatprep.subr.bf16.mxu1 %v5735_v50 }
 0x1ef   :  { %547 = vmatpush1.bf16.msra.mxu0 %v5997_v47 }
 0x1f0   :  { %548 = vmatprep.subr.bf16.mxu0 %v6000_v48 }
 0x1f1   :  { %4969 = vmatpush3.bf16.msra.mxu1 %v5309_v15 }
 0x1f2   :  { %4970 = vmatprep.subr.bf16.mxu1 %v5735_v50 }
 0x1f3   :  { %549 = vmatpush1.bf16.msra.mxu0 %v6003_v49 }
 0x1f4   :  { %550 = vmatprep.subr.bf16.mxu0 %v6006_v53 }
 0x1f5   :  { %4971 = vmatpush3.bf16.msra.mxu1 %v5310_v30 }
 0x1f6   :  { %4972 = vmatprep.subr.bf16.mxu1 %v5735_v50 }
 0x1f7   :  { %551 = vmatpush1.bf16.msra.mxu0 %v6009_v55 }
 0x1f8   :  { %552 = vmatprep.subr.bf16.mxu0 %v6012_v56 }
 0x1f9   :  { %4973 = vmatpush3.bf16.msra.mxu1 %v5311_v57 }
 0x1fa   :  { %4974 = vmatprep.subr.bf16.mxu1 %v5735_v50 }
 0x1fb   :  { %553 = vmatpush1.bf16.msra.mxu0 %v6015_v59 }
 0x1fc   :  { %785 = vmatprep.subr.bf16.mxu0 %v5869_v5 }
 0x1fd   :  { %4975 = vmatpush3.bf16.msra.mxu1 %v5312_v58 }
 0x1fe   :  { %571 = vmatmul.mubr.bf16.vlgmr.msra.gmra.mrb[0].mxu0 %v441_v61  ;;  %826 = vmatprep.subr.bf16.mxu1 %v5872_v6 }
 0x1ff   :  { %786 = vmatpush1.bf16.msra.mxu0 %v5874_v7  ;;  %817 = vmatprep.mubr.bf16.mxu0 %v5731_v0  ;;  %v423_v7 = vlaneseq }
 0x200   :  { %787 = vmatprep.subr.bf16.mxu0 %v5879_v9  ;;  %v114_v9 = vld [vmem:[%s6723_s6] sm:$0x7] }
 0x201   :  { %v424_v2 = vshrl.u32 %v423_v7, 7 }
 0x203   :  { %788 = vmatpush1.bf16.msra.mxu0 %v5891_v12  ;;  %v433_v12 = vsub.s32 2, %v424_v2  ;;  %v425_v3 = vsub.s32 0, %v424_v2  ;;  %v429_v26 = vsub.s32 1, %v424_v2 }
 0x204   :  { %900 = vmatprep.subr.bf16.mxu0 %v5941_v52 }
 0x205   :  { %v6039_v4 = vrot.slane %v114_v9, %v433_v12  ;;  %v6041_v11 = vrot.slane %v114_v9, %v425_v3 }
 0x206   :  { %4587 = vmatmul.mubr.msk.bf16.vlgmr.msra.gmra.mrb[4].mxu0 %vm215_vm0, %v6029_v63 }
 0x207   :  { %901 = vmatpush1.bf16.msra.mxu0 %v5939_v51  ;;  %932 = vmatprep.mubr.bf16.mxu0 %v5731_v0 }
 0x208   :  { %1081 = vmatprep.subr.bf16.mxu0 %v5943_v54 }
 0x258   :  { %v726_v27 = vpop.permute.xlu1 %725 }
 0x259   :  { %v728_v31 = vmul.f32 %v726_v27, %v714_v21  ;;  %v1254_v21 = vmax.f32 %v5921_v34, 0.0 }
 0x25b   :  { %v729_v32 = vadd.f32 %v728_v31, %v719_v25  ;;  %v1255_v22 = vsub.f32 0.0, %v1254_v21  ;;  %v6063_v31 = vrot.slane %v114_v9, %v429_v26  ;;  %v5313_v21 = vld [vmem:[#allocation6 + $0x8] ss:$12 sps:$4 sm:$0xff]  }
 0x25d   :  { %v873_v41 = vpack.c.bf16 %v729_v32, %v729_v32  ;;  %v1256_v25 = vmul.f32 1.442695, %v1255_v22 }
 0x25f   :  { %879 = vrot.lane.b32.xlu0 %v873_v41, %s5733_s22  ;;  %5460 = vpow2.f32 %v1256_v25 }
 0x263   :  { %1260 = vrot.lane.b32.xlu0 %v5904_v16, %s5723_s8 }
 0x269   :  { %v5461_v27 = vpop.eup %5460 }
 0x2b1   :  { %v416_v61 = vpop.f32.mrb[4].mxu1 }
 0x2b2   :  { %v6060_v7 = vadd.f32 %v416_v61, %v5959_v62  ;;  %v4958_v12 = vpop.f32.mrb[5].mxu1  ;;  %v1265_v62 = vsub.f32 1.0, %v5461_v27 }
 0x2b3   :  { %v419_v3 = vpop.f32.mrb[6].mxu1 }
 0x2b4   :  { %v4959_v14 = vpop.f32.mrb[7].mxu1  ;;  %v1266_v15 = vmul.f32 %v1265_v62, %v5933_v45 }
 0x2d1   :  { %v6065_v32 = vpop.f32.mrb[0].mxu0  ;;  %v880_v33 = vpop.permute.xlu0 %879 }
 0x2d2   :  { %v574_v6 = vpop.f32.mrb[1].mxu0  ;;  %4592 = vmatmul.mubr.msk.bf16.vlgmr.msra.gmra.mrb[4].mxu0 %vm337_vm2, %v880_v33 }
 0x2d3   :  { %v5163_v41 = vadd.f32 %v574_v6, %v6063_v31  ;;  %v576_v43 = vpop.f32.mrb[2].mxu0  ;;  %1082 = vmatpush1.bf16.msra.mxu0 %v5967_v23  ;;  %1113 = vmatprep.mubr.bf16.mxu0 %v5731_v0 }
 0x2d4   :  { %v577_v34 = vpop.f32.mrb[3].mxu0  ;;  %1083 = vmatprep.subr.bf16.mxu0 %v5969_v24 }
 0x2d5   :  { %v4570_v2 = vmul.f32 -1.442695, %v5163_v41  ;;  %v1261_v9 = vpop.permute.xlu0 %1260 }
 0x2d6   :  { %v1264_v30 = vmul.f32 %v5461_v27, %v1261_v9  ;;  %v1798_v27 = vmax.f32 %v5923_v35, 0.0 }
 0x2d7   :  { %5462 = vpow2.f32 %v4570_v2  ;;  %1084 = vmatpush1.bf16.msra.mxu0 %v5974_v28  ;;  %v440_v2 = vadd.f32 %v6039_v4, %v6060_v7 }
 0x2d8   :  { %v1267_v57 = vadd.f32 %v1266_v15, %v1264_v30  ;;  %1085 = vmatprep.subr.bf16.mxu0 %v5978_v29 }
 0x2da   :  { %1269 = vrot.lane.b32.xlu1 %v1267_v57, %s5734_s1 }
 0x2db   :  { %1086 = vmatpush1.bf16.msra.mxu0 %v5984_v40 }
 0x2dc   :  { %1087 = vmatprep.subr.bf16.mxu0 %v5987_v42 }
 0x2df   :  { %1088 = vmatpush1.bf16.msra.mxu0 %v5991_v44 }
 0x2e0   :  { %1089 = vmatprep.subr.bf16.mxu0 %v5994_v46 }
 0x2e1   :  { %v5463_v58 = vpop.eup %5462 }
 0x2e2   :  { %v588_v61 = vadd.f32 1.0, %v5463_v58 }
 0x2e3   :  { %1090 = vmatpush1.bf16.msra.mxu0 %v5997_v47 }
 0x2e4   :  { %5464 = vrcp.f32 %v588_v61  ;;  %1091 = vmatprep.subr.bf16.mxu0 %v6000_v48 }
 0x2e7   :  { %1092 = vmatpush1.bf16.msra.mxu0 %v6003_v49 }
 0x2e8   :  { %1093 = vmatprep.subr.bf16.mxu0 %v6006_v53 }
 0x2eb   :  { %1094 = vmatpush1.bf16.msra.mxu0 %v6009_v55 }
 0x2ec   :  { %1095 = vmatprep.subr.bf16.mxu0 %v6012_v56 }
 0x2ee   :  { %v5465_v12 = vpop.eup %5464 }
 0x2ef   :  { %v593_v3 = vmul.f32 %v5465_v12, %v6017_v60  ;;  %1096 = vmatpush1.bf16.msra.mxu0 %v6015_v59 }
 0x2f0   :  { %1329 = vmatprep.subr.bf16.mxu0 %v5869_v5  ;;  %v6102_v5 = vpop.permute.xlu1 %1284 }
 0x2f1   :  { %v594_v14 = vpack.c.bf16 %v593_v3, %v593_v3 }
 0x2f3   :  { %4977 = vmatmul.mubr.bf16.vlgmr.msra.gmra.mrb[8].mxu1 %v594_v14 }
 0x2f4   :  { %827 = vmatpush1.bf16.msra.mxu1 %v5876_v8  ;;  %858 = vmatprep.mubr.bf16.mxu1 %v5731_v0  ;;  %v1258_v8 = vsub.f32 1.0, %v5904_v16 }
 0x2f5   :  { %828 = vmatprep.subr.bf16.mxu1 %v5884_v10  ;;  %v1263_v10 = vmul.f32 %v1261_v9, %v5904_v16  ;;  %v5162_v16 = vadd.f32 %v6065_v32, %v6041_v11 }
 0x2f7   :  { %v4569_v62 = vmul.f32 -1.442695, %v5162_v16 }
 0x2f8   :  { %829 = vmatpush1.bf16.msra.mxu1 %v5893_v13  ;;  %v1818_v13 = vpack.c.bf16 %v5906_v17, %v5906_v17 }
 0x2f9   :  { %4980 = vmatprep.subr.bf16.mxu1 %v5735_v50 }
 0x2fa   :  { %1828 = vrot.lane.b32.xlu1 %v1818_v13, %s5733_s22 }
 0x2fb   :  { %4588 = vmatmul.mubr.msk.bf16.vlgmr.msra.gmra.mrb[12].mxu1 %vm215_vm0, %v6029_v63 }
 0x2fc   :  { %4981 = vmatpush3.bf16.msra.mxu1 %v5313_v21  ;;  %4982 = vmatprep.mubr.msk.bf16.mxu1 %vm5736_vm1, %v5735_v50 }
 0x2fd   :  { %4986 = vmatprep.subr.bf16.mxu1 %v5735_v50 }
 0x303   :  { %4983 = vmatmul.mubr.msk.bf16.vlgmr.msra.gmra.mrb[16].mxu1 %vm337_vm2, %v880_v33  ;;  %v1799_v33 = vsub.f32 0.0, %v1798_v27 }
 0x304   :  { %5002 = vmatprep.mubr.msk.bf16.mxu1 %vm5736_vm1, %v5735_v50 }
 0x305   :  { %v1800_v6 = vmul.f32 1.442695, %v1799_v33 }
 0x307   :  { %5466 = vpow2.f32 %v1800_v6 }
 0x308   :  { %5468 = vpow2.f32 %v4569_v62 }
 0x311   :  { %v5467_v41 = vpop.eup %5466 }
 0x312   :  { %v5469_v43 = vpop.eup %5468  ;;  %v1809_v15 = vsub.f32 1.0, %v5467_v41 }
 0x313   :  { %v587_v30 = vadd.f32 1.0, %v5469_v43 }
 0x314   :  { %v1810_v12 = vmul.f32 %v1809_v15, %v5933_v45 }
 0x34c   :  { %v1270_v63 = vpop.permute.xlu1 %1269 }
 0x34d   :  { %v1272_v22 = vmul.f32 %v1270_v63, %v1258_v8 }
 0x34f   :  { %v1273_v25 = vadd.f32 %v1272_v22, %v1263_v10 }
 0x351   :  { %v1417_v26 = vpack.c.bf16 %v1273_v25, %v1273_v25 }
 0x353   :  { %1423 = vrot.lane.b32.xlu0 %v1417_v26, %s5733_s22 }
 0x357   :  { %1804 = vrot.lane.b32.xlu0 %v5906_v17, %s5723_s8 }
 0x3c5   :  { %v6115_v34 = vpop.permute.xlu0 %1423 }
 0x3c6   :  { %v693_v9 = vpop.f32.mrb[8].mxu1 }
 0x3c7   :  { %v699_v57 = vadd.f32 %v693_v9, %v440_v2  ;;  %v4978_v35 = vpop.f32.mrb[9].mxu1 }
 0x3c8   :  { %v696_v58 = vpop.f32.mrb[10].mxu1 }
 0x3c9   :  { %5470 = vtanh.f32 %v699_v57  ;;  %v4979_v61 = vpop.f32.mrb[11].mxu1  ;;  %v6119_v32 = vpop.permute.xlu0 %1804  ;;  %v5566_v58 = vld [vmem:[#allocation8] ss:$16 sps:$4 sm:$0xff]  }
 0x3ca   :  { %v1808_v3 = vmul.f32 %v5467_v41, %v6119_v32  ;;  %5472 = vrcp.f32 %v587_v30  ;;  %v5567_v61 = vld [vmem:[#allocation8 + $0x24] ss:$16 sps:$4 sm:$0xff]  }
 0x3cc   :  { %v1811_v14 = vadd.f32 %v1810_v12, %v1808_v3  ;;  %v5568_v12 = vld [vmem:[#allocation8 + $0x20] ss:$16 sps:$4 sm:$0xff]  }
 0x3ce   :  { %v860_v21 = vpop.f32.mrb[12].mxu1  ;;  %1813 = vrot.lane.b32.xlu1 %v1811_v14, %s5734_s1 }
 0x3cf   :  { %v862_v7 = vpop.f32.mrb[13].mxu1 }
 0x3d0   :  { %v867_v8 = vadd.f32 %v5964_v1, %v862_v7  ;;  %v864_v10 = vpop.f32.mrb[14].mxu1 }
 0x3d1   :  { %v865_v13 = vpop.f32.mrb[15].mxu1 }
 0x3d2   :  { %v868_v63 = vmax.f32 %v867_v8, 0.0 }
 0x3d3   :  { %v5471_v22 = vpop.eup %5470 }
 0x3d4   :  { %v701_v25 = vsub.f32 %v5471_v22, %v6017_v60  ;;  %v869_v26 = vsub.f32 0.0, %v868_v63  ;;  %v5473_v27 = vpop.eup %5472 }
 0x3d6   :  { %v702_v33 = vmul.f32 %v5473_v27, %v701_v25  ;;  %v870_v16 = vmul.f32 1.442695, %v869_v26  ;;  %v975_v6 = vpop.f32.mrb[16].mxu1 }
 0x3d7   :  { %v6126_v62 = vadd.f32 %v975_v6, %v860_v21  ;;  %v4984_v41 = vpop.f32.mrb[17].mxu1 }
 0x3d8   :  { %v703_v43 = vadd.f32 %v702_v33, %v6017_v60  ;;  %5474 = vpow2.f32 %v870_v16  ;;  %v978_v2 = vpop.f32.mrb[18].mxu1 }
 0x3d9   :  { %v4985_v9 = vpop.f32.mrb[19].mxu1  ;;  %v5571_v2 = vld [vmem:[#allocation8 + $0x2c] ss:$16 sps:$4 sm:$0xff]  }
 0x3da   :  { %v704_v15 = vpack.c.bf16 %v703_v43, %v703_v43  ;;  %v5572_v9 = vld [vmem:[#allocation8 + $0x28] ss:$16 sps:$4 sm:$0xff]  }
 0x3dc   :  { %705 = vst [vmem:[#allocation12] sm:$0x1] %v704_v15  ;;  %v5322_v15 = vld [vmem:[#allocation6 + $0x8] ss:$12 sps:$4 sm:$0xff]  }
 0x3e2   :  { %v5475_v30 = vpop.eup %5474 }
 0x3e3   :  { %v6129_v57 = vmul.f32 %v5475_v30, %v703_v43  ;;  %v5570_v43 = vld [vmem:[#allocation8 + $0x8] ss:$16 sps:$4 sm:$0xff]  }
 0x3e5   :  { %v984_v35 = vpack.c.bf16 %v6129_v57, %v6129_v57 }
 0x3e7   :  { %1114 = vmatmul.mubr.bf16.vlgmr.msra.gmra.mrb[4].mxu0 %v984_v35  ;;  %v2346_v35 = vsub.f32 1.0, %v5908_v18 }
 0x3e8   :  { %1330 = vmatpush1.bf16.msra.mxu0 %v5566_v58  ;;  %1361 = vmatprep.mubr.bf16.mxu0 %v5731_v0 }
 0x3e9   :  { %1331 = vmatprep.subr.bf16.mxu0 %v5567_v61 }
 0x3ec   :  { %1332 = vmatpush1.bf16.msra.mxu0 %v5568_v12  ;;  %v2906_v12 = vpack.c.bf16 %v5910_v19, %v5910_v19 }
 0x3ed   :  { %1444 = vmatprep.subr.bf16.mxu0 %v5941_v52  ;;  %v1802_v52 = vsub.f32 1.0, %v5906_v17 }
 0x3ef   :  { %4628 = vmatmul.mubr.msk.bf16.vlgmr.msra.gmra.mrb[8].mxu0 %vm215_vm0, %v6102_v5 }
 0x3f0   :  { %1445 = vmatpush1.bf16.msra.mxu0 %v5939_v51  ;;  %1476 = vmatprep.mubr.bf16.mxu0 %v5731_v0  ;;  %v6158_v51 = vpop.permute.xlu1 %1828 }
 0x3f1   :  { %1625 = vmatprep.subr.bf16.mxu0 %v5943_v54  ;;  %v5314_v54 = vld [vmem:[#allocation11] sm:$0xff]  }
 0x3f2   :  { %4987 = vmatpush3.bf16.msra.mxu1 %v5314_v54 }
 0x3f3   :  { %4988 = vmatprep.subr.bf16.mxu1 %v5735_v50 }
 0x3fb   :  { %4633 = vmatmul.mubr.msk.bf16.vlgmr.msra.gmra.mrb[8].mxu0 %vm337_vm2, %v6115_v34 }
 0x3fc   :  { %1626 = vmatpush1.bf16.msra.mxu0 %v5967_v23  ;;  %1657 = vmatprep.mubr.bf16.mxu0 %v5731_v0  ;;  %v1807_v23 = vmul.f32 %v6119_v32, %v5906_v17  ;;  %v5317_v17 = vld [vmem:[#allocation11 + $0x18] sm:$0xff]  }
 0x3fd   :  { %1627 = vmatprep.subr.bf16.mxu0 %v5969_v24 }
 0x400   :  { %1628 = vmatpush1.bf16.msra.mxu0 %v5974_v28  ;;  %v2362_v28 = vpack.c.bf16 %v5908_v18, %v5908_v18 }
 0x401   :  { %1629 = vmatprep.subr.bf16.mxu0 %v5978_v29 }
 0x402   :  { %2372 = vrot.lane.b32.xlu1 %v2362_v28, %s5733_s22 }
 0x404   :  { %1630 = vmatpush1.bf16.msra.mxu0 %v5984_v40  ;;  %v5315_v40 = vld [vmem:[#allocation11 + $0x8] sm:$0xff]  }
 0x405   :  { %1631 = vmatprep.subr.bf16.mxu0 %v5987_v42  ;;  %4989 = vmatpush3.bf16.msra.mxu1 %v5315_v40 }
 0x406   :  { %4990 = vmatprep.subr.bf16.mxu1 %v5735_v50 }
 0x408   :  { %1632 = vmatpush1.bf16.msra.mxu0 %v5991_v44 }
 0x409   :  { %1633 = vmatprep.subr.bf16.mxu0 %v5994_v46  ;;  %v5316_v46 = vld [vmem:[#allocation11 + $0x10] sm:$0xff]  }
 0x40a   :  { %4991 = vmatpush3.bf16.msra.mxu1 %v5316_v46  ;;  %v983_v46 = vadd.f32 %v6126_v62, %v6039_v4 }
 0x40b   :  { %4992 = vmatprep.subr.bf16.mxu1 %v5735_v50 }
 0x40c   :  { %1634 = vmatpush1.bf16.msra.mxu0 %v5997_v47  ;;  %v5318_v47 = vld [vmem:[#allocation11 + $0x20] sm:$0xff]  }
 0x40d   :  { %1635 = vmatprep.subr.bf16.mxu0 %v6000_v48  ;;  %v5319_v48 = vld [vmem:[#allocation11 + $0x28] sm:$0xff]  }
 0x40e   :  { %4993 = vmatpush3.bf16.msra.mxu1 %v5317_v17 }
 0x40f   :  { %4994 = vmatprep.subr.bf16.mxu1 %v5735_v50 }
 0x410   :  { %1636 = vmatpush1.bf16.msra.mxu0 %v6003_v49  ;;  %v5320_v49 = vld [vmem:[#allocation11 + $0x30] sm:$0xff]  }
 0x411   :  { %1637 = vmatprep.subr.bf16.mxu0 %v6006_v53  ;;  %v5321_v53 = vld [vmem:[#allocation11 + $0x38] sm:$0xff]  }
 0x412   :  { %4995 = vmatpush3.bf16.msra.mxu1 %v5318_v47 }
 0x413   :  { %4996 = vmatprep.subr.bf16.mxu1 %v5735_v50 }
 0x414   :  { %1638 = vmatpush1.bf16.msra.mxu0 %v6009_v55  ;;  %v5569_v55 = vld [vmem:[#allocation8 + $0xc] ss:$16 sps:$4 sm:$0xff]  }
 0x415   :  { %1639 = vmatprep.subr.bf16.mxu0 %v6012_v56  ;;  %v2342_v56 = vmax.f32 %v5925_v36, 0.0 }
 0x416   :  { %4997 = vmatpush3.bf16.msra.mxu1 %v5319_v48 }
 0x417   :  { %4998 = vmatprep.subr.bf16.mxu1 %v5735_v50 }
 0x418   :  { %1640 = vmatpush1.bf16.msra.mxu0 %v6015_v59  ;;  %v2343_v59 = vsub.f32 0.0, %v2342_v56 }
 0x41a   :  { %4999 = vmatpush3.bf16.msra.mxu1 %v5320_v49  ;;  %v2344_v60 = vmul.f32 1.442695, %v2343_v59 }
 0x41b   :  { %5000 = vmatprep.subr.bf16.mxu1 %v5735_v50 }
 0x41c   :  { %5476 = vpow2.f32 %v2344_v60 }
 0x41e   :  { %5001 = vmatpush3.bf16.msra.mxu1 %v5321_v53 }
 0x41f   :  { %1370 = vmatprep.subr.bf16.mxu1 %v5569_v55 }
 0x426   :  { %v5477_v32 = vpop.eup %5476 }
 0x427   :  { %v2353_v21 = vsub.f32 1.0, %v5477_v32 }
 0x429   :  { %v2354_v25 = vmul.f32 %v2353_v21, %v5933_v45 }
 0x440   :  { %v1814_v24 = vpop.permute.xlu1 %1813 }
 0x441   :  { %v1816_v29 = vmul.f32 %v1814_v24, %v1802_v52 }
 0x443   :  { %v1817_v42 = vadd.f32 %v1816_v29, %v1807_v23 }
 0x445   :  { %v1961_v44 = vpack.c.bf16 %v1817_v42, %v1817_v42 }
 0x447   :  { %1967 = vrot.lane.b32.xlu0 %v1961_v44, %s5733_s22 }
 0x44b   :  { %2348 = vrot.lane.b32.xlu0 %v5908_v18, %s5723_s8 }
 0x474   :  { %v6194_v30 = vpop.permute.xlu1 %2372 }
 0x4b9   :  { %v6177_v3 = vpop.permute.xlu0 %1967 }
 0x4ba   :  { %v1115_v14 = vpop.f32.mrb[4].mxu0 }
 0x4bb   :  { %v1117_v7 = vpop.f32.mrb[5].mxu0  ;;  %v5164_v24 = vadd.f32 %v1115_v14, %v6041_v11 }
 0x4bc   :  { %v5165_v8 = vadd.f32 %v1117_v7, %v6063_v31  ;;  %v1119_v10 = vpop.f32.mrb[6].mxu0 }
 0x4bd   :  { %v1120_v13 = vpop.f32.mrb[7].mxu0  ;;  %v2349_v63 = vpop.permute.xlu0 %2348  ;;  %v4610_v29 = vmul.f32 -1.442695, %v5164_v24 }
 0x4be   :  { %v4611_v22 = vmul.f32 -1.442695, %v5165_v8  ;;  %v2352_v26 = vmul.f32 %v5477_v32, %v2349_v63  ;;  %v2351_v58 = vmul.f32 %v2349_v63, %v5908_v18  ;;  %v2886_v18 = vmax.f32 %v5927_v37, 0.0 }
 0x4c0   :  { %5478 = vpow2.f32 %v4611_v22  ;;  %v2355_v36 = vadd.f32 %v2354_v25, %v2352_v26  ;;  %v2887_v23 = vsub.f32 0.0, %v2886_v18 }
 0x4c2   :  { %2357 = vrot.lane.b32.xlu1 %v2355_v36, %s5734_s1  ;;  %v2888_v28 = vmul.f32 1.442695, %v2887_v23  ;;  %v5332_v23 = vld [vmem:[#allocation11] sm:$0xff]  }
 0x4c6   :  { %2916 = vrot.lane.b32.xlu1 %v2906_v12, %s5733_s22 }
 0x4ca   :  { %v5479_v27 = vpop.eup %5478 }
 0x4cb   :  { %v1131_v33 = vadd.f32 1.0, %v5479_v27 }
 0x4cd   :  { %5480 = vrcp.f32 %v1131_v33 }
 0x4ce   :  { %5482 = vpow2.f32 %v2888_v28  ;;  %v3450_v28 = vpack.c.bf16 %v5912_v20, %v5912_v20 }
 0x4cf   :  { %5484 = vpow2.f32 %v4610_v29 }
 0x4d7   :  { %v5481_v16 = vpop.eup %5480 }
 0x4d8   :  { %v1136_v6 = vmul.f32 %v5481_v16, %v6129_v57  ;;  %v5483_v40 = vpop.eup %5482 }
 0x4d9   :  { %v5485_v42 = vpop.eup %5484  ;;  %v2897_v17 = vsub.f32 1.0, %v5483_v40 }
 0x4da   :  { %v1137_v41 = vpack.c.bf16 %v1136_v6, %v1136_v6  ;;  %v1130_v48 = vadd.f32 1.0, %v5485_v42  ;;  %v5333_v42 = vld [vmem:[#allocation11 + $0x8] sm:$0xff]  }
 0x4db   :  { %v2898_v56 = vmul.f32 %v2897_v17, %v5933_v45  ;;  %v5336_v17 = vld [vmem:[#allocation11 + $0x20] sm:$0xff]  }
 0x4dc   :  { %5003 = vmatmul.mubr.bf16.vlgmr.msra.gmra.mrb[20].mxu1 %v1137_v41 }
 0x4dd   :  { %1371 = vmatpush1.bf16.msra.mxu1 %v5570_v43  ;;  %1402 = vmatprep.mubr.bf16.mxu1 %v5731_v0 }
 0x4de   :  { %1372 = vmatprep.subr.bf16.mxu1 %v5571_v2 }
 0x4e1   :  { %1373 = vmatpush1.bf16.msra.mxu1 %v5572_v9 }
 0x4e2   :  { %5006 = vmatprep.subr.bf16.mxu1 %v5735_v50 }
 0x4e4   :  { %4629 = vmatmul.mubr.msk.bf16.vlgmr.msra.gmra.mrb[24].mxu1 %vm215_vm0, %v6102_v5 }
 0x4e5   :  { %5007 = vmatpush3.bf16.msra.mxu1 %v5322_v15  ;;  %5008 = vmatprep.mubr.msk.bf16.mxu1 %vm5736_vm1, %v5735_v50  ;;  %v6222_v15 = vld [vmem:[#allocation8] ss:$16 sps:$4 sm:$0xff]  }
 0x4e6   :  { %5012 = vmatprep.subr.bf16.mxu1 %v5735_v50 }
 0x4ec   :  { %5009 = vmatmul.mubr.msk.bf16.vlgmr.msra.gmra.mrb[28].mxu1 %vm337_vm2, %v6115_v34  ;;  %v6204_v34 = vld [vmem:[#allocation8 + $0x4] ss:$16 sps:$4 sm:$0xff]  }
 0x4ed   :  { %5028 = vmatprep.mubr.msk.bf16.mxu1 %vm5736_vm1, %v5735_v50  ;;  %1873 = vmatprep.subr.bf16.mxu0 %v6204_v34 }
 0x4ee   :  { %5013 = vmatpush3.bf16.msra.mxu1 %v5332_v23  ;;  %v6299_v23 = vld [vmem:[#allocation9] ss:$8 sps:$4 sm:$0xff]  }
 0x4ef   :  { %5014 = vmatprep.subr.bf16.mxu1 %v5735_v50 }
 0x4f2   :  { %5015 = vmatpush3.bf16.msra.mxu1 %v5333_v42  ;;  %v6310_v42 = vld [vmem:[#allocation9 + $0x10] ss:$8 sps:$4 sm:$0xff]  }
 0x4f3   :  { %5016 = vmatprep.subr.bf16.mxu1 %v5735_v50 }
 0x534   :  { %v2358_v61 = vpop.permute.xlu1 %2357 }
 0x535   :  { %v2360_v5 = vmul.f32 %v2358_v61, %v2346_v35  ;;  %v6229_v61 = vld [vmem:[#allocation8 + $0x20] ss:$16 sps:$4 sm:$0xff]  }
 0x537   :  { %v2361_v52 = vadd.f32 %v2360_v5, %v2351_v58  ;;  %v6226_v58 = vld [vmem:[#allocation8 + $0x24] ss:$16 sps:$4 sm:$0xff]  }
 0x538   :  { %v6236_v5 = vld [vmem:[#allocation6] ss:$12 sps:$4 sm:$0xff]   ;;  %v6246_v12 = vpop.permute.xlu1 %2916 }
 0x539   :  { %v2505_v54 = vpack.c.bf16 %v2361_v52, %v2361_v52  ;;  %v2890_v52 = vsub.f32 1.0, %v5910_v19 }
 0x53b   :  { %2511 = vrot.lane.b32.xlu0 %v2505_v54, %s5733_s22 }
 0x53f   :  { %2892 = vrot.lane.b32.xlu0 %v5910_v19, %s5723_s8 }
 0x5ad   :  { %v6209_v44 = vpop.permute.xlu0 %2511 }
 0x5af   :  { %v1236_v47 = vpop.f32.mrb[20].mxu1 }
 0x5b0   :  { %v1242_v49 = vadd.f32 %v1236_v47, %v983_v46  ;;  %v5004_v53 = vpop.f32.mrb[21].mxu1  ;;  %v5335_v46 = vld [vmem:[#allocation11 + $0x18] sm:$0xff]   ;;  %v5337_v47 = vld [vmem:[#allocation11 + $0x28] sm:$0xff]  }
 0x5b1   :  { %v1239_v37 = vpop.f32.mrb[22].mxu1  ;;  %v2893_v55 = vpop.permute.xlu0 %2892  ;;  %v3430_v53 = vmax.f32 %v5929_v38, 0.0 }
 0x5b2   :  { %5486 = vtanh.f32 %v1242_v49  ;;  %v2896_v59 = vmul.f32 %v5483_v40, %v2893_v55  ;;  %v5005_v60 = vpop.f32.mrb[23].mxu1  ;;  %v2895_v54 = vmul.f32 %v2893_v55, %v5910_v19  ;;  %v5334_v19 = vld [vmem:[#allocation11 + $0x10] sm:$0xff]   ;;  %v5339_v49 = vld [vmem:[#allocation11 + $0x38] sm:$0xff]  }
 0x5b3   :  { %5488 = vrcp.f32 %v1130_v48  ;;  %5017 = vmatpush3.bf16.msra.mxu1 %v5334_v19  ;;  %v5338_v48 = vld [vmem:[#allocation11 + $0x30] sm:$0xff]   ;;  %v3431_v37 = vsub.f32 0.0, %v3430_v53  ;;  %v6315_v19 = vld [vmem:[#allocation9 + $0x24] ss:$8 sps:$4 sm:$0xff]  }
 0x5b4   :  { %v2899_v32 = vadd.f32 %v2898_v56, %v2896_v59  ;;  %5018 = vmatprep.subr.bf16.mxu1 %v5735_v50  ;;  %v6335_v53 = vld [vmem:[#allocation9 + $0x54] ss:$8 sps:$4 sm:$0xff]  }
 0x5b5   :  { %v3432_v55 = vmul.f32 1.442695, %v3431_v37  ;;  %v6337_v37 = vld [vmem:[#allocation9 + $0x50] ss:$8 sps:$4 sm:$0xff]  }
 0x5b6   :  { %2901 = vrot.lane.b32.xlu1 %v2899_v32, %s5734_s1 }
 0x5b7   :  { %v1404_v14 = vpop.f32.mrb[24].mxu1  ;;  %5019 = vmatpush3.bf16.msra.mxu1 %v5335_v46  ;;  %v6317_v46 = vld [vmem:[#allocation9 + $0x20] ss:$8 sps:$4 sm:$0xff]  }
 0x5b8   :  { %v1406_v21 = vpop.f32.mrb[25].mxu1  ;;  %5020 = vmatprep.subr.bf16.mxu1 %v5735_v50 }
 0x5b9   :  { %v1411_v62 = vadd.f32 %v5964_v1, %v1406_v21  ;;  %v1408_v7 = vpop.f32.mrb[26].mxu1 }
 0x5ba   :  { %v1409_v8 = vpop.f32.mrb[27].mxu1  ;;  %3460 = vrot.lane.b32.xlu1 %v3450_v28, %s5733_s22 }
 0x5bb   :  { %v1412_v10 = vmax.f32 %v1411_v62, 0.0  ;;  %5021 = vmatpush3.bf16.msra.mxu1 %v5336_v17  ;;  %v6323_v17 = vld [vmem:[#allocation9 + $0x34] ss:$8 sps:$4 sm:$0xff]  }
 0x5bc   :  { %v5487_v13 = vpop.eup %5486  ;;  %5022 = vmatprep.subr.bf16.mxu1 %v5735_v50 }
 0x5bd   :  { %v1244_v63 = vsub.f32 %v5487_v13, %v6129_v57  ;;  %v1413_v22 = vsub.f32 0.0, %v1412_v10  ;;  %v5489_v25 = vpop.eup %5488 }
 0x5bf   :  { %v1245_v26 = vmul.f32 %v5489_v25, %v1244_v63  ;;  %v1414_v36 = vmul.f32 1.442695, %v1413_v22  ;;  %v1519_v27 = vpop.f32.mrb[28].mxu1  ;;  %5023 = vmatpush3.bf16.msra.mxu1 %v5337_v47  ;;  %v6325_v47 = vld [vmem:[#allocation9 + $0x30] ss:$8 sps:$4 sm:$0xff]  }
 0x5c0   :  { %v6217_v33 = vadd.f32 %v1519_v27, %v1404_v14  ;;  %v5010_v16 = vpop.f32.mrb[29].mxu1  ;;  %5024 = vmatprep.subr.bf16.mxu1 %v5735_v50  ;;  %v6275_v27 = vld [vmem:[#allocation8 + $0x8] ss:$16 sps:$4 sm:$0xff]  }
 0x5c1   :  { %v1246_v6 = vadd.f32 %v1245_v26, %v6129_v57  ;;  %5490 = vpow2.f32 %v1414_v36  ;;  %v1522_v41 = vpop.f32.mrb[30].mxu1  ;;  %v6233_v57 = vld [vmem:[#allocation6 + $0x4] ss:$12 sps:$4 sm:$0xff]  }
 0x5c2   :  { %v5011_v43 = vpop.f32.mrb[31].mxu1  ;;  %5492 = vpow2.f32 %v3432_v55  ;;  %v6280_v41 = vld [vmem:[#allocation8 + $0x28] ss:$16 sps:$4 sm:$0xff]  }
 0x5c3   :  { %v1247_v1 = vpack.c.bf16 %v1246_v6, %v1246_v6  ;;  %5025 = vmatpush3.bf16.msra.mxu1 %v5338_v48  ;;  %v5346_v43 = vld [vmem:[#allocation6 + $0x8] ss:$12 sps:$4 sm:$0xff]   ;;  %v6329_v48 = vld [vmem:[#allocation9 + $0x44] ss:$8 sps:$4 sm:$0xff]   ;;  %v6341_v55 = vld [vmem:[#allocation9 + $0x60] ss:$8 sps:$4 sm:$0xff]  }
 0x5c4   :  { %5026 = vmatprep.subr.bf16.mxu1 %v5735_v50 }
 0x5c5   :  { %1249 = vst [vmem:[#allocation12 + $0x1] sm:$0x1] %v1247_v1 }
 0x5c7   :  { %5027 = vmatpush3.bf16.msra.mxu1 %v5339_v49  ;;  %v6331_v49 = vld [vmem:[#allocation9 + $0x40] ss:$8 sps:$4 sm:$0xff]  }
 0x5cb   :  { %v5491_v2 = vpop.eup %5490 }
 0x5cc   :  { %v6220_v9 = vmul.f32 %v5491_v2, %v1246_v6  ;;  %v5493_v56 = vpop.eup %5492  ;;  %v6277_v6 = vld [vmem:[#allocation8 + $0x2c] ss:$16 sps:$4 sm:$0xff]   ;;  %v5573_v2 = vld [vmem:[#allocation3 + $0xc] sm:$0x3] }
 0x5cd   :  { %v3441_v60 = vsub.f32 1.0, %v5493_v56 }
 0x5ce   :  { %v1528_v35 = vpack.c.bf16 %v6220_v9, %v6220_v9 }
 0x5cf   :  { %v3442_v8 = vmul.f32 %v3441_v60, %v5933_v45  ;;  %v6345_v60 = vld [vmem:[#allocation9 + $0x74] ss:$8 sps:$4 sm:$0xff]  }
 0x5d0   :  { %1658 = vmatmul.mubr.bf16.vlgmr.msra.gmra.mrb[8].mxu0 %v1528_v35  ;;  %v3434_v35 = vsub.f32 1.0, %v5573_v2 }
 0x5d1   :  { %1874 = vmatpush1.bf16.msra.mxu0 %v6222_v15  ;;  %1905 = vmatprep.mubr.bf16.mxu0 %v5731_v0 }
 0x5d2   :  { %1875 = vmatprep.subr.bf16.mxu0 %v6226_v58 }
 0x5d5   :  { %1876 = vmatpush1.bf16.msra.mxu0 %v6229_v61 }
 0x5d6   :  { %1988 = vmatprep.subr.bf16.mxu0 %v6233_v57 }
 0x5d8   :  { %4669 = vmatmul.mubr.msk.bf16.vlgmr.msra.gmra.mrb[12].mxu0 %vm215_vm0, %v6158_v51 }
 0x5d9   :  { %1989 = vmatpush1.bf16.msra.mxu0 %v6236_v5  ;;  %2020 = vmatprep.mubr.bf16.mxu0 %v5731_v0 }
 0x5e4   :  { %4674 = vmatmul.mubr.msk.bf16.vlgmr.msra.gmra.mrb[12].mxu0 %vm337_vm2, %v6177_v3 }
 0x5e5   :  { %2201 = vmatprep.mubr.bf16.mxu0 %v5731_v0 }
 0x628   :  { %v2902_v18 = vpop.permute.xlu1 %2901 }
 0x629   :  { %v2904_v24 = vmul.f32 %v2902_v18, %v2890_v52  ;;  %v6297_v18 = vld [vmem:[#allocation9 + $0x4] ss:$8 sps:$4 sm:$0xff]  }
 0x62a   :  { %2169 = vmatprep.subr.bf16.mxu0 %v6297_v18 }
 0x62b   :  { %v2905_v29 = vadd.f32 %v2904_v24, %v2895_v54  ;;  %2170 = vmatpush1.bf16.msra.mxu0 %v6299_v23 }
 0x62c   :  { %v6295_v1 = vpop.permute.xlu1 %3460 }
 0x62d   :  { %v3049_v40 = vpack.c.bf16 %v2905_v29, %v2905_v29 }
 0x62f   :  { %3055 = vrot.lane.b32.xlu0 %v3049_v40, %s5733_s22  ;;  %v6308_v40 = vld [vmem:[#allocation9 + $0x14] ss:$8 sps:$4 sm:$0xff]  }
 0x630   :  { %2171 = vmatprep.subr.bf16.mxu0 %v6308_v40 }
 0x631   :  { %2172 = vmatpush1.bf16.msra.mxu0 %v6310_v42 }
 0x632   :  { %2173 = vmatprep.subr.bf16.mxu0 %v6315_v19 }
 0x633   :  { %3436 = vrot.lane.b32.xlu0 %v5912_v20, %s5723_s8  ;;  %v6263_v20 = vld [vmem:[#allocation8 + $0xc] ss:$16 sps:$4 sm:$0xff]  }
 0x634   :  { %1914 = vmatprep.subr.bf16.mxu1 %v6263_v20 }
 0x635   :  { %2174 = vmatpush1.bf16.msra.mxu0 %v6317_v46 }
 0x636   :  { %2175 = vmatprep.subr.bf16.mxu0 %v6323_v17 }
 0x639   :  { %2176 = vmatpush1.bf16.msra.mxu0 %v6325_v47 }
 0x63a   :  { %2177 = vmatprep.subr.bf16.mxu0 %v6329_v48 }
 0x63d   :  { %2178 = vmatpush1.bf16.msra.mxu0 %v6331_v49 }
 0x63e   :  { %2179 = vmatprep.subr.bf16.mxu0 %v6335_v53 }
 0x641   :  { %2180 = vmatpush1.bf16.msra.mxu0 %v6337_v37 }
 0x6a1   :  { %v6267_v59 = vpop.permute.xlu0 %3055 }
 0x6a3   :  { %v6269_v32 = vpop.f32.mrb[8].mxu0 }
 0x6a4   :  { %v1661_v14 = vpop.f32.mrb[9].mxu0 }
 0x6a5   :  { %v5167_v21 = vadd.f32 %v1661_v14, %v6063_v31  ;;  %v1663_v62 = vpop.f32.mrb[10].mxu0  ;;  %v3437_v7 = vpop.permute.xlu0 %3436  ;;  %v6349_v14 = vld [vmem:[#allocation9 + $0x70] ss:$8 sps:$4 sm:$0xff]  }
 0x6a6   :  { %v3440_v10 = vmul.f32 %v5493_v56, %v3437_v7  ;;  %v1664_v13 = vpop.f32.mrb[11].mxu0  ;;  %v3439_v52 = vmul.f32 %v5573_v2, %v3437_v7  ;;  %v6343_v56 = vld [vmem:[#allocation9 + $0x64] ss:$8 sps:$4 sm:$0xff]   ;;  %v5166_v7 = vadd.f32 %v6269_v32, %v6041_v11 }
 0x6a7   :  { %v4652_v63 = vmul.f32 -1.442695, %v5167_v21  ;;  %2181 = vmatprep.subr.bf16.mxu0 %v6343_v56  ;;  %v3974_v21 = vmax.f32 %v5931_v39, 0.0 }
 0x6a8   :  { %v3443_v38 = vadd.f32 %v3442_v8, %v3440_v10  ;;  %2182 = vmatpush1.bf16.msra.mxu0 %v6341_v55  ;;  %v4651_v10 = vmul.f32 -1.442695, %v5166_v7 }
 0x6a9   :  { %5494 = vpow2.f32 %v4652_v63  ;;  %2183 = vmatprep.subr.bf16.mxu0 %v6345_v60  ;;  %v3975_v62 = vsub.f32 0.0, %v3974_v21 }
 0x6aa   :  { %3445 = vrot.lane.b32.xlu1 %v3443_v38, %s5734_s1 }
 0x6ab   :  { %v3976_v8 = vmul.f32 1.442695, %v3975_v62 }
 0x6ac   :  { %2184 = vmatpush1.bf16.msra.mxu0 %v6349_v14 }
 0x6ad   :  { %2417 = vmatprep.subr.bf16.mxu0 %v6204_v34 }
 0x6b3   :  { %v5495_v22 = vpop.eup %5494 }
 0x6b4   :  { %v1675_v25 = vadd.f32 1.0, %v5495_v22 }
 0x6b6   :  { %5496 = vrcp.f32 %v1675_v25  ;;  %v1527_v25 = vadd.f32 %v6217_v33, %v6039_v4  ;;  %v6369_v33 = vld [vmem:[%s6724_s7] ss:$0 sm:$0xff]  ;;  %s5737_s7 = smov [#allocation12]  }
 0x6b7   :  { %5498 = vpow2.f32 %v3976_v8  ;;  %s4520_s26 = sshll.u32 %s5737_s7, 4  ;;  %s4521_s26 = int_to_ptr.vmem [resolvable:$true] %s4520_s26 }
 0x6b8   :  { %5500 = vpow2.f32 %v4651_v10  ;;  %s5686_s27 = scalar_lea.vmem %s4521_s26, 128  ;;  %p5691_p13 = scmp.lt.s32.totalorder %s4521_s26, %s4521_s26 }
 0x6b9   :  { %p5687_p12 = scmp.ne.s32.totalorder %s4521_s26, %s5686_s27  ;;  %p5692_p0 = scmp.lt.s32.totalorder %s5686_s27, %s5686_s27 }
 0x6bb   :  { %p5693_p1 = por %p5692_p0, %p5691_p13 }
 0x6bd   :  { %p5694_p2 = pnand %p5693_p1, %p5687_p12 }
 0x6c0   :  { %v5497_v26 = vpop.eup %5496 }
 0x6c1   :  { %v1680_v36 = vmul.f32 %v5497_v26, %v6220_v9  ;;  %v5499_v13 = vpop.eup %5498 }
 0x6c2   :  { %v5501_v38 = vpop.eup %5500  ;;  %v3985_v22 = vsub.f32 1.0, %v5499_v13 }
 0x6c3   :  { %v1681_v16 = vpack.c.bf16 %v1680_v36, %v1680_v36  ;;  %v1674_v36 = vadd.f32 1.0, %v5501_v38 }
 0x6c4   :  { %v3986_v32 = vmul.f32 %v3985_v22, %v5933_v45 }
 0x6c5   :  { %5029 = vmatmul.mubr.bf16.vlgmr.msra.gmra.mrb[32].mxu1 %v1681_v16 }
 0x6c6   :  { %1915 = vmatpush1.bf16.msra.mxu1 %v6275_v27  ;;  %1946 = vmatprep.mubr.bf16.mxu1 %v5731_v0 }
 0x6c7   :  { %1916 = vmatprep.subr.bf16.mxu1 %v6277_v6 }
 0x6ca   :  { %1917 = vmatpush1.bf16.msra.mxu1 %v6280_v41 }
 0x6cb   :  { %5032 = vmatprep.subr.bf16.mxu1 %v5735_v50 }
 0x6cd   :  { %4670 = vmatmul.mubr.msk.bf16.vlgmr.msra.gmra.mrb[36].mxu1 %vm215_vm0, %v6158_v51 }
 0x6ce   :  { %5033 = vmatpush3.bf16.msra.mxu1 %v5346_v43  ;;  %5034 = vmatprep.mubr.msk.bf16.mxu1 %vm5736_vm1, %v5735_v50 }
 0x6cf   :  { %5038 = vmatprep.subr.bf16.mxu1 %v5735_v50 }
 0x6d5   :  { %5035 = vmatmul.mubr.msk.bf16.vlgmr.msra.gmra.mrb[40].mxu1 %vm337_vm2, %v6177_v3  ;;  %v6303_v3 = vld [vmem:[#allocation3 + $0xe] sm:$0x3] }
 0x6d6   :  { %5054 = vmatprep.mubr.msk.bf16.mxu1 %vm5736_vm1, %v5735_v50  ;;  %v3994_v28 = vpack.c.bf16 %v6303_v3, %v6303_v3 }
 0x6d8   :  { %4004 = vrot.lane.b32.xlu1 %v3994_v28, %s5733_s22 }
 0x71c   :  { %v3446_v54 = vpop.permute.xlu1 %3445 }
 0x71d   :  { %v3448_v51 = vmul.f32 %v3446_v54, %v3434_v35 }
 0x71f   :  { %v3449_v24 = vadd.f32 %v3448_v51, %v3439_v52 }
 0x721   :  { %v3593_v29 = vpack.c.bf16 %v3449_v24, %v3449_v24 }
 0x723   :  { %3599 = vrot.lane.b32.xlu0 %v3593_v29, %s5733_s22 }
 0x727   :  { %3980 = vrot.lane.b32.xlu0 %v6303_v3, %s5723_s8 }
 0x795   :  { %v6357_v63 = vpop.permute.xlu0 %3599 }
 0x798   :  { %v1780_v26 = vpop.f32.mrb[32].mxu1 }
 0x799   :  { %v1786_v16 = vadd.f32 %v1780_v26, %v1527_v25  ;;  %v5030_v39 = vpop.f32.mrb[33].mxu1  ;;  %v6361_v43 = vpop.permute.xlu0 %3980 }
 0x79a   :  { %v3984_v2 = vmul.f32 %v5499_v13, %v6361_v43  ;;  %v1783_v35 = vpop.f32.mrb[34].mxu1 }
 0x79b   :  { %5502 = vtanh.f32 %v1786_v16  ;;  %v5031_v52 = vpop.f32.mrb[35].mxu1 }
 0x79c   :  { %v3987_v54 = vadd.f32 %v3986_v32, %v3984_v2  ;;  %5504 = vrcp.f32 %v1674_v36 }
 0x79e   :  { %3989 = vrot.lane.b32.xlu1 %v3987_v54, %s5734_s1  ;;  %v3978_v54 = vsub.f32 1.0, %v6303_v3 }
 0x7a0   :  { %v1948_v51 = vpop.f32.mrb[36].mxu1 }
 0x7a1   :  { %v1950_v24 = vpop.f32.mrb[37].mxu1 }
 0x7a2   :  { %v1955_v28 = vadd.f32 %v6369_v33, %v1950_v24  ;;  %v1952_v29 = vpop.f32.mrb[38].mxu1 }
 0x7a3   :  { %v1953_v45 = vpop.f32.mrb[39].mxu1 }
 0x7a4   :  { %v1956_v21 = vmax.f32 %v1955_v28, 0.0  ;;  %v5371_v45 = vld [vmem:[#allocation11] sm:$0xff]  }
 0x7a5   :  { %v5503_v62 = vpop.eup %5502  ;;  %5039 = vmatpush3.bf16.msra.mxu1 %v5371_v45 }
 0x7a6   :  { %v1788_v7 = vsub.f32 %v5503_v62, %v6220_v9  ;;  %v1957_v8 = vsub.f32 0.0, %v1956_v21  ;;  %v5505_v10 = vpop.eup %5504  ;;  %5040 = vmatprep.subr.bf16.mxu1 %v5735_v50  ;;  %v5372_v62 = vld [vmem:[#allocation11 + $0x8] sm:$0xff]  }
 0x7a8   :  { %v1789_v13 = vmul.f32 %v5505_v10, %v1788_v7  ;;  %v1958_v38 = vmul.f32 1.442695, %v1957_v8  ;;  %v2063_v22 = vpop.f32.mrb[40].mxu1  ;;  %v5374_v7 = vld [vmem:[#allocation11 + $0x18] sm:$0xff]   ;;  %v5377_v8 = vld [vmem:[#allocation11 + $0x30] sm:$0xff]  }
 0x7a9   :  { %v6373_v25 = vadd.f32 %v2063_v22, %v1948_v51  ;;  %v5036_v26 = vpop.f32.mrb[41].mxu1  ;;  %v3983_v51 = vmul.f32 %v6303_v3, %v6361_v43  ;;  %5041 = vmatpush3.bf16.msra.mxu1 %v5372_v62  ;;  %v5375_v3 = vld [vmem:[#allocation11 + $0x20] sm:$0xff]   ;;  %v5376_v43 = vld [vmem:[#allocation11 + $0x28] sm:$0xff]   ;;  %v5378_v10 = vld [vmem:[#allocation11 + $0x38] sm:$0xff]  }
 0x7aa   :  { %v1790_v36 = vadd.f32 %v1789_v13, %v6220_v9  ;;  %5506 = vpow2.f32 %v1958_v38  ;;  %v2066_v16 = vpop.f32.mrb[42].mxu1  ;;  %v6409_v9 = vpop.permute.xlu1 %4004  ;;  %5042 = vmatprep.subr.bf16.mxu1 %v5735_v50 }
 0x7ab   :  { %v5037_v39 = vpop.f32.mrb[43].mxu1 }
 0x7ac   :  { %v1791_v32 = vpack.c.bf16 %v1790_v36, %v1790_v36 }
 0x7ae   :  { %1793 = vst [vmem:[#allocation12 + $0x2] sm:$0x1] %v1791_v32 }
 0x7b4   :  { %v5507_v2 = vpop.eup %5506 }
 0x7b5   :  { %v6376_v35 = vmul.f32 %v5507_v2, %v1790_v36 }
 0x7b7   :  { %v2072_v52 = vpack.c.bf16 %v6376_v35, %v6376_v35 }
 0x7b9   :  { %2202 = vmatmul.mubr.bf16.vlgmr.msra.gmra.mrb[12].mxu0 %v2072_v52 }
 0x7ba   :  { %2418 = vmatpush1.bf16.msra.mxu0 %v6222_v15  ;;  %2449 = vmatprep.mubr.bf16.mxu0 %v5731_v0 }
 0x7bb   :  { %2419 = vmatprep.subr.bf16.mxu0 %v6226_v58 }
 0x7be   :  { %2420 = vmatpush1.bf16.msra.mxu0 %v6229_v61 }
 0x7bf   :  { %2532 = vmatprep.subr.bf16.mxu0 %v6233_v57 }
 0x7c1   :  { %4710 = vmatmul.mubr.msk.bf16.vlgmr.msra.gmra.mrb[16].mxu0 %vm215_vm0, %v6194_v30 }
 0x7c2   :  { %2533 = vmatpush1.bf16.msra.mxu0 %v6236_v5  ;;  %2564 = vmatprep.mubr.bf16.mxu0 %v5731_v0 }
 0x7c3   :  { %2713 = vmatprep.subr.bf16.mxu0 %v6297_v18 }
 0x7cd   :  { %4715 = vmatmul.mubr.msk.bf16.vlgmr.msra.gmra.mrb[16].mxu0 %vm337_vm2, %v6209_v44 }
 0x7ce   :  { %2714 = vmatpush1.bf16.msra.mxu0 %v6299_v23  ;;  %2745 = vmatprep.mubr.bf16.mxu0 %v5731_v0 }
 0x7cf   :  { %2715 = vmatprep.subr.bf16.mxu0 %v6308_v40 }
 0x7d2   :  { %2716 = vmatpush1.bf16.msra.mxu0 %v6310_v42 }
 0x7d3   :  { %2717 = vmatprep.subr.bf16.mxu0 %v6315_v19 }
 0x7d6   :  { %2718 = vmatpush1.bf16.msra.mxu0 %v6317_v46 }
 0x7d7   :  { %2719 = vmatprep.subr.bf16.mxu0 %v6323_v17 }
 0x7da   :  { %2720 = vmatpush1.bf16.msra.mxu0 %v6325_v47 }
 0x7db   :  { %2721 = vmatprep.subr.bf16.mxu0 %v6329_v48 }
 0x7de   :  { %2722 = vmatpush1.bf16.msra.mxu0 %v6331_v49 }
 0x7df   :  { %2723 = vmatprep.subr.bf16.mxu0 %v6335_v53 }
 0x7e2   :  { %2724 = vmatpush1.bf16.msra.mxu0 %v6337_v37 }
 0x7e3   :  { %2725 = vmatprep.subr.bf16.mxu0 %v6343_v56 }
 0x7e6   :  { %2726 = vmatpush1.bf16.msra.mxu0 %v6341_v55 }
 0x7e7   :  { %2727 = vmatprep.subr.bf16.mxu0 %v6345_v60 }
 0x7ea   :  { %2728 = vmatpush1.bf16.msra.mxu0 %v6349_v14 }
 0x7eb   :  { %2961 = vmatprep.subr.bf16.mxu0 %v6204_v34  ;;  %v5373_v34 = vld [vmem:[#allocation11 + $0x10] sm:$0xff]  }
 0x7ec   :  { %5043 = vmatpush3.bf16.msra.mxu1 %v5373_v34 }
 0x7ed   :  { %5044 = vmatprep.subr.bf16.mxu1 %v5735_v50 }
 0x7f0   :  { %5045 = vmatpush3.bf16.msra.mxu1 %v5374_v7 }
 0x7f1   :  { %5046 = vmatprep.subr.bf16.mxu1 %v5735_v50 }
 0x7f4   :  { %5047 = vmatpush3.bf16.msra.mxu1 %v5375_v3 }
 0x7f5   :  { %5048 = vmatprep.subr.bf16.mxu1 %v5735_v50 }
 0x7f8   :  { %5049 = vmatpush3.bf16.msra.mxu1 %v5376_v43 }
 0x7f9   :  { %5050 = vmatprep.subr.bf16.mxu1 %v5735_v50 }
 0x7fc   :  { %5051 = vmatpush3.bf16.msra.mxu1 %v5377_v8 }
 0x7fd   :  { %5052 = vmatprep.subr.bf16.mxu1 %v5735_v50 }
 0x800   :  { %5053 = vmatpush3.bf16.msra.mxu1 %v5378_v10 }
 0x801   :  { %2458 = vmatprep.subr.bf16.mxu1 %v6263_v20 }
 0x810   :  { %v3990_v24 = vpop.permute.xlu1 %3989 }
 0x811   :  { %v3992_v28 = vmul.f32 %v3990_v24, %v3978_v54 }
 0x813   :  { %v3993_v29 = vadd.f32 %v3992_v28, %v3983_v51  ;;  %v5379_v51 = vld [vmem:[#allocation6 + $0x8] ss:$12 sps:$4 sm:$0xff]  }
 0x815   :  { %v4137_v21 = vpack.c.bf16 %v3993_v29, %v3993_v29 }
 0x817   :  { %4143 = vrot.lane.b32.xlu0 %v4137_v21, %s5733_s22 }
 0x88c   :  { %v2203_v13 = vpop.f32.mrb[12].mxu0 }
 0x88d   :  { %v2205_v38 = vpop.f32.mrb[13].mxu0  ;;  %v5168_v24 = vadd.f32 %v2203_v13, %v6041_v11 }
 0x88e   :  { %v5169_v22 = vadd.f32 %v2205_v38, %v6063_v31  ;;  %v2207_v26 = vpop.f32.mrb[14].mxu0 }
 0x88f   :  { %v2208_v36 = vpop.f32.mrb[15].mxu0  ;;  %v4692_v28 = vmul.f32 -1.442695, %v5168_v24 }
 0x890   :  { %v4693_v16 = vmul.f32 -1.442695, %v5169_v22 }
 0x892   :  { %5508 = vpow2.f32 %v4693_v16 }
 0x89c   :  { %v5509_v39 = vpop.eup %5508 }
 0x89d   :  { %v2219_v32 = vadd.f32 1.0, %v5509_v39 }
 0x89f   :  { %5510 = vrcp.f32 %v2219_v32 }
 0x8a0   :  { %5512 = vpow2.f32 %v4692_v28 }
 0x8a9   :  { %v5511_v2 = vpop.eup %5510 }
 0x8aa   :  { %v2224_v52 = vmul.f32 %v5511_v2, %v6376_v35  ;;  %v5513_v29 = vpop.eup %5512 }
 0x8ab   :  { %v2218_v21 = vadd.f32 1.0, %v5513_v29 }
 0x8ac   :  { %v2225_v54 = vpack.c.bf16 %v2224_v52, %v2224_v52 }
 0x8ae   :  { %5055 = vmatmul.mubr.bf16.vlgmr.msra.gmra.mrb[44].mxu1 %v2225_v54 }
 0x8af   :  { %2459 = vmatpush1.bf16.msra.mxu1 %v6275_v27  ;;  %2490 = vmatprep.mubr.bf16.mxu1 %v5731_v0 }
 0x8b0   :  { %2460 = vmatprep.subr.bf16.mxu1 %v6277_v6 }
 0x8b3   :  { %2461 = vmatpush1.bf16.msra.mxu1 %v6280_v41 }
 0x8b4   :  { %5058 = vmatprep.subr.bf16.mxu1 %v5735_v50 }
 0x8b6   :  { %4711 = vmatmul.mubr.msk.bf16.vlgmr.msra.gmra.mrb[48].mxu1 %vm215_vm0, %v6194_v30  ;;  %v2071_v30 = vadd.f32 %v6373_v25, %v6039_v4 }
 0x8b7   :  { %5059 = vmatpush3.bf16.msra.mxu1 %v5379_v51  ;;  %5060 = vmatprep.mubr.msk.bf16.mxu1 %vm5736_vm1, %v5735_v50 }
 0x8b8   :  { %5064 = vmatprep.subr.bf16.mxu1 %v5735_v50 }
 0x8be   :  { %5061 = vmatmul.mubr.msk.bf16.vlgmr.msra.gmra.mrb[52].mxu1 %vm337_vm2, %v6209_v44 }
 0x8bf   :  { %5080 = vmatprep.mubr.msk.bf16.mxu1 %vm5736_vm1, %v5735_v50 }
 0x981   :  { %v2324_v45 = vpop.f32.mrb[44].mxu1 }
 0x982   :  { %v2330_v62 = vadd.f32 %v2324_v45, %v2071_v30  ;;  %v5056_v34 = vpop.f32.mrb[45].mxu1 }
 0x983   :  { %v2327_v7 = vpop.f32.mrb[46].mxu1 }
 0x984   :  { %5514 = vtanh.f32 %v2330_v62  ;;  %v5057_v3 = vpop.f32.mrb[47].mxu1 }
 0x985   :  { %5516 = vrcp.f32 %v2218_v21 }
 0x989   :  { %v2492_v44 = vpop.f32.mrb[48].mxu1 }
 0x98a   :  { %v2494_v43 = vpop.f32.mrb[49].mxu1 }
 0x98b   :  { %v2499_v8 = vadd.f32 %v6369_v33, %v2494_v43  ;;  %v2496_v10 = vpop.f32.mrb[50].mxu1 }
 0x98c   :  { %v2497_v13 = vpop.f32.mrb[51].mxu1 }
 0x98d   :  { %v2500_v38 = vmax.f32 %v2499_v8, 0.0 }
 0x98e   :  { %v5515_v22 = vpop.eup %5514 }
 0x98f   :  { %v2332_v26 = vsub.f32 %v5515_v22, %v6376_v35  ;;  %v2501_v36 = vsub.f32 0.0, %v2500_v38  ;;  %v5517_v25 = vpop.eup %5516 }
 0x991   :  { %v2333_v16 = vmul.f32 %v5517_v25, %v2332_v26  ;;  %v2502_v39 = vmul.f32 1.442695, %v2501_v36  ;;  %v2607_v32 = vpop.f32.mrb[52].mxu1 }
 0x992   :  { %v6444_v2 = vadd.f32 %v2607_v32, %v2492_v44  ;;  %v5062_v52 = vpop.f32.mrb[53].mxu1 }
 0x993   :  { %v2334_v54 = vadd.f32 %v2333_v16, %v6376_v35  ;;  %5518 = vpow2.f32 %v2502_v39  ;;  %v2610_v51 = vpop.f32.mrb[54].mxu1 }
 0x994   :  { %v5063_v24 = vpop.f32.mrb[55].mxu1 }
 0x995   :  { %v2335_v28 = vpack.c.bf16 %v2334_v54, %v2334_v54 }
 0x997   :  { %2337 = vst [vmem:[#allocation12 + $0x3] sm:$0x1] %v2335_v28 }
 0x99d   :  { %v5519_v29 = vpop.eup %5518 }
 0x99e   :  { %v6447_v30 = vmul.f32 %v5519_v29, %v2334_v54  ;;  %v6516_v29 = vld [vmem:[#allocation8] ss:$16 sps:$4 sm:$0xff]  }
 0x9a0   :  { %v2616_v45 = vpack.c.bf16 %v6447_v30, %v6447_v30 }
 0x9a2   :  { %2746 = vmatmul.mubr.bf16.vlgmr.msra.gmra.mrb[16].mxu0 %v2616_v45 }
 0x9a3   :  { %2962 = vmatpush1.bf16.msra.mxu0 %v6222_v15  ;;  %2993 = vmatprep.mubr.bf16.mxu0 %v5731_v0  ;;  %v5380_v15 = vld [vmem:[#allocation11] sm:$0xff]  }
 0x9a4   :  { %2963 = vmatprep.subr.bf16.mxu0 %v6226_v58  ;;  %5065 = vmatpush3.bf16.msra.mxu1 %v5380_v15  ;;  %v5381_v58 = vld [vmem:[#allocation11 + $0x8] sm:$0xff]   ;;  %v6520_v15 = vld [vmem:[#allocation8 + $0x24] ss:$16 sps:$4 sm:$0xff]  }
 0x9a5   :  { %5066 = vmatprep.subr.bf16.mxu1 %v5735_v50 }
 0x9a7   :  { %2964 = vmatpush1.bf16.msra.mxu0 %v6229_v61  ;;  %v5382_v61 = vld [vmem:[#allocation11 + $0x10] sm:$0xff]  }
 0x9a8   :  { %3076 = vmatprep.subr.bf16.mxu0 %v6233_v57  ;;  %5067 = vmatpush3.bf16.msra.mxu1 %v5381_v58  ;;  %v5383_v57 = vld [vmem:[#allocation11 + $0x18] sm:$0xff]   ;;  %v6523_v58 = vld [vmem:[#allocation8 + $0x20] ss:$16 sps:$4 sm:$0xff]  }
 0x9a9   :  { %5068 = vmatprep.subr.bf16.mxu1 %v5735_v50 }
 0x9aa   :  { %4751 = vmatmul.mubr.msk.bf16.vlgmr.msra.gmra.mrb[20].mxu0 %vm215_vm0, %v6246_v12 }
 0x9ab   :  { %3077 = vmatpush1.bf16.msra.mxu0 %v6236_v5  ;;  %3108 = vmatprep.mubr.bf16.mxu0 %v5731_v0  ;;  %v5384_v5 = vld [vmem:[#allocation11 + $0x20] sm:$0xff]  }
 0x9ac   :  { %3257 = vmatprep.subr.bf16.mxu0 %v6297_v18  ;;  %5069 = vmatpush3.bf16.msra.mxu1 %v5382_v61  ;;  %v5385_v18 = vld [vmem:[#allocation11 + $0x28] sm:$0xff]  }
 0x9ad   :  { %5070 = vmatprep.subr.bf16.mxu1 %v5735_v50  ;;  %v6530_v61 = vld [vmem:[#allocation6] ss:$12 sps:$4 sm:$0xff]  }
 0x9b0   :  { %5071 = vmatpush3.bf16.msra.mxu1 %v5383_v57  ;;  %v5398_v57 = vld [vmem:[#allocation11] sm:$0xff]  }
 0x9b1   :  { %5072 = vmatprep.subr.bf16.mxu1 %v5735_v50 }
 0x9b4   :  { %5073 = vmatpush3.bf16.msra.mxu1 %v5384_v5  ;;  %v5399_v5 = vld [vmem:[#allocation11 + $0x8] sm:$0xff]  }
 0x9b5   :  { %5074 = vmatprep.subr.bf16.mxu1 %v5735_v50 }
 0x9b6   :  { %4756 = vmatmul.mubr.msk.bf16.vlgmr.msra.gmra.mrb[20].mxu0 %vm337_vm2, %v6267_v59 }
 0x9b7   :  { %3258 = vmatpush1.bf16.msra.mxu0 %v6299_v23  ;;  %3289 = vmatprep.mubr.bf16.mxu0 %v5731_v0  ;;  %v5386_v23 = vld [vmem:[#allocation11 + $0x30] sm:$0xff]  }
 0x9b8   :  { %3259 = vmatprep.subr.bf16.mxu0 %v6308_v40  ;;  %5075 = vmatpush3.bf16.msra.mxu1 %v5385_v18  ;;  %v5387_v40 = vld [vmem:[#allocation11 + $0x38] sm:$0xff]   ;;  %v5400_v18 = vld [vmem:[#allocation11 + $0x10] sm:$0xff]  }
 0x9b9   :  { %5076 = vmatprep.subr.bf16.mxu1 %v5735_v50 }
 0x9bb   :  { %3260 = vmatpush1.bf16.msra.mxu0 %v6310_v42 }
 0x9bc   :  { %3261 = vmatprep.subr.bf16.mxu0 %v6315_v19  ;;  %5077 = vmatpush3.bf16.msra.mxu1 %v5386_v23  ;;  %v5401_v23 = vld [vmem:[#allocation11 + $0x18] sm:$0xff]  }
 0x9bd   :  { %5078 = vmatprep.subr.bf16.mxu1 %v5735_v50 }
 0x9bf   :  { %3262 = vmatpush1.bf16.msra.mxu0 %v6317_v46 }
 0x9c0   :  { %3263 = vmatprep.subr.bf16.mxu0 %v6323_v17  ;;  %5079 = vmatpush3.bf16.msra.mxu1 %v5387_v40  ;;  %v5402_v40 = vld [vmem:[#allocation11 + $0x20] sm:$0xff]  }
 0x9c1   :  { %3002 = vmatprep.subr.bf16.mxu1 %v6263_v20  ;;  %v5388_v20 = vld [vmem:[#allocation6 + $0x8] ss:$12 sps:$4 sm:$0xff]  }
 0x9c3   :  { %3264 = vmatpush1.bf16.msra.mxu0 %v6325_v47 }
 0x9c4   :  { %3265 = vmatprep.subr.bf16.mxu0 %v6329_v48 }
 0x9c7   :  { %3266 = vmatpush1.bf16.msra.mxu0 %v6331_v49 }
 0x9c8   :  { %3267 = vmatprep.subr.bf16.mxu0 %v6335_v53 }
 0x9cb   :  { %3268 = vmatpush1.bf16.msra.mxu0 %v6337_v37 }
 0x9cc   :  { %3269 = vmatprep.subr.bf16.mxu0 %v6343_v56 }
 0x9cf   :  { %3270 = vmatpush1.bf16.msra.mxu0 %v6341_v55 }
 0x9d0   :  { %3271 = vmatprep.subr.bf16.mxu0 %v6345_v60  ;;  %v2615_v60 = vadd.f32 %v6444_v2, %v6039_v4 }
 0x9d3   :  { %3272 = vmatpush1.bf16.msra.mxu0 %v6349_v14 }
 0xa75   :  { %v2747_v42 = vpop.f32.mrb[16].mxu0 }
 0xa76   :  { %v2749_v19 = vpop.f32.mrb[17].mxu0 }
 0xa77   :  { %v5171_v46 = vadd.f32 %v2749_v19, %v6063_v31  ;;  %v2751_v17 = vpop.f32.mrb[18].mxu0  ;;  %v5404_v19 = vld [vmem:[#allocation11 + $0x30] sm:$0xff]  }
 0xa78   :  { %v2752_v47 = vpop.f32.mrb[19].mxu0  ;;  %v6547_v17 = vld [vmem:[#allocation8 + $0xc] ss:$16 sps:$4 sm:$0xff]  }
 0xa79   :  { %v4734_v48 = vmul.f32 -1.442695, %v5171_v46  ;;  %v5405_v46 = vld [vmem:[#allocation11 + $0x38] sm:$0xff]  }
 0xa7b   :  { %5520 = vpow2.f32 %v4734_v48 }
 0xa85   :  { %v5521_v49 = vpop.eup %5520 }
 0xa86   :  { %v2763_v53 = vadd.f32 1.0, %v5521_v49 }
 0xa88   :  { %5522 = vrcp.f32 %v2763_v53 }
 0xa92   :  { %v5523_v37 = vpop.eup %5522 }
 0xa93   :  { %v2768_v55 = vmul.f32 %v5523_v37, %v6447_v30 }
 0xa95   :  { %v2769_v56 = vpack.c.bf16 %v2768_v55, %v2768_v55 }
 0xa97   :  { %5081 = vmatmul.mubr.bf16.vlgmr.msra.gmra.mrb[56].mxu1 %v2769_v56 }
 0xa98   :  { %3003 = vmatpush1.bf16.msra.mxu1 %v6275_v27  ;;  %3034 = vmatprep.mubr.bf16.mxu1 %v5731_v0  ;;  %v6503_v27 = vld [vmem:[#allocation8 + $0x4] ss:$16 sps:$4 sm:$0xff]  }
 0xa99   :  { %3004 = vmatprep.subr.bf16.mxu1 %v6277_v6  ;;  %3505 = vmatprep.subr.bf16.mxu0 %v6503_v27  ;;  %v5170_v6 = vadd.f32 %v2747_v42, %v6041_v11  ;;  %v5403_v42 = vld [vmem:[#allocation11 + $0x28] sm:$0xff]  }
 0xa9c   :  { %3005 = vmatpush1.bf16.msra.mxu1 %v6280_v41  ;;  %v4733_v41 = vmul.f32 -1.442695, %v5170_v6 }
 0xa9d   :  { %5084 = vmatprep.subr.bf16.mxu1 %v5735_v50 }
 0xa9e   :  { %5524 = vpow2.f32 %v4733_v41 }
 0xa9f   :  { %4752 = vmatmul.mubr.msk.bf16.vlgmr.msra.gmra.mrb[60].mxu1 %vm215_vm0, %v6246_v12 }
 0xaa0   :  { %5085 = vmatpush3.bf16.msra.mxu1 %v5388_v20  ;;  %5086 = vmatprep.mubr.msk.bf16.mxu1 %vm5736_vm1, %v5735_v50 }
 0xaa1   :  { %5090 = vmatprep.subr.bf16.mxu1 %v5735_v50 }
 0xaa7   :  { %5087 = vmatmul.mubr.msk.bf16.vlgmr.msra.gmra.mrb[64].mxu1 %vm337_vm2, %v6267_v59 }
 0xaa8   :  { %5106 = vmatprep.mubr.msk.bf16.mxu1 %vm5736_vm1, %v5735_v50  ;;  %v5525_v12 = vpop.eup %5524  ;;  %5091 = vmatpush3.bf16.msra.mxu1 %v5398_v57 }
 0xaa9   :  { %v2762_v35 = vadd.f32 1.0, %v5525_v12  ;;  %5092 = vmatprep.subr.bf16.mxu1 %v5735_v50  ;;  %v6552_v12 = vld [vmem:[#allocation8 + $0x8] ss:$16 sps:$4 sm:$0xff]  }
 0xaac   :  { %5093 = vmatpush3.bf16.msra.mxu1 %v5399_v5 }
 0xaad   :  { %5094 = vmatprep.subr.bf16.mxu1 %v5735_v50 }
 0xab0   :  { %5095 = vmatpush3.bf16.msra.mxu1 %v5400_v18 }
 0xab1   :  { %5096 = vmatprep.subr.bf16.mxu1 %v5735_v50 }
 0xab4   :  { %5097 = vmatpush3.bf16.msra.mxu1 %v5401_v23 }
 0xab5   :  { %5098 = vmatprep.subr.bf16.mxu1 %v5735_v50 }
 0xab8   :  { %5099 = vmatpush3.bf16.msra.mxu1 %v5402_v40 }
 0xab9   :  { %5100 = vmatprep.subr.bf16.mxu1 %v5735_v50 }
 0xabc   :  { %5101 = vmatpush3.bf16.msra.mxu1 %v5403_v42 }
 0xabd   :  { %5102 = vmatprep.subr.bf16.mxu1 %v5735_v50 }
 0xac0   :  { %5103 = vmatpush3.bf16.msra.mxu1 %v5404_v19 }
 0xac1   :  { %5104 = vmatprep.subr.bf16.mxu1 %v5735_v50 }
 0xac4   :  { %5105 = vmatpush3.bf16.msra.mxu1 %v5405_v46 }
 0xac5   :  { %3546 = vmatprep.subr.bf16.mxu1 %v6547_v17 }
 0xb6a   :  { %v2868_v14 = vpop.f32.mrb[56].mxu1 }
 0xb6b   :  { %v2874_v21 = vadd.f32 %v2868_v14, %v2615_v60  ;;  %v5082_v62 = vpop.f32.mrb[57].mxu1  ;;  %v6554_v14 = vld [vmem:[#allocation8 + $0x2c] ss:$16 sps:$4 sm:$0xff]  }
 0xb6c   :  { %v2871_v59 = vpop.f32.mrb[58].mxu1  ;;  %v6572_v62 = vld [vmem:[#allocation9 + $0x4] ss:$8 sps:$4 sm:$0xff]  }
 0xb6d   :  { %5526 = vtanh.f32 %v2874_v21  ;;  %v5083_v34 = vpop.f32.mrb[59].mxu1  ;;  %v5412_v21 = vld [vmem:[#allocation6 + $0x8] ss:$12 sps:$4 sm:$0xff]   ;;  %v6574_v59 = vld [vmem:[#allocation9] ss:$8 sps:$4 sm:$0xff]  }
 0xb6e   :  { %5528 = vrcp.f32 %v2762_v35  ;;  %v6557_v35 = vld [vmem:[#allocation8 + $0x28] ss:$16 sps:$4 sm:$0xff]  }
 0xb6f   :  { %v6580_v34 = vld [vmem:[#allocation9 + $0x10] ss:$8 sps:$4 sm:$0xff]  }
 0xb72   :  { %v3036_v7 = vpop.f32.mrb[60].mxu1 }
 0xb73   :  { %v3038_v3 = vpop.f32.mrb[61].mxu1 }
 0xb74   :  { %v3043_v44 = vadd.f32 %v6369_v33, %v3038_v3  ;;  %v3040_v43 = vpop.f32.mrb[62].mxu1  ;;  %v6590_v3 = vld [vmem:[#allocation9 + $0x34] ss:$8 sps:$4 sm:$0xff]  }
 0xb75   :  { %v3041_v8 = vpop.f32.mrb[63].mxu1  ;;  %v6596_v43 = vld [vmem:[#allocation9 + $0x44] ss:$8 sps:$4 sm:$0xff]  }
 0xb76   :  { %v3044_v10 = vmax.f32 %v3043_v44, 0.0  ;;  %v6592_v44 = vld [vmem:[#allocation9 + $0x30] ss:$8 sps:$4 sm:$0xff]   ;;  %v6598_v8 = vld [vmem:[#allocation9 + $0x40] ss:$8 sps:$4 sm:$0xff]  }
 0xb77   :  { %v5527_v13 = vpop.eup %5526 }
 0xb78   :  { %v2876_v38 = vsub.f32 %v5527_v13, %v6447_v30  ;;  %v3045_v22 = vsub.f32 0.0, %v3044_v10  ;;  %v5529_v26 = vpop.eup %5528  ;;  %v6602_v10 = vld [vmem:[#allocation9 + $0x54] ss:$8 sps:$4 sm:$0xff]   ;;  %v6604_v13 = vld [vmem:[#allocation9 + $0x50] ss:$8 sps:$4 sm:$0xff]  }
 0xb7a   :  { %v2877_v36 = vmul.f32 %v5529_v26, %v2876_v38  ;;  %v3046_v25 = vmul.f32 1.442695, %v3045_v22  ;;  %v3151_v16 = vpop.f32.mrb[64].mxu1  ;;  %v6608_v38 = vld [vmem:[#allocation9 + $0x60] ss:$8 sps:$4 sm:$0xff]  }
 0xb7b   :  { %v6511_v39 = vadd.f32 %v3151_v16, %v3036_v7  ;;  %v5088_v32 = vpop.f32.mrb[65].mxu1  ;;  %v6586_v7 = vld [vmem:[#allocation9 + $0x20] ss:$8 sps:$4 sm:$0xff]   ;;  %v6610_v22 = vld [vmem:[#allocation9 + $0x64] ss:$8 sps:$4 sm:$0xff]  }
 0xb7c   :  { %v2878_v2 = vadd.f32 %v2877_v36, %v6447_v30  ;;  %5530 = vpow2.f32 %v3046_v25  ;;  %v3154_v52 = vpop.f32.mrb[66].mxu1  ;;  %v6527_v30 = vld [vmem:[#allocation6 + $0x4] ss:$12 sps:$4 sm:$0xff]   ;;  %v6612_v26 = vld [vmem:[#allocation9 + $0x74] ss:$8 sps:$4 sm:$0xff]  }
 0xb7d   :  { %v5089_v54 = vpop.f32.mrb[67].mxu1  ;;  %v6616_v36 = vld [vmem:[#allocation9 + $0x70] ss:$8 sps:$4 sm:$0xff]  }
 0xb7e   :  { %v2879_v51 = vpack.c.bf16 %v2878_v2, %v2878_v2 }
 0xb80   :  { %2881 = vst [vmem:[#allocation12 + $0x4] sm:$0x1] %v2879_v51 }
 0xb86   :  { %v5531_v24 = vpop.eup %5530 }
 0xb87   :  { %v6514_v28 = vmul.f32 %v5531_v24, %v2878_v2  ;;  %v3159_v2 = vadd.f32 %v6511_v39, %v6039_v4 }
 0xb89   :  { %v3160_v45 = vpack.c.bf16 %v6514_v28, %v6514_v28 }
 0xb8b   :  { %3290 = vmatmul.mubr.bf16.vlgmr.msra.gmra.mrb[20].mxu0 %v3160_v45 }
 0xb8c   :  { %3506 = vmatpush1.bf16.msra.mxu0 %v6516_v29  ;;  %3537 = vmatprep.mubr.bf16.mxu0 %v5731_v0 }
 0xb8d   :  { %3507 = vmatprep.subr.bf16.mxu0 %v6520_v15 }
 0xb90   :  { %3508 = vmatpush1.bf16.msra.mxu0 %v6523_v58 }
 0xb91   :  { %3620 = vmatprep.subr.bf16.mxu0 %v6527_v30 }
 0xb93   :  { %4792 = vmatmul.mubr.msk.bf16.vlgmr.msra.gmra.mrb[24].mxu0 %vm215_vm0, %v6295_v1 }
 0xb94   :  { %3621 = vmatpush1.bf16.msra.mxu0 %v6530_v61  ;;  %3652 = vmatprep.mubr.bf16.mxu0 %v5731_v0 }
 0xb95   :  { %3801 = vmatprep.subr.bf16.mxu0 %v6572_v62 }
 0xb9f   :  { %4797 = vmatmul.mubr.msk.bf16.vlgmr.msra.gmra.mrb[24].mxu0 %vm337_vm2, %v6357_v63 }
 0xba0   :  { %3833 = vmatprep.mubr.bf16.mxu0 %v5731_v0  ;;  %3802 = vmatpush1.bf16.msra.mxu0 %v6574_v59 }
 0xc5e   :  { %v3291_v47 = vpop.f32.mrb[20].mxu0 }
 0xc5f   :  { %v3293_v48 = vpop.f32.mrb[21].mxu0  ;;  %v5172_v25 = vadd.f32 %v3291_v47, %v6041_v11 }
 0xc60   :  { %v5173_v49 = vadd.f32 %v3293_v48, %v6063_v31  ;;  %v3295_v53 = vpop.f32.mrb[22].mxu0 }
 0xc61   :  { %v3296_v37 = vpop.f32.mrb[23].mxu0  ;;  %v4774_v16 = vmul.f32 -1.442695, %v5172_v25 }
 0xc62   :  { %v4775_v55 = vmul.f32 -1.442695, %v5173_v49 }
 0xc64   :  { %5532 = vpow2.f32 %v4775_v55 }
 0xc6e   :  { %v5533_v56 = vpop.eup %5532 }
 0xc6f   :  { %v3307_v20 = vadd.f32 1.0, %v5533_v56 }
 0xc71   :  { %5534 = vrcp.f32 %v3307_v20 }
 0xc72   :  { %5536 = vpow2.f32 %v4774_v16 }
 0xc7b   :  { %v5535_v6 = vpop.eup %5534 }
 0xc7c   :  { %v3312_v41 = vmul.f32 %v5535_v6, %v6514_v28  ;;  %v5537_v32 = vpop.eup %5536 }
 0xc7d   :  { %v3306_v54 = vadd.f32 1.0, %v5537_v32 }
 0xc7e   :  { %v3313_v60 = vpack.c.bf16 %v3312_v41, %v3312_v41 }
 0xc80   :  { %5107 = vmatmul.mubr.bf16.vlgmr.msra.gmra.mrb[68].mxu1 %v3313_v60 }
 0xc81   :  { %3547 = vmatpush1.bf16.msra.mxu1 %v6552_v12  ;;  %3578 = vmatprep.mubr.bf16.mxu1 %v5731_v0 }
 0xc82   :  { %3548 = vmatprep.subr.bf16.mxu1 %v6554_v14 }
 0xc85   :  { %3549 = vmatpush1.bf16.msra.mxu1 %v6557_v35 }
 0xc86   :  { %5110 = vmatprep.subr.bf16.mxu1 %v5735_v50 }
 0xc88   :  { %4793 = vmatmul.mubr.msk.bf16.vlgmr.msra.gmra.mrb[72].mxu1 %vm215_vm0, %v6295_v1  ;;  %v6578_v1 = vld [vmem:[#allocation9 + $0x14] ss:$8 sps:$4 sm:$0xff]  }
 0xc89   :  { %5111 = vmatpush3.bf16.msra.mxu1 %v5412_v21  ;;  %5112 = vmatprep.mubr.msk.bf16.mxu1 %vm5736_vm1, %v5735_v50 }
 0xc8a   :  { %5116 = vmatprep.subr.bf16.mxu1 %v5735_v50  ;;  %3803 = vmatprep.subr.bf16.mxu0 %v6578_v1 }
 0xc8b   :  { %3804 = vmatpush1.bf16.msra.mxu0 %v6580_v34 }
 0xc90   :  { %5113 = vmatmul.mubr.msk.bf16.vlgmr.msra.gmra.mrb[76].mxu1 %vm337_vm2, %v6357_v63  ;;  %v6584_v63 = vld [vmem:[#allocation9 + $0x24] ss:$8 sps:$4 sm:$0xff]  }
 0xc91   :  { %5132 = vmatprep.mubr.msk.bf16.mxu1 %vm5736_vm1, %v5735_v50  ;;  %3805 = vmatprep.subr.bf16.mxu0 %v6584_v63 }
 0xc92   :  { %3806 = vmatpush1.bf16.msra.mxu0 %v6586_v7 }
 0xc93   :  { %3807 = vmatprep.subr.bf16.mxu0 %v6590_v3 }
 0xc96   :  { %3808 = vmatpush1.bf16.msra.mxu0 %v6592_v44 }
 0xc97   :  { %3809 = vmatprep.subr.bf16.mxu0 %v6596_v43 }
 0xc9a   :  { %3810 = vmatpush1.bf16.msra.mxu0 %v6598_v8 }
 0xc9b   :  { %3811 = vmatprep.subr.bf16.mxu0 %v6602_v10 }
 0xc9e   :  { %3812 = vmatpush1.bf16.msra.mxu0 %v6604_v13 }
 0xc9f   :  { %3813 = vmatprep.subr.bf16.mxu0 %v6610_v22 }
 0xca2   :  { %3814 = vmatpush1.bf16.msra.mxu0 %v6608_v38 }
 0xca3   :  { %3815 = vmatprep.subr.bf16.mxu0 %v6612_v26 }
 0xca6   :  { %3816 = vmatpush1.bf16.msra.mxu0 %v6616_v36 }
 0xca7   :  { %4049 = vmatprep.subr.bf16.mxu0 %v6503_v27 }
 0xd53   :  { %v3412_v52 = vpop.f32.mrb[68].mxu1 }
 0xd54   :  { %v3418_v51 = vadd.f32 %v3412_v52, %v3159_v2  ;;  %v5108_v24 = vpop.f32.mrb[69].mxu1 }
 0xd55   :  { %v3415_v45 = vpop.f32.mrb[70].mxu1 }
 0xd56   :  { %5538 = vtanh.f32 %v3418_v51  ;;  %v5109_v57 = vpop.f32.mrb[71].mxu1 }
 0xd57   :  { %5540 = vrcp.f32 %v3306_v54 }
 0xd5b   :  { %v3580_v5 = vpop.f32.mrb[72].mxu1 }
 0xd5c   :  { %v3582_v18 = vpop.f32.mrb[73].mxu1 }
 0xd5d   :  { %v3587_v27 = vadd.f32 %v6369_v33, %v3582_v18  ;;  %v3584_v23 = vpop.f32.mrb[74].mxu1 }
 0xd5e   :  { %v3585_v40 = vpop.f32.mrb[75].mxu1 }
 0xd5f   :  { %v3588_v42 = vmax.f32 %v3587_v27, 0.0 }
 0xd60   :  { %v5539_v19 = vpop.eup %5538 }
 0xd61   :  { %v3420_v46 = vsub.f32 %v5539_v19, %v6514_v28  ;;  %v3589_v47 = vsub.f32 0.0, %v3588_v42  ;;  %v5541_v39 = vpop.eup %5540 }
 0xd63   :  { %v3421_v48 = vmul.f32 %v5541_v39, %v3420_v46  ;;  %v3590_v49 = vmul.f32 1.442695, %v3589_v47  ;;  %v3695_v53 = vpop.f32.mrb[76].mxu1 }
 0xd64   :  { %v6626_v37 = vadd.f32 %v3695_v53, %v3580_v5  ;;  %v5114_v55 = vpop.f32.mrb[77].mxu1 }
 0xd65   :  { %v3422_v56 = vadd.f32 %v3421_v48, %v6514_v28  ;;  %5542 = vpow2.f32 %v3590_v49  ;;  %v3698_v20 = vpop.f32.mrb[78].mxu1  ;;  %v6643_v28 = vpop.permute.xlu0 %4143 }
 0xd66   :  { %v5115_v6 = vpop.f32.mrb[79].mxu1  ;;  %v5447_v20 = vld [vmem:[#allocation11 + $0x8] sm:$0xff]  }
 0xd67   :  { %v3423_v41 = vpack.c.bf16 %v3422_v56, %v3422_v56  ;;  %v5448_v6 = vld [vmem:[#allocation11 + $0x10] sm:$0xff]  }
 0xd69   :  { %3425 = vst [vmem:[#allocation12 + $0x5] sm:$0x1] %v3423_v41  ;;  %v5449_v41 = vld [vmem:[#allocation11 + $0x18] sm:$0xff]  }
 0xd6f   :  { %v5543_v60 = vpop.eup %5542 }
 0xd70   :  { %v6629_v21 = vmul.f32 %v5543_v60, %v3422_v56  ;;  %v5446_v56 = vld [vmem:[#allocation11] sm:$0xff]  }
 0xd71   :  { %v5450_v60 = vld [vmem:[#allocation11 + $0x20] sm:$0xff]  }
 0xd72   :  { %v3704_v25 = vpack.c.bf16 %v6629_v21, %v6629_v21 }
 0xd74   :  { %3834 = vmatmul.mubr.bf16.vlgmr.msra.gmra.mrb[24].mxu0 %v3704_v25  ;;  %v5452_v25 = vld [vmem:[#allocation11 + $0x30] sm:$0xff]  }
 0xd75   :  { %4050 = vmatpush1.bf16.msra.mxu0 %v6516_v29  ;;  %4081 = vmatprep.mubr.bf16.mxu0 %v5731_v0  ;;  %v5437_v29 = vld [vmem:[#allocation11] sm:$0xff]  }
 0xd76   :  { %4051 = vmatprep.subr.bf16.mxu0 %v6520_v15  ;;  %5117 = vmatpush3.bf16.msra.mxu1 %v5437_v29  ;;  %v5438_v15 = vld [vmem:[#allocation11 + $0x8] sm:$0xff]  }
 0xd77   :  { %5118 = vmatprep.subr.bf16.mxu1 %v5735_v50 }
 0xd79   :  { %4052 = vmatpush1.bf16.msra.mxu0 %v6523_v58  ;;  %v5439_v58 = vld [vmem:[#allocation11 + $0x10] sm:$0xff]  }
 0xd7a   :  { %4164 = vmatprep.subr.bf16.mxu0 %v6527_v30  ;;  %5119 = vmatpush3.bf16.msra.mxu1 %v5438_v15  ;;  %v5440_v30 = vld [vmem:[#allocation11 + $0x18] sm:$0xff]  }
 0xd7b   :  { %5120 = vmatprep.subr.bf16.mxu1 %v5735_v50 }
 0xd7c   :  { %4833 = vmatmul.mubr.msk.bf16.vlgmr.msra.gmra.mrb[28].mxu0 %vm215_vm0, %v6409_v9 }
 0xd7d   :  { %4165 = vmatpush1.bf16.msra.mxu0 %v6530_v61  ;;  %4196 = vmatprep.mubr.bf16.mxu0 %v5731_v0  ;;  %v5441_v61 = vld [vmem:[#allocation11 + $0x20] sm:$0xff]  }
 0xd7e   :  { %4345 = vmatprep.subr.bf16.mxu0 %v6572_v62  ;;  %5121 = vmatpush3.bf16.msra.mxu1 %v5439_v58  ;;  %v5442_v62 = vld [vmem:[#allocation11 + $0x28] sm:$0xff]  }
 0xd7f   :  { %5122 = vmatprep.subr.bf16.mxu1 %v5735_v50 }
 0xd82   :  { %5123 = vmatpush3.bf16.msra.mxu1 %v5440_v30 }
 0xd83   :  { %5124 = vmatprep.subr.bf16.mxu1 %v5735_v50 }
 0xd86   :  { %5125 = vmatpush3.bf16.msra.mxu1 %v5441_v61 }
 0xd87   :  { %5126 = vmatprep.subr.bf16.mxu1 %v5735_v50 }
 0xd88   :  { %4838 = vmatmul.mubr.msk.bf16.vlgmr.msra.gmra.mrb[28].mxu0 %vm337_vm2, %v6643_v28 }
 0xd89   :  { %4346 = vmatpush1.bf16.msra.mxu0 %v6574_v59  ;;  %4377 = vmatprep.mubr.bf16.mxu0 %v5731_v0  ;;  %v5443_v59 = vld [vmem:[#allocation11 + $0x30] sm:$0xff]  }
 0xd8a   :  { %4347 = vmatprep.subr.bf16.mxu0 %v6578_v1  ;;  %5127 = vmatpush3.bf16.msra.mxu1 %v5442_v62  ;;  %v5444_v1 = vld [vmem:[#allocation11 + $0x38] sm:$0xff]  }
 0xd8b   :  { %5128 = vmatprep.subr.bf16.mxu1 %v5735_v50 }
 0xd8d   :  { %4348 = vmatpush1.bf16.msra.mxu0 %v6580_v34 }
 0xd8e   :  { %4349 = vmatprep.subr.bf16.mxu0 %v6584_v63  ;;  %5129 = vmatpush3.bf16.msra.mxu1 %v5443_v59 }
 0xd8f   :  { %5130 = vmatprep.subr.bf16.mxu1 %v5735_v50 }
 0xd91   :  { %4350 = vmatpush1.bf16.msra.mxu0 %v6586_v7 }
 0xd92   :  { %4351 = vmatprep.subr.bf16.mxu0 %v6590_v3  ;;  %5131 = vmatpush3.bf16.msra.mxu1 %v5444_v1 }
 0xd93   :  { %4090 = vmatprep.subr.bf16.mxu1 %v6547_v17  ;;  %v5445_v17 = vld [vmem:[#allocation6 + $0x8] ss:$12 sps:$4 sm:$0xff]  }
 0xd95   :  { %4352 = vmatpush1.bf16.msra.mxu0 %v6592_v44 }
 0xd96   :  { %4353 = vmatprep.subr.bf16.mxu0 %v6596_v43 }
 0xd99   :  { %4354 = vmatpush1.bf16.msra.mxu0 %v6598_v8 }
 0xd9a   :  { %4355 = vmatprep.subr.bf16.mxu0 %v6602_v10 }
 0xd9d   :  { %4356 = vmatpush1.bf16.msra.mxu0 %v6604_v13 }
 0xd9e   :  { %4357 = vmatprep.subr.bf16.mxu0 %v6610_v22 }
 0xda1   :  { %4358 = vmatpush1.bf16.msra.mxu0 %v6608_v38 }
 0xda2   :  { %4359 = vmatprep.subr.bf16.mxu0 %v6612_v26 }
 0xda5   :  { %4360 = vmatpush1.bf16.msra.mxu0 %v6616_v36 }
 0xe47   :  { %v3835_v34 = vpop.f32.mrb[24].mxu0 }
 0xe48   :  { %v3837_v63 = vpop.f32.mrb[25].mxu0 }
 0xe49   :  { %v5175_v7 = vadd.f32 %v3837_v63, %v6063_v31  ;;  %v3839_v3 = vpop.f32.mrb[26].mxu0 }
 0xe4a   :  { %v3840_v44 = vpop.f32.mrb[27].mxu0 }
 0xe4b   :  { %v4816_v43 = vmul.f32 -1.442695, %v5175_v7 }
 0xe4d   :  { %5544 = vpow2.f32 %v4816_v43 }
 0xe57   :  { %v5545_v8 = vpop.eup %5544 }
 0xe58   :  { %v3851_v10 = vadd.f32 1.0, %v5545_v8 }
 0xe5a   :  { %5546 = vrcp.f32 %v3851_v10 }
 0xe64   :  { %v5547_v13 = vpop.eup %5546 }
 0xe65   :  { %v3856_v38 = vmul.f32 %v5547_v13, %v6629_v21 }
 0xe67   :  { %v3857_v22 = vpack.c.bf16 %v3856_v38, %v3856_v38 }
 0xe69   :  { %5133 = vmatmul.mubr.bf16.vlgmr.msra.gmra.mrb[80].mxu1 %v3857_v22 }
 0xe6a   :  { %4091 = vmatpush1.bf16.msra.mxu1 %v6552_v12  ;;  %4122 = vmatprep.mubr.bf16.mxu1 %v5731_v0  ;;  %v5174_v0 = vadd.f32 %v3835_v34, %v6041_v11 }
 0xe6b   :  { %4092 = vmatprep.subr.bf16.mxu1 %v6554_v14 }
 0xe6c   :  { %v4815_v12 = vmul.f32 -1.442695, %v5174_v0 }
 0xe6e   :  { %4093 = vmatpush1.bf16.msra.mxu1 %v6557_v35  ;;  %5548 = vpow2.f32 %v4815_v12 }
 0xe6f   :  { %5136 = vmatprep.subr.bf16.mxu1 %v5735_v50 }
 0xe71   :  { %4834 = vmatmul.mubr.msk.bf16.vlgmr.msra.gmra.mrb[84].mxu1 %vm215_vm0, %v6409_v9  ;;  %v3703_v9 = vadd.f32 %v6626_v37, %v6039_v4 }
 0xe72   :  { %5137 = vmatpush3.bf16.msra.mxu1 %v5445_v17  ;;  %5138 = vmatprep.mubr.msk.bf16.mxu1 %vm5736_vm1, %v5735_v50 }
 0xe73   :  { %5142 = vmatprep.subr.bf16.mxu1 %v5735_v50 }
 0xe78   :  { %v5549_v14 = vpop.eup %5548 }
 0xe79   :  { %5139 = vmatmul.mubr.msk.bf16.vlgmr.msra.gmra.mrb[88].mxu1 %vm337_vm2, %v6643_v28  ;;  %v3850_v26 = vadd.f32 1.0, %v5549_v14  ;;  %v5453_v28 = vld [vmem:[#allocation11 + $0x38] sm:$0xff]  }
 0xe7a   :  { %5158 = vmatprep.mubr.msk.bf16.mxu1 %vm5736_vm1, %v5735_v50  ;;  %5143 = vmatpush3.bf16.msra.mxu1 %v5446_v56 }
 0xe7b   :  { %5144 = vmatprep.subr.bf16.mxu1 %v5735_v50 }
 0xe7e   :  { %5145 = vmatpush3.bf16.msra.mxu1 %v5447_v20 }
 0xe7f   :  { %5146 = vmatprep.subr.bf16.mxu1 %v5735_v50 }
 0xe82   :  { %5147 = vmatpush3.bf16.msra.mxu1 %v5448_v6 }
 0xe83   :  { %5148 = vmatprep.subr.bf16.mxu1 %v5735_v50 }
 0xe86   :  { %5149 = vmatpush3.bf16.msra.mxu1 %v5449_v41 }
 0xe87   :  { %5150 = vmatprep.subr.bf16.mxu1 %v5735_v50 }
 0xe8a   :  { %5151 = vmatpush3.bf16.msra.mxu1 %v5450_v60 }
 0xe8b   :  { %5152 = vmatprep.subr.bf16.mxu1 %v5735_v50 }
 0xf3c   :  { %v3956_v35 = vpop.f32.mrb[80].mxu1 }
 0xf3d   :  { %v3962_v36 = vadd.f32 %v3956_v35, %v3703_v9  ;;  %v5134_v16 = vpop.f32.mrb[81].mxu1 }
 0xf3e   :  { %v3959_v32 = vpop.f32.mrb[82].mxu1 }
 0xf3f   :  { %5550 = vtanh.f32 %v3962_v36  ;;  %v5135_v2 = vpop.f32.mrb[83].mxu1 }
 0xf40   :  { %5552 = vrcp.f32 %v3850_v26 }
 0xf44   :  { %v4124_v52 = vpop.f32.mrb[84].mxu1 }
 0xf45   :  { %v4126_v54 = vpop.f32.mrb[85].mxu1 }
 0xf46   :  { %v4131_v51 = vadd.f32 %v6369_v33, %v4126_v54  ;;  %v4128_v24 = vpop.f32.mrb[86].mxu1 }
 0xf47   :  { %v4129_v45 = vpop.f32.mrb[87].mxu1 }
 0xf48   :  { %v4132_v57 = vmax.f32 %v4131_v51, 0.0 }
 0xf49   :  { %v5551_v5 = vpop.eup %5550 }
 0xf4a   :  { %v3964_v18 = vsub.f32 %v5551_v5, %v6629_v21  ;;  %v4133_v27 = vsub.f32 0.0, %v4132_v57  ;;  %v5553_v23 = vpop.eup %5552 }
 0xf4c   :  { %v3965_v40 = vmul.f32 %v5553_v23, %v3964_v18  ;;  %v4134_v42 = vmul.f32 1.442695, %v4133_v27  ;;  %v4239_v19 = vpop.f32.mrb[88].mxu1 }
 0xf4d   :  { %v4240_v46 = vadd.f32 %v4239_v19, %v4124_v52  ;;  %v5140_v47 = vpop.f32.mrb[89].mxu1 }
 0xf4e   :  { %v3966_v39 = vadd.f32 %v3965_v40, %v6629_v21  ;;  %5554 = vpow2.f32 %v4134_v42  ;;  %v4242_v48 = vpop.f32.mrb[90].mxu1  ;;  %v5451_v21 = vld [vmem:[#allocation11 + $0x28] sm:$0xff]  }
 0xf4f   :  { %v5141_v49 = vpop.f32.mrb[91].mxu1  ;;  %5153 = vmatpush3.bf16.msra.mxu1 %v5451_v21  ;;  %v4247_v43 = vadd.f32 %v4240_v46, %v6039_v4 }
 0xf50   :  { %v3967_v53 = vpack.c.bf16 %v3966_v39, %v3966_v39  ;;  %5154 = vmatprep.subr.bf16.mxu1 %v5735_v50 }
 0xf52   :  { %3969 = vst [vmem:[#allocation12 + $0x6] sm:$0x1] %v3967_v53 }
 0xf53   :  { %5155 = vmatpush3.bf16.msra.mxu1 %v5452_v25 }
 0xf54   :  { %5156 = vmatprep.subr.bf16.mxu1 %v5735_v50 }
 0xf57   :  { %5157 = vmatpush3.bf16.msra.mxu1 %v5453_v28 }
 0xf58   :  { %v5555_v33 = vpop.eup %5554 }
 0xf59   :  { %v4136_v37 = vmul.f32 %v5555_v33, %v3966_v39 }
 0xf5b   :  { %v4248_v55 = vpack.c.bf16 %v4136_v37, %v4136_v37 }
 0xf5d   :  { %4378 = vmatmul.mubr.bf16.vlgmr.msra.gmra.mrb[28].mxu0 %v4248_v55 }
0x1030   :  { %v4379_v29 = vpop.f32.mrb[28].mxu0 }
0x1031   :  { %v4381_v15 = vpop.f32.mrb[29].mxu0  ;;  %v5176_v3 = vadd.f32 %v4379_v29, %v6041_v11 }
0x1032   :  { %v5177_v58 = vadd.f32 %v4381_v15, %v6063_v31  ;;  %v4383_v30 = vpop.f32.mrb[30].mxu0 }
0x1033   :  { %v4384_v61 = vpop.f32.mrb[31].mxu0  ;;  %v4856_v44 = vmul.f32 -1.442695, %v5176_v3 }
0x1034   :  { %v4857_v62 = vmul.f32 -1.442695, %v5177_v58 }
0x1036   :  { %5556 = vpow2.f32 %v4857_v62 }
0x1040   :  { %v5557_v59 = vpop.eup %5556 }
0x1041   :  { %v4395_v1 = vadd.f32 1.0, %v5557_v59 }
0x1043   :  { %5558 = vrcp.f32 %v4395_v1 }
0x1044   :  { %5560 = vpow2.f32 %v4856_v44 }
0x104d   :  { %v5559_v34 = vpop.eup %5558 }
0x104e   :  { %v4400_v63 = vmul.f32 %v5559_v34, %v4136_v37  ;;  %v5561_v50 = vpop.eup %5560 }
0x104f   :  { %v4394_v31 = vadd.f32 1.0, %v5561_v50 }
0x1050   :  { %v4401_v7 = vpack.c.bf16 %v4400_v63, %v4400_v63 }
0x1052   :  { %5159 = vmatmul.mubr.bf16.vlgmr.msra.gmra.mrb[92].mxu1 %v4401_v7 }
0x1125   :  { %v4500_v8 = vpop.f32.mrb[92].mxu1 }
0x1126   :  { %v4506_v10 = vadd.f32 %v4500_v8, %v4247_v43  ;;  %v5160_v13 = vpop.f32.mrb[93].mxu1 }
0x1127   :  { %v4503_v38 = vpop.f32.mrb[94].mxu1 }
0x1128   :  { %5562 = vtanh.f32 %v4506_v10  ;;  %v5161_v22 = vpop.f32.mrb[95].mxu1 }
0x1129   :  { %5564 = vrcp.f32 %v4394_v31 }
0x1132   :  { %v5563_v17 = vpop.eup %5562 }
0x1133   :  { %v4508_v0 = vsub.f32 %v5563_v17, %v4136_v37  ;;  %v5565_v12 = vpop.eup %5564 }
0x1135   :  { %v4509_v14 = vmul.f32 %v5565_v12, %v4508_v0 }
0x1137   :  { %v4510_v11 = vadd.f32 %v4509_v14, %v4136_v37 }
0x1139   :  { %v4511_v9 = vpack.c.bf16 %v4510_v11, %v4510_v11  ;;  %4514 = vst [vmem:[#allocation2] sm:$0x3] %v4510_v11 }
0x113b   :  { %4513 = vst [vmem:[#allocation12 + $0x7] sm:$0x1] %v4511_v9 }
0x113c   :  { %5697 = shalt.err (!%p5694_p2)
}
0x113d   :  { %s5698_s28 = scalar_lea.hbm %s6727_s10, 128 }
0x113e   :  { %p5699_p3 = scmp.ne.s32.totalorder %s6727_s10, %s5698_s28  ;;  %p5702_p4 = scmp.lt.u32.totalorder %s5698_s28, %s6727_s10 }
0x1140   :  { %p5704_p5 = pnand %p5702_p4, %p5699_p3 }
0x1142   :  { %5707 = shalt.err (!%p5704_p5)
}
0x1143   :  { %s5738_s5 = smov 1  }
0x1144   :  { %4526 = dma.vmem_to_hbm [thread:$0]  %s4521_s26, 128, %s6727_s10, [#allocation5], %s5727_s21, %s5727_s21, %s5738_s5  }
0x1145   :  { %5714 = dma.done.wait [#allocation5], 128  }
0x1146   :  { %5715 = vsyncadd [#allocation5], 4294967168 }
0x1147   :  { %4530 = vsyncpa [#allocation4], 1 }
0x1148   :  { %4531 = vsyncpa [#allocation7], 1 }
0x1149   :  { %4532 = vsyncpa [#allocation10], 1 }
0x114a   :  { %4533 = vsyncpa [#allocation5], 1 }

</bundles_post_ra>
